<compile_context>
chip_gen: v6e
topology: v6e:2x2x1
jax: 0.10.0
libtpu: 0.0.40
codegen_flags: <defaults>
</compile_context>

<pallas_src>
import functools
import math

import jax
import jax.numpy as jnp
from jax.experimental import pallas as pl
from jax.experimental.pallas import tpu as pltpu

_F32 = jnp.float32
_BF16 = jnp.bfloat16


# ------------------------------ small helpers ------------------------------

def _round_up(x, m):
    return ((x + m - 1) // m) * m


def _pad2(a, rows, cols):
    r, c = a.shape
    if r == rows and c == cols:
        return a
    return jnp.pad(a, ((0, rows - r), (0, cols - c)))


def _pick_seq_tile(n, cap=256):
    """Largest tile in {cap,128,...,8} that divides n, else the full extent."""
    for t in (cap, 128, 64, 32, 16, 8):
        if t <= n and n % t == 0:
            return t
    return n


@functools.lru_cache(maxsize=None)
def _vmem_capacity_bytes():
    cap = 64 * 1024 * 1024          # conservative default (v7x per-TC VMEM)
    try:
        info = pltpu.get_tpu_info()
        cap = int(getattr(info, "vmem_capacity_bytes", cap))
    except Exception:
        pass
    return cap


def _vmem_limit_bytes():
    # ~25% headroom below physical VMEM (review: generation-aware limit).
    return (_vmem_capacity_bytes() * 3) // 4


def _gemm_tiles():
    # v5e / v6e (128 MiB VMEM): larger tiles amortize per-grid-step overhead;
    # v7x (64 MiB): stay conservative.
    if _vmem_capacity_bytes() >= 100 * 1024 * 1024:
        return 512, 512, 1024
    return 256, 256, 512


def _erf(x):
    # Abramowitz & Stegun 7.1.26 polynomial (|err| < ~1e-6 with the approx
    # reciprocal).  exp and the reciprocal ride the EUP slot, which is idle
    # during the surrounding MXU-heavy FFN work.
    a1, a2, a3, a4, a5 = (0.254829592, -0.284496736, 1.421413741,
                          -1.453152027, 1.061405429)
    p = 0.3275911
    sgn = jnp.where(x >= 0.0, 1.0, -1.0)
    ax = jnp.abs(x)
    t = pl.reciprocal(1.0 + p * ax, approx=True)
    poly = ((((a5 * t + a4) * t + a3) * t + a2) * t + a1) * t
    return sgn * (1.0 - poly * jnp.exp(-ax * ax))


def _gelu(x):
    # erf-form GELU (matches torch.nn.GELU()).
    return 0.5 * x * (1.0 + _erf(x * 0.7071067811865476))


# ---------------------- tiled GEMM (+bias, +residual) ----------------------

def _gemm_kernel(*refs, has_residual):
    if has_residual:
        x_ref, w_ref, b_ref, r_ref, o_ref, acc_ref = refs
    else:
        x_ref, w_ref, b_ref, o_ref, acc_ref = refs
        r_ref = None
    k = pl.program_id(2)

    @pl.when(k == 0)
    def _():
        acc_ref[...] = jnp.zeros_like(acc_ref)

    acc_ref[...] += jnp.dot(x_ref[...], w_ref[...],
                            preferred_element_type=_F32)

    @pl.when(k == pl.num_programs(2) - 1)
    def _():
        out = acc_ref[...] + b_ref[...]
        if has_residual:
            out = out + r_ref[...].astype(_F32)
        o_ref[...] = out.astype(o_ref.dtype)


def gemm_bias_pallas(x, w, b, residual=None, *, out_dtype=_BF16,
                     bm=None, bn=None, bk=None):
    """y = x @ w + b (+ residual).  bf16 MXU operands, f32 accumulate,
    bias/residual applied as the last-K-step epilogue."""
    dbm, dbn, dbk = _gemm_tiles()
    bm, bn, bk = bm or dbm, bn or dbn, bk or dbk
    M, K = x.shape
    N = w.shape[1]
    tm = min(bm, _round_up(M, 16))
    tn = min(bn, _round_up(N, 128))
    tk = min(bk, _round_up(K, 128))
    Mp, Np, Kp = _round_up(M, tm), _round_up(N, tn), _round_up(K, tk)

    xp = _pad2(x.astype(_BF16), Mp, Kp)
    wp = _pad2(w.astype(_BF16), Kp, Np)
    bp = _pad2(b.reshape(1, N).astype(_F32), 1, Np)

    in_specs = [
        pl.BlockSpec((tm, tk), lambda i, j, k: (i, k)),
        pl.BlockSpec((tk, tn), lambda i, j, k: (k, j)),
        pl.BlockSpec((1, tn), lambda i, j, k: (0, j)),
    ]
    args = [xp, wp, bp]
    has_residual = residual is not None
    if has_residual:
        in_specs.append(pl.BlockSpec((tm, tn), lambda i, j, k: (i, j)))
        args.append(_pad2(residual, Mp, Np))

    out = pl.pallas_call(
        functools.partial(_gemm_kernel, has_residual=has_residual),
        out_shape=jax.ShapeDtypeStruct((Mp, Np), out_dtype),
        grid=(Mp // tm, Np // tn, Kp // tk),
        in_specs=in_specs,
        out_specs=pl.BlockSpec((tm, tn), lambda i, j, k: (i, j)),
        scratch_shapes=[pltpu.VMEM((tm, tn), _F32)],
        compiler_params=pltpu.CompilerParams(
            dimension_semantics=("parallel", "parallel", "arbitrary"),
            vmem_limit_bytes=_vmem_limit_bytes()),
    )(*args)
    return out[:M, :N]


# -------------------- fused LayerNorm -> GEMM (LN prologue) -----------------

def _ln_gemm_kernel(x_ref, g_ref, be_ref, w_ref, b_ref, o_ref, xn_ref, *, eps):
    # LN computed once per row tile (j == 0), cached in bf16 VMEM scratch and
    # reused for every output (j) tile.
    @pl.when(pl.program_id(1) == 0)
    def _():
        x = x_ref[...].astype(_F32)
        mu = jnp.mean(x, axis=-1, keepdims=True)
        var = jnp.mean(jnp.square(x - mu), axis=-1, keepdims=True)
        xn = (x - mu) * jax.lax.rsqrt(var + eps) * g_ref[...] + be_ref[...]
        xn_ref[...] = xn.astype(_BF16)

    o_ref[...] = (jnp.dot(xn_ref[...], w_ref[...],
                          preferred_element_type=_F32)
                  + b_ref[...]).astype(o_ref.dtype)


def ln_gemm_pallas(x, gamma, beta, w, b, *, eps, out_dtype=_BF16,
                   bm=256, bn=512):
    """y = LayerNorm(x) @ w + b, LN fused as a cached prologue."""
    M, D = x.shape
    N = w.shape[1]
    tm = min(bm, _round_up(M, 16))
    tn = min(bn, _round_up(N, 128))
    Mp, Np = _round_up(M, tm), _round_up(N, tn)

    xp = _pad2(x, Mp, D)                       # never pad D: LN needs true rows
    wp = _pad2(w.astype(_BF16), D, Np)
    bp = _pad2(b.reshape(1, N).astype(_F32), 1, Np)

    out = pl.pallas_call(
        functools.partial(_ln_gemm_kernel, eps=eps),
        out_shape=jax.ShapeDtypeStruct((Mp, Np), out_dtype),
        grid=(Mp // tm, Np // tn),
        in_specs=[
            pl.BlockSpec((tm, D), lambda i, j: (i, 0)),
            pl.BlockSpec((1, D), lambda i, j: (0, 0)),
            pl.BlockSpec((1, D), lambda i, j: (0, 0)),
            pl.BlockSpec((D, tn), lambda i, j: (0, j)),
            pl.BlockSpec((1, tn), lambda i, j: (0, j)),
        ],
        out_specs=pl.BlockSpec((tm, tn), lambda i, j: (i, j)),
        scratch_shapes=[pltpu.VMEM((tm, D), _BF16)],
        compiler_params=pltpu.CompilerParams(
            dimension_semantics=("parallel", "arbitrary"),
            vmem_limit_bytes=_vmem_limit_bytes()),
    )(xp, gamma.reshape(1, D).astype(_F32), beta.reshape(1, D).astype(_F32),
      wp, bp)
    return out[:M, :N]


# --------------------------- multi-head attention ---------------------------

def _mhsa_kernel(q_ref, kv_ref, o_ref, *, num_heads, scale, embed_dim):
    D = embed_dim
    dh = D // num_heads
    outs = []
    for h in range(num_heads):                 # static unroll over heads
        lo = h * dh
        qh = (q_ref[0, :, lo:lo + dh].astype(_F32) * scale).astype(_BF16)
        kh = kv_ref[0, :, D + lo:D + lo + dh]
        vh = kv_ref[0, :, 2 * D + lo:2 * D + lo + dh]
        s = jax.lax.dot_general(qh, kh, (((1,), (1,)), ((), ())),
                                preferred_element_type=_F32)
        m = jnp.max(s, axis=-1, keepdims=True)
        p = jnp.exp(s - m)
        p = p * pl.reciprocal(jnp.sum(p, axis=-1, keepdims=True), approx=True)
        outs.append(jnp.dot(p.astype(_BF16), vh, preferred_element_type=_F32))
    # single lane-dense store of all heads
    o_ref[0] = jnp.concatenate(outs, axis=-1).astype(o_ref.dtype)


def attention_pallas(qkv, *, num_heads, tq_cap=256):
    """qkv: [B, S, 3D] packed -> [B, S, D]; grid over (batch, query tile)."""
    B, S, D3 = qkv.shape
    D = D3 // 3
    scale = 1.0 / math.sqrt(D // num_heads)
    tq = _pick_seq_tile(S, tq_cap)
    return pl.pallas_call(
        functools.partial(_mhsa_kernel, num_heads=num_heads, scale=scale,
                          embed_dim=D),
        out_shape=jax.ShapeDtypeStruct((B, S, D), _BF16),
        grid=(B, S // tq),
        in_specs=[pl.BlockSpec((1, tq, D3), lambda b, qi: (b, qi, 0)),
                  pl.BlockSpec((1, S, D3), lambda b, qi: (b, 0, 0))],
        out_specs=pl.BlockSpec((1, tq, D), lambda b, qi: (b, qi, 0)),
        compiler_params=pltpu.CompilerParams(
            dimension_semantics=("parallel", "parallel"),
            vmem_limit_bytes=_vmem_limit_bytes()),
    )(qkv, qkv)


# ----------------- cross-modal context (modal_seq == 1 path) ----------------

def _cross_ctx_kernel(mc_ref, wv_ref, bv_ref, wo_ref, bo_ref, wg_ref, bg_ref,
                      gf_ref, og_ref):
    mc = mc_ref[...]                                    # bf16
    v = jnp.dot(mc, wv_ref[...], preferred_element_type=_F32) + bv_ref[...]
    c = jnp.dot(v.astype(_BF16), wo_ref[...],
                preferred_element_type=_F32) + bo_ref[...]
    g = jax.nn.sigmoid(
        jnp.dot(c.astype(_BF16), wg_ref[...],
                preferred_element_type=_F32) + bg_ref[...])
    gf_ref[...] = g * c          # gate * fusion_output   (per-batch vector)
    og_ref[...] = 1.0 - g        # (1 - gate)


def cross_context_pallas(mc, attn_p, gate_p):
    """Cross-attention with a single key/value position collapses to
    out_proj(v_proj(modal_context)) -- softmax over one key is exactly 1 -- so
    the q/k projections and cross_modal_norm are mathematically inert.  This
    kernel fuses the V/out projections with the modal gate (bf16 MXU ops)."""
    B, D = mc.shape
    Bp = _round_up(B, 16)
    mcp = _pad2(mc.astype(_BF16), Bp, D)
    gf, og = pl.pallas_call(
        _cross_ctx_kernel,
        out_shape=(jax.ShapeDtypeStruct((Bp, D), _F32),
                   jax.ShapeDtypeStruct((Bp, D), _F32)),
        grid=(1,),
        in_specs=[pl.BlockSpec((Bp, D), lambda i: (0, 0)),
                  pl.BlockSpec((D, D), lambda i: (0, 0)),
                  pl.BlockSpec((1, D), lambda i: (0, 0)),
                  pl.BlockSpec((D, D), lambda i: (0, 0)),
                  pl.BlockSpec((1, D), lambda i: (0, 0)),
                  pl.BlockSpec((D, D), lambda i: (0, 0)),
                  pl.BlockSpec((1, D), lambda i: (0, 0))],
        out_specs=(pl.BlockSpec((Bp, D), lambda i: (0, 0)),
                   pl.BlockSpec((Bp, D), lambda i: (0, 0))),
        compiler_params=pltpu.CompilerParams(
            dimension_semantics=("arbitrary",)),
    )(mcp,
      attn_p['wv'].astype(_BF16), attn_p['bv'].reshape(1, D).astype(_F32),
      attn_p['wo'].astype(_BF16), attn_p['bo'].reshape(1, D).astype(_F32),
      gate_p['w'].astype(_BF16), gate_p['b'].reshape(1, D).astype(_F32))
    return gf[:B], og[:B]


# ------------------- fused gate-mix + norm2 (two outputs) -------------------

def _gate_norm_kernel(x_ref, gf_ref, og_ref, g_ref, b_ref, xo_ref, xn_ref,
                      *, eps):
    x = x_ref[0].astype(_F32)                  # (ts, D) residual stream
    mixed = gf_ref[0] + og_ref[0] * x          # gate*fusion + (1-gate)*residual
    xo_ref[0] = mixed.astype(xo_ref.dtype)
    mu = jnp.mean(mixed, axis=-1, keepdims=True)
    var = jnp.mean(jnp.square(mixed - mu), axis=-1, keepdims=True)
    xn_ref[0] = ((mixed - mu) * jax.lax.rsqrt(var + eps) * g_ref[...]
                 + b_ref[...]).astype(xn_ref.dtype)


def fuse_gate_norm_pallas(x, gf, og, gamma, beta, *, eps, ts_cap=256):
    """Returns (gated-mixed residual stream, norm2(of it)) in one kernel."""
    B, S, D = x.shape
    ts = _pick_seq_tile(S, ts_cap)
    return pl.pallas_call(
        functools.partial(_gate_norm_kernel, eps=eps),
        out_shape=(jax.ShapeDtypeStruct((B, S, D), _BF16),
                   jax.ShapeDtypeStruct((B, S, D), _BF16)),
        grid=(B, S // ts),
        in_specs=[
            pl.BlockSpec((1, ts, D), lambda b, s: (b, s, 0)),
            pl.BlockSpec((1, 1, D), lambda b, s: (b, 0, 0)),
            pl.BlockSpec((1, 1, D), lambda b, s: (b, 0, 0)),
            pl.BlockSpec((1, D), lambda b, s: (0, 0)),
            pl.BlockSpec((1, D), lambda b, s: (0, 0)),
        ],
        out_specs=(pl.BlockSpec((1, ts, D), lambda b, s: (b, s, 0)),
                   pl.BlockSpec((1, ts, D), lambda b, s: (b, s, 0))),
        compiler_params=pltpu.CompilerParams(
            dimension_semantics=("parallel", "parallel")),
    )(x.astype(_BF16), gf.reshape(B, 1, D).astype(_F32),
      og.reshape(B, 1, D).astype(_F32),
      gamma.reshape(1, D).astype(_F32), beta.reshape(1, D).astype(_F32))


# ------------------- fused MoE (all experts in one kernel) ------------------

def _moe_kernel(x_ref, g_ref, w1_ref, b1_ref, w2_ref, b2_ref, r_ref,
                o_ref, acc_ref):
    e = pl.program_id(1)
    h = pl.program_id(2)

    @pl.when((e == 0) & (h == 0))
    def _():
        acc_ref[...] = jnp.zeros_like(acc_ref)

    gate = g_ref[0]                                     # (tm, 1) f32

    @pl.when(h == 0)
    def _():
        acc_ref[...] += gate * b2_ref[0]                # gated expert bias once

    x = x_ref[...]                                      # (tm, D) bf16
    hid = jnp.dot(x, w1_ref[0], preferred_element_type=_F32) + b1_ref[0]
    hid = _gelu(hid)
    y = jnp.dot(hid.astype(_BF16), w2_ref[0], preferred_element_type=_F32)
    acc_ref[...] += gate * y

    @pl.when((e == pl.num_programs(1) - 1) & (h == pl.num_programs(2) - 1))
    def _():
        o_ref[...] = (acc_ref[...] + r_ref[...].astype(_F32)).astype(o_ref.dtype)


def moe_pallas(x, gates, w1s, b1s, w2s, b2s, residual, *, bm=256, bh=512):
    """Grid over (row-tile, expert, hidden-chunk) accumulates
    gate_e * Expert_e(x) into a VMEM-resident accumulator; the 4D hidden is
    tiled so weight blocks + GELU temp fit v7x VMEM; residual is added on the
    last step (no per-expert HBM writebacks)."""
    M, D = x.shape
    E, _, H = w1s.shape
    tm = min(bm, _round_up(M, 16))
    th = min(bh, _round_up(H, 128))
    Mp, Hp = _round_up(M, tm), _round_up(H, th)

    xp = _pad2(x.astype(_BF16), Mp, D)
    rp = _pad2(residual.astype(_BF16), Mp, D)
    gt = _pad2(gates.astype(_F32), Mp, E).T[:, :, None]   # (E, Mp, 1)

    w1p = w1s.astype(_BF16)
    b1p = b1s.astype(_F32)
    w2p = w2s.astype(_BF16)
    b2p = b2s.astype(_F32)
    if Hp != H:
        w1p = jnp.pad(w1p, ((0, 0), (0, 0), (0, Hp - H)))
        b1p = jnp.pad(b1p, ((0, 0), (0, 0), (0, Hp - H)))
        w2p = jnp.pad(w2p, ((0, 0), (0, Hp - H), (0, 0)))

    out = pl.pallas_call(
        _moe_kernel,
        out_shape=jax.ShapeDtypeStruct((Mp, D), _BF16),
        grid=(Mp // tm, E, Hp // th),
        in_specs=[
            pl.BlockSpec((tm, D), lambda i, e, h: (i, 0)),
            pl.BlockSpec((1, tm, 1), lambda i, e, h: (e, i, 0)),
            pl.BlockSpec((1, D, th), lambda i, e, h: (e, 0, h)),
            pl.BlockSpec((1, 1, th), lambda i, e, h: (e, 0, h)),
            pl.BlockSpec((1, th, D), lambda i, e, h: (e, h, 0)),
            pl.BlockSpec((1, 1, D), lambda i, e, h: (e, 0, 0)),
            pl.BlockSpec((tm, D), lambda i, e, h: (i, 0)),
        ],
        out_specs=pl.BlockSpec((tm, D), lambda i, e, h: (i, 0)),
        scratch_shapes=[pltpu.VMEM((tm, D), _F32)],
        compiler_params=pltpu.CompilerParams(
            dimension_semantics=("parallel", "arbitrary", "arbitrary"),
            vmem_limit_bytes=_vmem_limit_bytes()),
    )(xp, gt, w1p, b1p, w2p, b2p, rp)
    return out[:M]


# --------------- fused FFN block: x + W2(GELU(W1(LN(x)))) -------------------

def _ffn_kernel(x_ref, g_ref, be_ref, w1_ref, b1_ref, w2_ref, b2_ref, o_ref,
                acc_ref, xn_ref, *, eps):
    h = pl.program_id(1)

    @pl.when(h == 0)
    def _():
        x = x_ref[...].astype(_F32)
        mu = jnp.mean(x, axis=-1, keepdims=True)
        var = jnp.mean(jnp.square(x - mu), axis=-1, keepdims=True)
        xn = (x - mu) * jax.lax.rsqrt(var + eps) * g_ref[...] + be_ref[...]
        xn_ref[...] = xn.astype(_BF16)
        acc_ref[...] = jnp.zeros_like(acc_ref)

    hid = jnp.dot(xn_ref[...], w1_ref[...],
                  preferred_element_type=_F32) + b1_ref[...]
    hid = _gelu(hid)
    acc_ref[...] += jnp.dot(hid.astype(_BF16), w2_ref[...],
                            preferred_element_type=_F32)

    @pl.when(h == pl.num_programs(1) - 1)
    def _():
        o_ref[...] = (x_ref[...].astype(_F32) + acc_ref[...]
                      + b2_ref[...]).astype(o_ref.dtype)


def ffn_pallas(x, gamma, beta, w1, b1, w2, b2, *, eps, bm=256, bh=512):
    """norm3 + Linear(D,4D) + GELU + Linear(4D,D) + residual in one kernel;
    the hidden dimension is tiled so the 4D activation never leaves VMEM and
    the per-step weight blocks fit the v7x budget."""
    M, D = x.shape
    H = w1.shape[1]
    tm = min(bm, _round_up(M, 16))
    th = min(bh, _round_up(H, 128))
    Mp, Hp = _round_up(M, tm), _round_up(H, th)

    xp = _pad2(x.astype(_BF16), Mp, D)
    w1p = _pad2(w1.astype(_BF16), D, Hp)
    b1p = _pad2(b1.reshape(1, H).astype(_F32), 1, Hp)
    w2p = _pad2(w2.astype(_BF16), Hp, D)
    b2p = b2.reshape(1, D).astype(_F32)

    out = pl.pallas_call(
        functools.partial(_ffn_kernel, eps=eps),
        out_shape=jax.ShapeDtypeStruct((Mp, D), _BF16),
        grid=(Mp // tm, Hp // th),
        in_specs=[
            pl.BlockSpec((tm, D), lambda i, h: (i, 0)),
            pl.BlockSpec((1, D), lambda i, h: (0, 0)),
            pl.BlockSpec((1, D), lambda i, h: (0, 0)),
            pl.BlockSpec((D, th), lambda i, h: (0, h)),
            pl.BlockSpec((1, th), lambda i, h: (0, h)),
            pl.BlockSpec((th, D), lambda i, h: (h, 0)),
            pl.BlockSpec((1, D), lambda i, h: (0, 0)),
        ],
        out_specs=pl.BlockSpec((tm, D), lambda i, h: (i, 0)),
        scratch_shapes=[pltpu.VMEM((tm, D), _F32),
                        pltpu.VMEM((tm, D), _BF16)],
        compiler_params=pltpu.CompilerParams(
            dimension_semantics=("parallel", "arbitrary"),
            vmem_limit_bytes=_vmem_limit_bytes()),
    )(xp, gamma.reshape(1, D).astype(_F32), beta.reshape(1, D).astype(_F32),
      w1p, b1p, w2p, b2p)
    return out[:M]


# ----------------------------- plain-JAX glue --------------------------------

def router_masks(logits, top_k, num_experts):
    # TODO(synk): `AttentiveRouter` is not defined in the reference source;
    # implemented as a softmax top-k router (gate = softmax prob at selected
    # experts) with a Switch-style load-balancing auxiliary loss.
    probs = jax.nn.softmax(logits, axis=-1)
    _, top_idx = jax.lax.top_k(probs, top_k)
    onehot = jnp.sum(jax.nn.one_hot(top_idx, num_experts, dtype=_F32), axis=-2)
    masks = probs * onehot
    importance = jnp.mean(probs, axis=0)
    load = jnp.mean(onehot, axis=0)
    loss = num_experts * jnp.sum(importance * load)
    return masks, loss, load


def encoder_forward(x, modal_context, p, cfg):
    """UnifiedModalEncoder.forward (eval path; dropout == identity)."""
    B, S, D = x.shape
    M = B * S
    nh = cfg['num_heads']
    eps = cfg['layer_norm_eps']
    ns = cfg['num_shared_experts']
    ni = cfg['num_modality_specific_experts']

    x_flat = x.reshape(M, D)                                   # bf16 stream

    # --- self-attention (norm1 fused into the packed QKV projection) ---
    qkv = ln_gemm_pallas(x_flat, p['norm1']['g'], p['norm1']['b'],
                         p['self_attn']['wqkv'], p['self_attn']['bqkv'],
                         eps=eps)                              # (M, 3D) bf16
    attn = attention_pallas(qkv.reshape(B, S, 3 * D), num_heads=nh)
    # output projection with the residual add fused as an epilogue
    x_flat = gemm_bias_pallas(attn.reshape(M, D), p['self_attn']['wo'],
                              p['self_attn']['bo'], residual=x_flat)

    # --- cross-modal fusion (modal_seq == 1 path, see cross_context_pallas) ---
    gf, og = cross_context_pallas(modal_context.reshape(B, D),
                                  p['cross_attn'], p['modal_gate'])
    x3, xn2_3 = fuse_gate_norm_pallas(x_flat.reshape(B, S, D), gf, og,
                                      p['norm2']['g'], p['norm2']['b'], eps=eps)
    x_flat = x3.reshape(M, D)
    xn2 = xn2_3.reshape(M, D)

    # --- MoE: both routers in one GEMM; all experts in one fused kernel ---
    logits = gemm_bias_pallas(xn2, p['router_w'], p['router_b'],
                              out_dtype=_F32)
    shared_masks, shared_loss, shared_usage = router_masks(
        logits[:, :ns], cfg['top_k'], ns)
    image_masks, image_loss, _ = router_masks(
        logits[:, ns:ns + ni], cfg['top_k'], ni)
    gates = jnp.concatenate([shared_masks, image_masks], axis=-1)
    x_flat = moe_pallas(xn2, gates, p['experts_w1'], p['experts_b1'],
                        p['experts_w2'], p['experts_b2'], residual=x_flat)

    # --- FFN block (norm3 + FFN + residual, one kernel) ---
    x_flat = ffn_pallas(x_flat, p['norm3']['g'], p['norm3']['b'],
                        p['ffn']['w1'], p['ffn']['b1'],
                        p['ffn']['w2'], p['ffn']['b2'], eps=eps)

    return x_flat.reshape(B, S, D), shared_loss + image_loss, shared_usage


def multimodal_moe_forward(params, x_img, cfg):
    """MultiModalMoE.forward with text_tokens=None, return_attention=False."""
    B, C, Hi, Wi = x_img.shape
    P = cfg['patch_size']
    D = cfg['embed_dim']
    Hp, Wp = Hi // P, Wi // P
    Np = Hp * Wp

    # PatchEmbed: Conv2d(kernel=stride=P) == GEMM on flattened patches;
    # the positional embedding rides the GEMM's residual epilogue.
    patches = x_img.reshape(B, C, Hp, P, Wp, P)
    patches = patches.transpose(0, 2, 4, 1, 3, 5).reshape(B * Np, C * P * P)
    pos = jnp.broadcast_to(params['pos_embed'], (B, Np, D)).reshape(B * Np, D)
    x = gemm_bias_pallas(patches, params['patch_w'], params['patch_b'],
                         residual=pos).reshape(B, Np, D)       # bf16 stream
    # pos_drop / nn.Dropout = identity (inference semantics)

    # text_tokens is None -> zero modal context [B, 1, D]
    modal_context = jnp.zeros((B, 1, D), _F32)

    total_router_loss = jnp.zeros((), _F32)
    for layer_p in params['encoders']:
        x, rloss, _ = encoder_forward(x, modal_context, layer_p, cfg)
        total_router_loss = total_router_loss + rloss

    pooled = jnp.mean(x.astype(_F32), axis=1)                  # [B, D]
    # final LayerNorm fused into the classifier-head GEMM
    logits = ln_gemm_pallas(pooled, params['norm']['g'], params['norm']['b'],
                            params['head_w'], params['head_b'],
                            eps=cfg['layer_norm_eps'], out_dtype=_F32)
    return {'logits': logits, 'router_loss': total_router_loss}


# --------------------------- parameter init ----------------------------------

def init_params(key, cfg):
    std = cfg['initializer_range']
    D = cfg['embed_dim']
    Hff = 4 * D
    P = cfg['patch_size']
    C = cfg['in_channels']
    Np = (cfg['img_size'] // P) ** 2
    ns = cfg['num_shared_experts']
    ni = cfg['num_modality_specific_experts']
    E = ns + ni
    keys = iter(jax.random.split(key, 256))
    # Matmul weights are stored in bf16 (MXU operands, halves weight DMA);
    # biases / LN params / pos_embed stay f32.
    nrm = lambda shape: (std * jax.random.normal(next(keys), shape, _F32)
                         ).astype(_BF16)
    nrm_f32 = lambda shape: std * jax.random.normal(next(keys), shape, _F32)
    zeros = lambda shape: jnp.zeros(shape, _F32)
    ones = lambda shape: jnp.ones(shape, _F32)

    def ln_p():
        return {'g': ones((D,)), 'b': zeros((D,))}

    def encoder_p():
        return {
            # packed q|k|v in-projection (like nn.MultiheadAttention in_proj)
            'self_attn': {'wqkv': nrm((D, 3 * D)), 'bqkv': zeros((3 * D,)),
                          'wo': nrm((D, D)), 'bo': zeros((D,))},
            # cross-attention: with modal_seq == 1 only V and output
            # projections affect the result (softmax over one key == 1), so
            # the inert q/k projections and cross_modal_norm are not stored.
            'cross_attn': {'wv': nrm((D, D)), 'bv': zeros((D,)),
                           'wo': nrm((D, D)), 'bo': zeros((D,))},
            'modal_gate': {'w': nrm((D, D)), 'b': zeros((D,))},
            'norm1': ln_p(), 'norm2': ln_p(), 'norm3': ln_p(),
            # TODO(synk): `Expert` is not defined in the reference source;
            # implemented as Linear(D,4D) -> GELU -> Linear(4D,D), with shared
            # (first ns) and image-specific (last ni) experts stacked.
            'experts_w1': nrm((E, D, Hff)), 'experts_b1': zeros((E, 1, Hff)),
            'experts_w2': nrm((E, Hff, D)), 'experts_b2': zeros((E, 1, D)),
            # shared router (first ns cols) and image router (last ni cols)
            'router_w': nrm((D, E)), 'router_b': zeros((E,)),
            'ffn': {'w1': nrm((D, Hff)), 'b1': zeros((Hff,)),
                    'w2': nrm((Hff, D)), 'b2': zeros((D,))},
        }

    return {
        # Conv2d(C, D, P, P) weight [D, C, P, P] stored transposed as [C*P*P, D]
        'patch_w': nrm((C * P * P, D)),
        'patch_b': zeros((D,)),
        'pos_embed': nrm_f32((1, Np, D)),
        'encoders': [encoder_p() for _ in range(cfg['num_layers'])],
        'norm': ln_p(),
        'head_w': nrm((D, cfg['num_classes'])),
        'head_b': zeros((cfg['num_classes'],)),
    }


# --------------------------------- main ---------------------------------------

if __name__ == "__main__":
    cfg = dict(
        img_size=16, patch_size=4, in_channels=4, num_classes=10,
        embed_dim=32, num_shared_experts=4, num_modality_specific_experts=2,
        top_k=2, num_heads=4, num_layers=2,
        layer_norm_eps=1e-5, initializer_range=0.02,
    )
    key = jax.random.PRNGKey(0)
    pkey, xkey = jax.random.split(key)
    params = init_params(pkey, cfg)
    x = jax.random.normal(
        xkey, (2, cfg['in_channels'], cfg['img_size'], cfg['img_size']), _F32)

    fwd = jax.jit(functools.partial(multimodal_moe_forward, cfg=cfg))
    out = fwd(params, x)
    jax.block_until_ready(out)

    assert out['logits'].shape == (2, cfg['num_classes'])
    assert out['logits'].dtype == _F32
    assert out['router_loss'].shape == ()
    assert bool(jnp.all(jnp.isfinite(out['logits'])))
    print("KERNEL_OK")
</pallas_src>

<mosaic_0001>
module attributes {stable_mosaic.version = 11 : i64} {
  func.func @_gemm_kernel(%arg0: i32, %arg1: i32, %arg2: i32, %arg3: memref<32x128xbf16, #tpu.memory_space<vmem>>, %arg4: memref<128x128xbf16, #tpu.memory_space<vmem>>, %arg5: memref<1x128xf32, #tpu.memory_space<vmem>>, %arg6: memref<32x128xf32, #tpu.memory_space<vmem>>, %arg7: memref<32x128xbf16, #tpu.memory_space<vmem>>, %arg8: memref<32x128xf32, #tpu.memory_space<vmem>>) attributes {dimension_semantics = [#tpu.dimension_semantics<parallel>, #tpu.dimension_semantics<parallel>, #tpu.dimension_semantics<arbitrary>], iteration_bounds = array<i64: 1, 1, 1>, scalar_prefetch = 0 : i64, scratch_operands = 1 : i64, tpu.core_type = #tpu.core_type<tc>, window_params = [{transform_indices = @transform_0, window_bounds = array<i64: 32, 128>}, {transform_indices = @transform_1, window_bounds = array<i64: 128, 128>}, {transform_indices = @transform_2, window_bounds = array<i64: 1, 128>}, {transform_indices = @transform_3, window_bounds = array<i64: 32, 128>}, {transform_indices = @transform_4, window_bounds = array<i64: 32, 128>}]} {
    %c0_i32 = arith.constant 0 : i32
    %0 = arith.cmpi eq, %arg2, %c0_i32 : i32
    %1 = arith.extui %0 : i1 to i32
    %c0_i32_0 = arith.constant 0 : i32
    %2 = arith.cmpi ne, %1, %c0_i32_0 : i32
    scf.if %2 {
      %cst_10 = arith.constant 0.000000e+00 : f32
      %12 = vector.broadcast %cst_10 : f32 to vector<32x128xf32>
      %c0_11 = arith.constant 0 : index
      %c0_12 = arith.constant 0 : index
      %13 = vector.load %arg8[%c0_11, %c0_12] : memref<32x128xf32, #tpu.memory_space<vmem>>, vector<32x128xf32>
      tpu.vector_store %arg8[%c0_11, %c0_12], %12 {strides = array<i32>} : memref<32x128xf32, #tpu.memory_space<vmem>>, vector<32x128xf32>,
    } else {
    }
    %c0 = arith.constant 0 : index
    %c0_1 = arith.constant 0 : index
    %3 = vector.load %arg8[%c0, %c0_1] : memref<32x128xf32, #tpu.memory_space<vmem>>, vector<32x128xf32>
    %c0_2 = arith.constant 0 : index
    %c0_3 = arith.constant 0 : index
    %4 = vector.load %arg3[%c0_2, %c0_3] : memref<32x128xbf16, #tpu.memory_space<vmem>>, vector<32x128xbf16>
    %c0_4 = arith.constant 0 : index
    %c0_5 = arith.constant 0 : index
    %5 = vector.load %arg4[%c0_4, %c0_5] : memref<128x128xbf16, #tpu.memory_space<vmem>>, vector<128x128xbf16>
    %cst = arith.constant dense<0.000000e+00> : vector<32x128xf32>
    %6 = tpu.matmul %4, %5, %cst {dimension_numbers = #tpu.dot_dimension_numbers<[1], [0], [0], [1], [0, 0, 1, 1], [], []>} : vector<32x128xbf16>, vector<128x128xbf16>, vector<32x128xf32> -> vector<32x128xf32>
    %7 = arith.addf %3, %6 : vector<32x128xf32>
    %c0_6 = arith.constant 0 : index
    %c0_7 = arith.constant 0 : index
    %8 = vector.load %arg8[%c0_6, %c0_7] : memref<32x128xf32, #tpu.memory_space<vmem>>, vector<32x128xf32>
    tpu.vector_store %arg8[%c0_6, %c0_7], %7 {strides = array<i32>} : memref<32x128xf32, #tpu.memory_space<vmem>>, vector<32x128xf32>,
    %c0_i32_8 = arith.constant 0 : i32
    %9 = arith.cmpi eq, %arg2, %c0_i32_8 : i32
    %10 = arith.extui %9 : i1 to i32
    %c0_i32_9 = arith.constant 0 : i32
    %11 = arith.cmpi ne, %10, %c0_i32_9 : i32
    scf.if %11 {
      %c0_10 = arith.constant 0 : index
      %c0_11 = arith.constant 0 : index
      %12 = vector.load %arg8[%c0_10, %c0_11] : memref<32x128xf32, #tpu.memory_space<vmem>>, vector<32x128xf32>
      %c0_12 = arith.constant 0 : index
      %c0_13 = arith.constant 0 : index
      %13 = vector.load %arg5[%c0_12, %c0_13] : memref<1x128xf32, #tpu.memory_space<vmem>>, vector<1x128xf32>
      %14 = vector.broadcast %13 : vector<1x128xf32> to vector<32x128xf32>
      %15 = arith.addf %12, %14 : vector<32x128xf32>
      %c0_14 = arith.constant 0 : index
      %c0_15 = arith.constant 0 : index
      %16 = vector.load %arg6[%c0_14, %c0_15] : memref<32x128xf32, #tpu.memory_space<vmem>>, vector<32x128xf32>
      %17 = arith.addf %15, %16 : vector<32x128xf32>
      %18 = arith.truncf %17 : vector<32x128xf32> to vector<32x128xbf16>
      %c0_16 = arith.constant 0 : index
      %c0_17 = arith.constant 0 : index
      %19 = vector.load %arg7[%c0_16, %c0_17] : memref<32x128xbf16, #tpu.memory_space<vmem>>, vector<32x128xbf16>
      tpu.vector_store %arg7[%c0_16, %c0_17], %18 {strides = array<i32>} : memref<32x128xbf16, #tpu.memory_space<vmem>>, vector<32x128xbf16>,
    } else {
    }
    return
  }
  func.func @transform_0(%arg0: i32, %arg1: i32, %arg2: i32) -> (i32, i32) {
    %c0_i32 = arith.constant 0 : i32
    return %arg0, %arg2 : i32, i32
  }
  func.func @transform_1(%arg0: i32, %arg1: i32, %arg2: i32) -> (i32, i32) {
    %c0_i32 = arith.constant 0 : i32
    return %arg2, %arg1 : i32, i32
  }
  func.func @transform_2(%arg0: i32, %arg1: i32, %arg2: i32) -> (i32, i32) {
    %c0_i32 = arith.constant 0 : i32
    %c0_i32_0 = arith.constant 0 : i32
    return %c0_i32, %arg1 : i32, i32
  }
  func.func @transform_3(%arg0: i32, %arg1: i32, %arg2: i32) -> (i32, i32) {
    %c0_i32 = arith.constant 0 : i32
    return %arg0, %arg1 : i32, i32
  }
  func.func @transform_4(%arg0: i32, %arg1: i32, %arg2: i32) -> (i32, i32) {
    %c0_i32 = arith.constant 0 : i32
    return %arg0, %arg1 : i32, i32
  }
}

module attributes {stable_mosaic.version = 11 : i64} {
  func.func @_ln_gemm_kernel(%arg0: i32, %arg1: i32, %arg2: memref<32x32xbf16, #tpu.memory_space<vmem>>, %arg3: memref<1x32xf32, #tpu.memory_space<vmem>>, %arg4: memref<1x32xf32, #tpu.memory_space<vmem>>, %arg5: memref<32x128xbf16, #tpu.memory_space<vmem>>, %arg6: memref<1x128xf32, #tpu.memory_space<vmem>>, %arg7: memref<32x128xbf16, #tpu.memory_space<vmem>>, %arg8: memref<32x32xbf16, #tpu.memory_space<vmem>>) attributes {dimension_semantics = [#tpu.dimension_semantics<parallel>, #tpu.dimension_semantics<arbitrary>], iteration_bounds = array<i64: 1, 1>, scalar_prefetch = 0 : i64, scratch_operands = 1 : i64, tpu.core_type = #tpu.core_type<tc>, window_params = [{transform_indices = @transform_0, window_bounds = array<i64: 32, 32>}, {pipeline_mode = #tpu.pipeline_mode<synchronous>, transform_indices = @transform_1, window_bounds = array<i64: 1, 32>}, {pipeline_mode = #tpu.pipeline_mode<synchronous>, transform_indices = @transform_2, window_bounds = array<i64: 1, 32>}, {transform_indices = @transform_3, window_bounds = array<i64: 32, 128>}, {transform_indices = @transform_4, window_bounds = array<i64: 1, 128>}, {transform_indices = @transform_5, window_bounds = array<i64: 32, 128>}]} {
    %c0_i32 = arith.constant 0 : i32
    %0 = arith.cmpi eq, %arg1, %c0_i32 : i32
    %1 = arith.extui %0 : i1 to i32
    %c0_i32_0 = arith.constant 0 : i32
    %2 = arith.cmpi ne, %1, %c0_i32_0 : i32
    scf.if %2 {
      %c0_8 = arith.constant 0 : index
      %c0_9 = arith.constant 0 : index
      %11 = vector.load %arg2[%c0_8, %c0_9] : memref<32x32xbf16, #tpu.memory_space<vmem>>, vector<32x32xbf16>
      %12 = arith.extf %11 : vector<32x32xbf16> to vector<32x32xf32>
      %cst_10 = arith.constant dense<0.000000e+00> : vector<32xf32>
      %13 = vector.multi_reduction <add>, %12, %cst_10 [1] : vector<32x32xf32> to vector<32xf32>
      %14 = vector.shape_cast %13 : vector<32xf32> to vector<32x1xf32>
      %cst_11 = arith.constant 3.200000e+01 : f32
      %15 = vector.broadcast %cst_11 : f32 to vector<32x1xf32>
      %16 = arith.divf %14, %15 : vector<32x1xf32>
      %17 = vector.broadcast %16 : vector<32x1xf32> to vector<32x32xf32>
      %18 = arith.subf %12, %17 : vector<32x32xf32>
      %19 = arith.mulf %18, %18 : vector<32x32xf32>
      %cst_12 = arith.constant dense<0.000000e+00> : vector<32xf32>
      %20 = vector.multi_reduction <add>, %19, %cst_12 [1] : vector<32x32xf32> to vector<32xf32>
      %21 = vector.shape_cast %20 : vector<32xf32> to vector<32x1xf32>
      %cst_13 = arith.constant 3.200000e+01 : f32
      %22 = vector.broadcast %cst_13 : f32 to vector<32x1xf32>
      %23 = arith.divf %21, %22 : vector<32x1xf32>
      %24 = vector.broadcast %16 : vector<32x1xf32> to vector<32x32xf32>
      %25 = arith.subf %12, %24 : vector<32x32xf32>
      %cst_14 = arith.constant 9.99999974E-6 : f32
      %26 = vector.broadcast %cst_14 : f32 to vector<32x1xf32>
      %27 = arith.addf %23, %26 : vector<32x1xf32>
      %28 = math.rsqrt %27 : vector<32x1xf32>
      %29 = vector.broadcast %28 : vector<32x1xf32> to vector<32x32xf32>
      %30 = arith.mulf %25, %29 : vector<32x32xf32>
      %c0_15 = arith.constant 0 : index
      %c0_16 = arith.constant 0 : index
      %31 = vector.load %arg3[%c0_15, %c0_16] : memref<1x32xf32, #tpu.memory_space<vmem>>, vector<1x32xf32>
      %32 = vector.broadcast %31 : vector<1x32xf32> to vector<32x32xf32>
      %33 = arith.mulf %30, %32 : vector<32x32xf32>
      %c0_17 = arith.constant 0 : index
      %c0_18 = arith.constant 0 : index
      %34 = vector.load %arg4[%c0_17, %c0_18] : memref<1x32xf32, #tpu.memory_space<vmem>>, vector<1x32xf32>
      %35 = vector.broadcast %34 : vector<1x32xf32> to vector<32x32xf32>
      %36 = arith.addf %33, %35 : vector<32x32xf32>
      %37 = arith.truncf %36 : vector<32x32xf32> to vector<32x32xbf16>
      %c0_19 = arith.constant 0 : index
      %c0_20 = arith.constant 0 : index
      %38 = vector.load %arg8[%c0_19, %c0_20] : memref<32x32xbf16, #tpu.memory_space<vmem>>, vector<32x32xbf16>
      tpu.vector_store %arg8[%c0_19, %c0_20], %37 {strides = array<i32>} : memref<32x32xbf16, #tpu.memory_space<vmem>>, vector<32x32xbf16>,
    } else {
    }
    %c0 = arith.constant 0 : index
    %c0_1 = arith.constant 0 : index
    %3 = vector.load %arg8[%c0, %c0_1] : memref<32x32xbf16, #tpu.memory_space<vmem>>, vector<32x32xbf16>
    %c0_2 = arith.constant 0 : index
    %c0_3 = arith.constant 0 : index
    %4 = vector.load %arg5[%c0_2, %c0_3] : memref<32x128xbf16, #tpu.memory_space<vmem>>, vector<32x128xbf16>
    %cst = arith.constant dense<0.000000e+00> : vector<32x128xf32>
    %5 = tpu.matmul %3, %4, %cst {dimension_numbers = #tpu.dot_dimension_numbers<[1], [0], [0], [1], [0, 0, 1, 1], [], []>} : vector<32x32xbf16>, vector<32x128xbf16>, vector<32x128xf32> -> vector<32x128xf32>
    %c0_4 = arith.constant 0 : index
    %c0_5 = arith.constant 0 : index
    %6 = vector.load %arg6[%c0_4, %c0_5] : memref<1x128xf32, #tpu.memory_space<vmem>>, vector<1x128xf32>
    %7 = vector.broadcast %6 : vector<1x128xf32> to vector<32x128xf32>
    %8 = arith.addf %5, %7 : vector<32x128xf32>
    %9 = arith.truncf %8 : vector<32x128xf32> to vector<32x128xbf16>
    %c0_6 = arith.constant 0 : index
    %c0_7 = arith.constant 0 : index
    %10 = vector.load %arg7[%c0_6, %c0_7] : memref<32x128xbf16, #tpu.memory_space<vmem>>, vector<32x128xbf16>
    tpu.vector_store %arg7[%c0_6, %c0_7], %9 {strides = array<i32>} : memref<32x128xbf16, #tpu.memory_space<vmem>>, vector<32x128xbf16>,
    return
  }
  func.func @transform_0(%arg0: i32, %arg1: i32) -> (i32, i32) {
    %c0_i32 = arith.constant 0 : i32
    %c0_i32_0 = arith.constant 0 : i32
    return %arg0, %c0_i32 : i32, i32
  }
  func.func @transform_1(%arg0: i32, %arg1: i32) -> (i32, i32) {
    %c0_i32 = arith.constant 0 : i32
    %c0_i32_0 = arith.constant 0 : i32
    %c0_i32_1 = arith.constant 0 : i32
    return %c0_i32, %c0_i32_0 : i32, i32
  }
  func.func @transform_2(%arg0: i32, %arg1: i32) -> (i32, i32) {
    %c0_i32 = arith.constant 0 : i32
    %c0_i32_0 = arith.constant 0 : i32
    %c0_i32_1 = arith.constant 0 : i32
    return %c0_i32, %c0_i32_0 : i32, i32
  }
  func.func @transform_3(%arg0: i32, %arg1: i32) -> (i32, i32) {
    %c0_i32 = arith.constant 0 : i32
    %c0_i32_0 = arith.constant 0 : i32
    return %c0_i32, %arg1 : i32, i32
  }
  func.func @transform_4(%arg0: i32, %arg1: i32) -> (i32, i32) {
    %c0_i32 = arith.constant 0 : i32
    %c0_i32_0 = arith.constant 0 : i32
    return %c0_i32, %arg1 : i32, i32
  }
  func.func @transform_5(%arg0: i32, %arg1: i32) -> (i32, i32) {
    %c0_i32 = arith.constant 0 : i32
    return %arg0, %arg1 : i32, i32
  }
}

module attributes {stable_mosaic.version = 11 : i64} {
  func.func @_mhsa_kernel(%arg0: i32, %arg1: i32, %arg2: memref<1x16x96xbf16, #tpu.memory_space<vmem>>, %arg3: memref<1x16x96xbf16, #tpu.memory_space<vmem>>, %arg4: memref<1x16x32xbf16, #tpu.memory_space<vmem>>) attributes {dimension_semantics = [#tpu.dimension_semantics<parallel>, #tpu.dimension_semantics<parallel>], iteration_bounds = array<i64: 2, 1>, scalar_prefetch = 0 : i64, scratch_operands = 0 : i64, tpu.core_type = #tpu.core_type<tc>, window_params = [{transform_indices = @transform_0, window_bounds = array<i64: 1, 16, 96>}, {transform_indices = @transform_1, window_bounds = array<i64: 1, 16, 96>}, {transform_indices = @transform_2, window_bounds = array<i64: 1, 16, 32>}]} {
    %c0 = arith.constant 0 : index
    %c0_0 = arith.constant 0 : index
    %c0_1 = arith.constant 0 : index
    %0 = vector.load %arg2[%c0, %c0_0, %c0_1] : memref<1x16x96xbf16, #tpu.memory_space<vmem>>, vector<1x16x8xbf16>
    %1 = vector.shape_cast %0 : vector<1x16x8xbf16> to vector<16x8xbf16>
    %2 = arith.extf %1 : vector<16x8xbf16> to vector<16x8xf32>
    %cst = arith.constant 0.353553385 : f32
    %3 = vector.broadcast %cst : f32 to vector<16x8xf32>
    %4 = arith.mulf %2, %3 : vector<16x8xf32>
    %5 = arith.truncf %4 : vector<16x8xf32> to vector<16x8xbf16>
    %c0_2 = arith.constant 0 : index
    %c0_3 = arith.constant 0 : index
    %c32 = arith.constant 32 : index
    %6 = vector.load %arg3[%c0_2, %c0_3, %c32] : memref<1x16x96xbf16, #tpu.memory_space<vmem>>, vector<1x16x8xbf16>
    %7 = vector.shape_cast %6 : vector<1x16x8xbf16> to vector<16x8xbf16>
    %c0_4 = arith.constant 0 : index
    %c0_5 = arith.constant 0 : index
    %c64 = arith.constant 64 : index
    %8 = vector.load %arg3[%c0_4, %c0_5, %c64] : memref<1x16x96xbf16, #tpu.memory_space<vmem>>, vector<1x16x8xbf16>
    %9 = vector.shape_cast %8 : vector<1x16x8xbf16> to vector<16x8xbf16>
    %cst_6 = arith.constant dense<0.000000e+00> : vector<16x16xf32>
    %10 = tpu.matmul %5, %7, %cst_6 {dimension_numbers = #tpu.dot_dimension_numbers<[1], [1], [0], [0], [0, 0, 1, 0], [], []>} : vector<16x8xbf16>, vector<16x8xbf16>, vector<16x16xf32> -> vector<16x16xf32>
    %cst_7 = arith.constant dense<0xFF800000> : vector<16xf32>
    %11 = vector.multi_reduction <maximumf>, %10, %cst_7 [1] : vector<16x16xf32> to vector<16xf32>
    %12 = vector.shape_cast %11 : vector<16xf32> to vector<16x1xf32>
    %13 = vector.broadcast %12 : vector<16x1xf32> to vector<16x16xf32>
    %14 = arith.subf %10, %13 : vector<16x16xf32>
    %15 = math.exp %14 : vector<16x16xf32>
    %cst_8 = arith.constant dense<0.000000e+00> : vector<16xf32>
    %16 = vector.multi_reduction <add>, %15, %cst_8 [1] : vector<16x16xf32> to vector<16xf32>
    %17 = vector.shape_cast %16 : vector<16xf32> to vector<16x1xf32>
    %18 = tpu.reciprocal %17 {approx = true} : vector<16x1xf32> -> vector<16x1xf32>
    %19 = vector.broadcast %18 : vector<16x1xf32> to vector<16x16xf32>
    %20 = arith.mulf %15, %19 : vector<16x16xf32>
    %21 = arith.truncf %20 : vector<16x16xf32> to vector<16x16xbf16>
    %cst_9 = arith.constant dense<0.000000e+00> : vector<16x8xf32>
    %22 = tpu.matmul %21, %9, %cst_9 {dimension_numbers = #tpu.dot_dimension_numbers<[1], [0], [0], [1], [0, 0, 1, 1], [], []>} : vector<16x16xbf16>, vector<16x8xbf16>, vector<16x8xf32> -> vector<16x8xf32>
    %c0_10 = arith.constant 0 : index
    %c0_11 = arith.constant 0 : index
    %c8 = arith.constant 8 : index
    %23 = vector.load %arg2[%c0_10, %c0_11, %c8] : memref<1x16x96xbf16, #tpu.memory_space<vmem>>, vector<1x16x8xbf16>
    %24 = vector.shape_cast %23 : vector<1x16x8xbf16> to vector<16x8xbf16>
    %25 = arith.extf %24 : vector<16x8xbf16> to vector<16x8xf32>
    %cst_12 = arith.constant 0.353553385 : f32
    %26 = vector.broadcast %cst_12 : f32 to vector<16x8xf32>
    %27 = arith.mulf %25, %26 : vector<16x8xf32>
    %28 = arith.truncf %27 : vector<16x8xf32> to vector<16x8xbf16>
    %c0_13 = arith.constant 0 : index
    %c0_14 = arith.constant 0 : index
    %c40 = arith.constant 40 : index
    %29 = vector.load %arg3[%c0_13, %c0_14, %c40] : memref<1x16x96xbf16, #tpu.memory_space<vmem>>, vector<1x16x8xbf16>
    %30 = vector.shape_cast %29 : vector<1x16x8xbf16> to vector<16x8xbf16>
    %c0_15 = arith.constant 0 : index
    %c0_16 = arith.constant 0 : index
    %c72 = arith.constant 72 : index
    %31 = vector.load %arg3[%c0_15, %c0_16, %c72] : memref<1x16x96xbf16, #tpu.memory_space<vmem>>, vector<1x16x8xbf16>
    %32 = vector.shape_cast %31 : vector<1x16x8xbf16> to vector<16x8xbf16>
    %cst_17 = arith.constant dense<0.000000e+00> : vector<16x16xf32>
    %33 = tpu.matmul %28, %30, %cst_17 {dimension_numbers = #tpu.dot_dimension_numbers<[1], [1], [0], [0], [0, 0, 1, 0], [], []>} : vector<16x8xbf16>, vector<16x8xbf16>, vector<16x16xf32> -> vector<16x16xf32>
    %cst_18 = arith.constant dense<0xFF800000> : vector<16xf32>
    %34 = vector.multi_reduction <maximumf>, %33, %cst_18 [1] : vector<16x16xf32> to vector<16xf32>
    %35 = vector.shape_cast %34 : vector<16xf32> to vector<16x1xf32>
    %36 = vector.broadcast %35 : vector<16x1xf32> to vector<16x16xf32>
    %37 = arith.subf %33, %36 : vector<16x16xf32>
    %38 = math.exp %37 : vector<16x16xf32>
    %cst_19 = arith.constant dense<0.000000e+00> : vector<16xf32>
    %39 = vector.multi_reduction <add>, %38, %cst_19 [1] : vector<16x16xf32> to vector<16xf32>
    %40 = vector.shape_cast %39 : vector<16xf32> to vector<16x1xf32>
    %41 = tpu.reciprocal %40 {approx = true} : vector<16x1xf32> -> vector<16x1xf32>
    %42 = vector.broadcast %41 : vector<16x1xf32> to vector<16x16xf32>
    %43 = arith.mulf %38, %42 : vector<16x16xf32>
    %44 = arith.truncf %43 : vector<16x16xf32> to vector<16x16xbf16>
    %cst_20 = arith.constant dense<0.000000e+00> : vector<16x8xf32>
    %45 = tpu.matmul %44, %32, %cst_20 {dimension_numbers = #tpu.dot_dimension_numbers<[1], [0], [0], [1], [0, 0, 1, 1], [], []>} : vector<16x16xbf16>, vector<16x8xbf16>, vector<16x8xf32> -> vector<16x8xf32>
    %c0_21 = arith.constant 0 : index
    %c0_22 = arith.constant 0 : index
    %c16 = arith.constant 16 : index
    %46 = vector.load %arg2[%c0_21, %c0_22, %c16] : memref<1x16x96xbf16, #tpu.memory_space<vmem>>, vector<1x16x8xbf16>
    %47 = vector.shape_cast %46 : vector<1x16x8xbf16> to vector<16x8xbf16>
    %48 = arith.extf %47 : vector<16x8xbf16> to vector<16x8xf32>
    %cst_23 = arith.constant 0.353553385 : f32
    %49 = vector.broadcast %cst_23 : f32 to vector<16x8xf32>
    %50 = arith.mulf %48, %49 : vector<16x8xf32>
    %51 = arith.truncf %50 : vector<16x8xf32> to vector<16x8xbf16>
    %c0_24 = arith.constant 0 : index
    %c0_25 = arith.constant 0 : index
    %c48 = arith.constant 48 : index
    %52 = vector.load %arg3[%c0_24, %c0_25, %c48] : memref<1x16x96xbf16, #tpu.memory_space<vmem>>, vector<1x16x8xbf16>
    %53 = vector.shape_cast %52 : vector<1x16x8xbf16> to vector<16x8xbf16>
    %c0_26 = arith.constant 0 : index
    %c0_27 = arith.constant 0 : index
    %c80 = arith.constant 80 : index
    %54 = vector.load %arg3[%c0_26, %c0_27, %c80] : memref<1x16x96xbf16, #tpu.memory_space<vmem>>, vector<1x16x8xbf16>
    %55 = vector.shape_cast %54 : vector<1x16x8xbf16> to vector<16x8xbf16>
    %cst_28 = arith.constant dense<0.000000e+00> : vector<16x16xf32>
    %56 = tpu.matmul %51, %53, %cst_28 {dimension_numbers = #tpu.dot_dimension_numbers<[1], [1], [0], [0], [0, 0, 1, 0], [], []>} : vector<16x8xbf16>, vector<16x8xbf16>, vector<16x16xf32> -> vector<16x16xf32>
    %cst_29 = arith.constant dense<0xFF800000> : vector<16xf32>
    %57 = vector.multi_reduction <maximumf>, %56, %cst_29 [1] : vector<16x16xf32> to vector<16xf32>
    %58 = vector.shape_cast %57 : vector<16xf32> to vector<16x1xf32>
    %59 = vector.broadcast %58 : vector<16x1xf32> to vector<16x16xf32>
    %60 = arith.subf %56, %59 : vector<16x16xf32>
    %61 = math.exp %60 : vector<16x16xf32>
    %cst_30 = arith.constant dense<0.000000e+00> : vector<16xf32>
    %62 = vector.multi_reduction <add>, %61, %cst_30 [1] : vector<16x16xf32> to vector<16xf32>
    %63 = vector.shape_cast %62 : vector<16xf32> to vector<16x1xf32>
    %64 = tpu.reciprocal %63 {approx = true} : vector<16x1xf32> -> vector<16x1xf32>
    %65 = vector.broadcast %64 : vector<16x1xf32> to vector<16x16xf32>
    %66 = arith.mulf %61, %65 : vector<16x16xf32>
    %67 = arith.truncf %66 : vector<16x16xf32> to vector<16x16xbf16>
    %cst_31 = arith.constant dense<0.000000e+00> : vector<16x8xf32>
    %68 = tpu.matmul %67, %55, %cst_31 {dimension_numbers = #tpu.dot_dimension_numbers<[1], [0], [0], [1], [0, 0, 1, 1], [], []>} : vector<16x16xbf16>, vector<16x8xbf16>, vector<16x8xf32> -> vector<16x8xf32>
    %c0_32 = arith.constant 0 : index
    %c0_33 = arith.constant 0 : index
    %c24 = arith.constant 24 : index
    %69 = vector.load %arg2[%c0_32, %c0_33, %c24] : memref<1x16x96xbf16, #tpu.memory_space<vmem>>, vector<1x16x8xbf16>
    %70 = vector.shape_cast %69 : vector<1x16x8xbf16> to vector<16x8xbf16>
    %71 = arith.extf %70 : vector<16x8xbf16> to vector<16x8xf32>
    %cst_34 = arith.constant 0.353553385 : f32
    %72 = vector.broadcast %cst_34 : f32 to vector<16x8xf32>
    %73 = arith.mulf %71, %72 : vector<16x8xf32>
    %74 = arith.truncf %73 : vector<16x8xf32> to vector<16x8xbf16>
    %c0_35 = arith.constant 0 : index
    %c0_36 = arith.constant 0 : index
    %c56 = arith.constant 56 : index
    %75 = vector.load %arg3[%c0_35, %c0_36, %c56] : memref<1x16x96xbf16, #tpu.memory_space<vmem>>, vector<1x16x8xbf16>
    %76 = vector.shape_cast %75 : vector<1x16x8xbf16> to vector<16x8xbf16>
    %c0_37 = arith.constant 0 : index
    %c0_38 = arith.constant 0 : index
    %c88 = arith.constant 88 : index
    %77 = vector.load %arg3[%c0_37, %c0_38, %c88] : memref<1x16x96xbf16, #tpu.memory_space<vmem>>, vector<1x16x8xbf16>
    %78 = vector.shape_cast %77 : vector<1x16x8xbf16> to vector<16x8xbf16>
    %cst_39 = arith.constant dense<0.000000e+00> : vector<16x16xf32>
    %79 = tpu.matmul %74, %76, %cst_39 {dimension_numbers = #tpu.dot_dimension_numbers<[1], [1], [0], [0], [0, 0, 1, 0], [], []>} : vector<16x8xbf16>, vector<16x8xbf16>, vector<16x16xf32> -> vector<16x16xf32>
    %cst_40 = arith.constant dense<0xFF800000> : vector<16xf32>
    %80 = vector.multi_reduction <maximumf>, %79, %cst_40 [1] : vector<16x16xf32> to vector<16xf32>
    %81 = vector.shape_cast %80 : vector<16xf32> to vector<16x1xf32>
    %82 = vector.broadcast %81 : vector<16x1xf32> to vector<16x16xf32>
    %83 = arith.subf %79, %82 : vector<16x16xf32>
    %84 = math.exp %83 : vector<16x16xf32>
    %cst_41 = arith.constant dense<0.000000e+00> : vector<16xf32>
    %85 = vector.multi_reduction <add>, %84, %cst_41 [1] : vector<16x16xf32> to vector<16xf32>
    %86 = vector.shape_cast %85 : vector<16xf32> to vector<16x1xf32>
    %87 = tpu.reciprocal %86 {approx = true} : vector<16x1xf32> -> vector<16x1xf32>
    %88 = vector.broadcast %87 : vector<16x1xf32> to vector<16x16xf32>
    %89 = arith.mulf %84, %88 : vector<16x16xf32>
    %90 = arith.truncf %89 : vector<16x16xf32> to vector<16x16xbf16>
    %cst_42 = arith.constant dense<0.000000e+00> : vector<16x8xf32>
    %91 = tpu.matmul %90, %78, %cst_42 {dimension_numbers = #tpu.dot_dimension_numbers<[1], [0], [0], [1], [0, 0, 1, 1], [], []>} : vector<16x16xbf16>, vector<16x8xbf16>, vector<16x8xf32> -> vector<16x8xf32>
    %92 = tpu.concatenate %22, %45, %68, %91 in 1 : vector<16x8xf32>, vector<16x8xf32>, vector<16x8xf32>, vector<16x8xf32> -> vector<16x32xf32>
    %93 = arith.truncf %92 : vector<16x32xf32> to vector<16x32xbf16>
    %c0_43 = arith.constant 0 : index
    %c0_44 = arith.constant 0 : index
    %c0_45 = arith.constant 0 : index
    %94 = vector.load %arg4[%c0_43, %c0_44, %c0_45] : memref<1x16x32xbf16, #tpu.memory_space<vmem>>, vector<1x16x32xbf16>
    %95 = vector.shape_cast %94 : vector<1x16x32xbf16> to vector<16x32xbf16>
    %96 = vector.shape_cast %93 : vector<16x32xbf16> to vector<1x16x32xbf16>
    tpu.vector_store %arg4[%c0_43, %c0_44, %c0_45], %96 {strides = array<i32>} : memref<1x16x32xbf16, #tpu.memory_space<vmem>>, vector<1x16x32xbf16>,
    return
  }
  func.func @transform_0(%arg0: i32, %arg1: i32) -> (i32, i32, i32) {
    %c0_i32 = arith.constant 0 : i32
    %c0_i32_0 = arith.constant 0 : i32
    return %arg0, %arg1, %c0_i32 : i32, i32, i32
  }
  func.func @transform_1(%arg0: i32, %arg1: i32) -> (i32, i32, i32) {
    %c0_i32 = arith.constant 0 : i32
    %c0_i32_0 = arith.constant 0 : i32
    %c0_i32_1 = arith.constant 0 : i32
    return %arg0, %c0_i32, %c0_i32_0 : i32, i32, i32
  }
  func.func @transform_2(%arg0: i32, %arg1: i32) -> (i32, i32, i32) {
    %c0_i32 = arith.constant 0 : i32
    %c0_i32_0 = arith.constant 0 : i32
    return %arg0, %arg1, %c0_i32 : i32, i32, i32
  }
}

module attributes {stable_mosaic.version = 11 : i64} {
  func.func @_gemm_kernel(%arg0: i32, %arg1: i32, %arg2: i32, %arg3: memref<32x128xbf16, #tpu.memory_space<vmem>>, %arg4: memref<128x128xbf16, #tpu.memory_space<vmem>>, %arg5: memref<1x128xf32, #tpu.memory_space<vmem>>, %arg6: memref<32x128xbf16, #tpu.memory_space<vmem>>, %arg7: memref<32x128xbf16, #tpu.memory_space<vmem>>, %arg8: memref<32x128xf32, #tpu.memory_space<vmem>>) attributes {dimension_semantics = [#tpu.dimension_semantics<parallel>, #tpu.dimension_semantics<parallel>, #tpu.dimension_semantics<arbitrary>], iteration_bounds = array<i64: 1, 1, 1>, scalar_prefetch = 0 : i64, scratch_operands = 1 : i64, tpu.core_type = #tpu.core_type<tc>, window_params = [{transform_indices = @transform_0, window_bounds = array<i64: 32, 128>}, {transform_indices = @transform_1, window_bounds = array<i64: 128, 128>}, {transform_indices = @transform_2, window_bounds = array<i64: 1, 128>}, {transform_indices = @transform_3, window_bounds = array<i64: 32, 128>}, {transform_indices = @transform_4, window_bounds = array<i64: 32, 128>}]} {
    %c0_i32 = arith.constant 0 : i32
    %0 = arith.cmpi eq, %arg2, %c0_i32 : i32
    %1 = arith.extui %0 : i1 to i32
    %c0_i32_0 = arith.constant 0 : i32
    %2 = arith.cmpi ne, %1, %c0_i32_0 : i32
    scf.if %2 {
      %cst_10 = arith.constant 0.000000e+00 : f32
      %12 = vector.broadcast %cst_10 : f32 to vector<32x128xf32>
      %c0_11 = arith.constant 0 : index
      %c0_12 = arith.constant 0 : index
      %13 = vector.load %arg8[%c0_11, %c0_12] : memref<32x128xf32, #tpu.memory_space<vmem>>, vector<32x128xf32>
      tpu.vector_store %arg8[%c0_11, %c0_12], %12 {strides = array<i32>} : memref<32x128xf32, #tpu.memory_space<vmem>>, vector<32x128xf32>,
    } else {
    }
    %c0 = arith.constant 0 : index
    %c0_1 = arith.constant 0 : index
    %3 = vector.load %arg8[%c0, %c0_1] : memref<32x128xf32, #tpu.memory_space<vmem>>, vector<32x128xf32>
    %c0_2 = arith.constant 0 : index
    %c0_3 = arith.constant 0 : index
    %4 = vector.load %arg3[%c0_2, %c0_3] : memref<32x128xbf16, #tpu.memory_space<vmem>>, vector<32x128xbf16>
    %c0_4 = arith.constant 0 : index
    %c0_5 = arith.constant 0 : index
    %5 = vector.load %arg4[%c0_4, %c0_5] : memref<128x128xbf16, #tpu.memory_space<vmem>>, vector<128x128xbf16>
    %cst = arith.constant dense<0.000000e+00> : vector<32x128xf32>
    %6 = tpu.matmul %4, %5, %cst {dimension_numbers = #tpu.dot_dimension_numbers<[1], [0], [0], [1], [0, 0, 1, 1], [], []>} : vector<32x128xbf16>, vector<128x128xbf16>, vector<32x128xf32> -> vector<32x128xf32>
    %7 = arith.addf %3, %6 : vector<32x128xf32>
    %c0_6 = arith.constant 0 : index
    %c0_7 = arith.constant 0 : index
    %8 = vector.load %arg8[%c0_6, %c0_7] : memref<32x128xf32, #tpu.memory_space<vmem>>, vector<32x128xf32>
    tpu.vector_store %arg8[%c0_6, %c0_7], %7 {strides = array<i32>} : memref<32x128xf32, #tpu.memory_space<vmem>>, vector<32x128xf32>,
    %c0_i32_8 = arith.constant 0 : i32
    %9 = arith.cmpi eq, %arg2, %c0_i32_8 : i32
    %10 = arith.extui %9 : i1 to i32
    %c0_i32_9 = arith.constant 0 : i32
    %11 = arith.cmpi ne, %10, %c0_i32_9 : i32
    scf.if %11 {
      %c0_10 = arith.constant 0 : index
      %c0_11 = arith.constant 0 : index
      %12 = vector.load %arg8[%c0_10, %c0_11] : memref<32x128xf32, #tpu.memory_space<vmem>>, vector<32x128xf32>
      %c0_12 = arith.constant 0 : index
      %c0_13 = arith.constant 0 : index
      %13 = vector.load %arg5[%c0_12, %c0_13] : memref<1x128xf32, #tpu.memory_space<vmem>>, vector<1x128xf32>
      %14 = vector.broadcast %13 : vector<1x128xf32> to vector<32x128xf32>
      %15 = arith.addf %12, %14 : vector<32x128xf32>
      %c0_14 = arith.constant 0 : index
      %c0_15 = arith.constant 0 : index
      %16 = vector.load %arg6[%c0_14, %c0_15] : memref<32x128xbf16, #tpu.memory_space<vmem>>, vector<32x128xbf16>
      %17 = arith.extf %16 : vector<32x128xbf16> to vector<32x128xf32>
      %18 = arith.addf %15, %17 : vector<32x128xf32>
      %19 = arith.truncf %18 : vector<32x128xf32> to vector<32x128xbf16>
      %c0_16 = arith.constant 0 : index
      %c0_17 = arith.constant 0 : index
      %20 = vector.load %arg7[%c0_16, %c0_17] : memref<32x128xbf16, #tpu.memory_space<vmem>>, vector<32x128xbf16>
      tpu.vector_store %arg7[%c0_16, %c0_17], %19 {strides = array<i32>} : memref<32x128xbf16, #tpu.memory_space<vmem>>, vector<32x128xbf16>,
    } else {
    }
    return
  }
  func.func @transform_0(%arg0: i32, %arg1: i32, %arg2: i32) -> (i32, i32) {
    %c0_i32 = arith.constant 0 : i32
    return %arg0, %arg2 : i32, i32
  }
  func.func @transform_1(%arg0: i32, %arg1: i32, %arg2: i32) -> (i32, i32) {
    %c0_i32 = arith.constant 0 : i32
    return %arg2, %arg1 : i32, i32
  }
  func.func @transform_2(%arg0: i32, %arg1: i32, %arg2: i32) -> (i32, i32) {
    %c0_i32 = arith.constant 0 : i32
    %c0_i32_0 = arith.constant 0 : i32
    return %c0_i32, %arg1 : i32, i32
  }
  func.func @transform_3(%arg0: i32, %arg1: i32, %arg2: i32) -> (i32, i32) {
    %c0_i32 = arith.constant 0 : i32
    return %arg0, %arg1 : i32, i32
  }
  func.func @transform_4(%arg0: i32, %arg1: i32, %arg2: i32) -> (i32, i32) {
    %c0_i32 = arith.constant 0 : i32
    return %arg0, %arg1 : i32, i32
  }
}

module attributes {stable_mosaic.version = 11 : i64} {
  func.func @_cross_ctx_kernel(%arg0: i32, %arg1: memref<16x32xbf16, #tpu.memory_space<vmem>>, %arg2: memref<32x32xbf16, #tpu.memory_space<vmem>>, %arg3: memref<1x32xf32, #tpu.memory_space<vmem>>, %arg4: memref<32x32xbf16, #tpu.memory_space<vmem>>, %arg5: memref<1x32xf32, #tpu.memory_space<vmem>>, %arg6: memref<32x32xbf16, #tpu.memory_space<vmem>>, %arg7: memref<1x32xf32, #tpu.memory_space<vmem>>, %arg8: memref<16x32xf32, #tpu.memory_space<vmem>>, %arg9: memref<16x32xf32, #tpu.memory_space<vmem>>) attributes {dimension_semantics = [#tpu.dimension_semantics<arbitrary>], iteration_bounds = array<i64: 1>, scalar_prefetch = 0 : i64, scratch_operands = 0 : i64, tpu.core_type = #tpu.core_type<tc>, window_params = [{pipeline_mode = #tpu.pipeline_mode<synchronous>, transform_indices = @transform_0, window_bounds = array<i64: 16, 32>}, {pipeline_mode = #tpu.pipeline_mode<synchronous>, transform_indices = @transform_1, window_bounds = array<i64: 32, 32>}, {pipeline_mode = #tpu.pipeline_mode<synchronous>, transform_indices = @transform_2, window_bounds = array<i64: 1, 32>}, {pipeline_mode = #tpu.pipeline_mode<synchronous>, transform_indices = @transform_3, window_bounds = array<i64: 32, 32>}, {pipeline_mode = #tpu.pipeline_mode<synchronous>, transform_indices = @transform_4, window_bounds = array<i64: 1, 32>}, {pipeline_mode = #tpu.pipeline_mode<synchronous>, transform_indices = @transform_5, window_bounds = array<i64: 32, 32>}, {pipeline_mode = #tpu.pipeline_mode<synchronous>, transform_indices = @transform_6, window_bounds = array<i64: 1, 32>}, {pipeline_mode = #tpu.pipeline_mode<synchronous>, transform_indices = @transform_7, window_bounds = array<i64: 16, 32>}, {pipeline_mode = #tpu.pipeline_mode<synchronous>, transform_indices = @transform_8, window_bounds = array<i64: 16, 32>}]} {
    %c0 = arith.constant 0 : index
    %c0_0 = arith.constant 0 : index
    %0 = vector.load %arg1[%c0, %c0_0] : memref<16x32xbf16, #tpu.memory_space<vmem>>, vector<16x32xbf16>
    %c0_1 = arith.constant 0 : index
    %c0_2 = arith.constant 0 : index
    %1 = vector.load %arg2[%c0_1, %c0_2] : memref<32x32xbf16, #tpu.memory_space<vmem>>, vector<32x32xbf16>
    %cst = arith.constant dense<0.000000e+00> : vector<16x32xf32>
    %2 = tpu.matmul %0, %1, %cst {dimension_numbers = #tpu.dot_dimension_numbers<[1], [0], [0], [1], [0, 0, 1, 1], [], []>} : vector<16x32xbf16>, vector<32x32xbf16>, vector<16x32xf32> -> vector<16x32xf32>
    %c0_3 = arith.constant 0 : index
    %c0_4 = arith.constant 0 : index
    %3 = vector.load %arg3[%c0_3, %c0_4] : memref<1x32xf32, #tpu.memory_space<vmem>>, vector<1x32xf32>
    %4 = vector.broadcast %3 : vector<1x32xf32> to vector<16x32xf32>
    %5 = arith.addf %2, %4 : vector<16x32xf32>
    %6 = arith.truncf %5 : vector<16x32xf32> to vector<16x32xbf16>
    %c0_5 = arith.constant 0 : index
    %c0_6 = arith.constant 0 : index
    %7 = vector.load %arg4[%c0_5, %c0_6] : memref<32x32xbf16, #tpu.memory_space<vmem>>, vector<32x32xbf16>
    %cst_7 = arith.constant dense<0.000000e+00> : vector<16x32xf32>
    %8 = tpu.matmul %6, %7, %cst_7 {dimension_numbers = #tpu.dot_dimension_numbers<[1], [0], [0], [1], [0, 0, 1, 1], [], []>} : vector<16x32xbf16>, vector<32x32xbf16>, vector<16x32xf32> -> vector<16x32xf32>
    %c0_8 = arith.constant 0 : index
    %c0_9 = arith.constant 0 : index
    %9 = vector.load %arg5[%c0_8, %c0_9] : memref<1x32xf32, #tpu.memory_space<vmem>>, vector<1x32xf32>
    %10 = vector.broadcast %9 : vector<1x32xf32> to vector<16x32xf32>
    %11 = arith.addf %8, %10 : vector<16x32xf32>
    %12 = arith.truncf %11 : vector<16x32xf32> to vector<16x32xbf16>
    %c0_10 = arith.constant 0 : index
    %c0_11 = arith.constant 0 : index
    %13 = vector.load %arg6[%c0_10, %c0_11] : memref<32x32xbf16, #tpu.memory_space<vmem>>, vector<32x32xbf16>
    %cst_12 = arith.constant dense<0.000000e+00> : vector<16x32xf32>
    %14 = tpu.matmul %12, %13, %cst_12 {dimension_numbers = #tpu.dot_dimension_numbers<[1], [0], [0], [1], [0, 0, 1, 1], [], []>} : vector<16x32xbf16>, vector<32x32xbf16>, vector<16x32xf32> -> vector<16x32xf32>
    %c0_13 = arith.constant 0 : index
    %c0_14 = arith.constant 0 : index
    %15 = vector.load %arg7[%c0_13, %c0_14] : memref<1x32xf32, #tpu.memory_space<vmem>>, vector<1x32xf32>
    %16 = vector.broadcast %15 : vector<1x32xf32> to vector<16x32xf32>
    %17 = arith.addf %14, %16 : vector<16x32xf32>
    %18 = arith.negf %17 : vector<16x32xf32>
    %19 = math.exp %18 : vector<16x32xf32>
    %cst_15 = arith.constant 1.000000e+00 : f32
    %20 = vector.broadcast %cst_15 : f32 to vector<16x32xf32>
    %21 = arith.addf %20, %19 : vector<16x32xf32>
    %22 = arith.divf %20, %21 : vector<16x32xf32>
    %23 = arith.mulf %22, %11 : vector<16x32xf32>
    %c0_16 = arith.constant 0 : index
    %c0_17 = arith.constant 0 : index
    %24 = vector.load %arg8[%c0_16, %c0_17] : memref<16x32xf32, #tpu.memory_space<vmem>>, vector<16x32xf32>
    tpu.vector_store %arg8[%c0_16, %c0_17], %23 {strides = array<i32>} : memref<16x32xf32, #tpu.memory_space<vmem>>, vector<16x32xf32>,
    %cst_18 = arith.constant 1.000000e+00 : f32
    %25 = vector.broadcast %cst_18 : f32 to vector<16x32xf32>
    %26 = arith.subf %25, %22 : vector<16x32xf32>
    %c0_19 = arith.constant 0 : index
    %c0_20 = arith.constant 0 : index
    %27 = vector.load %arg9[%c0_19, %c0_20] : memref<16x32xf32, #tpu.memory_space<vmem>>, vector<16x32xf32>
    tpu.vector_store %arg9[%c0_19, %c0_20], %26 {strides = array<i32>} : memref<16x32xf32, #tpu.memory_space<vmem>>, vector<16x32xf32>,
    return
  }
  func.func @transform_0(%arg0: i32) -> (i32, i32) {
    %c0_i32 = arith.constant 0 : i32
    %c0_i32_0 = arith.constant 0 : i32
    %c0_i32_1 = arith.constant 0 : i32
    return %c0_i32, %c0_i32_0 : i32, i32
  }
  func.func @transform_1(%arg0: i32) -> (i32, i32) {
    %c0_i32 = arith.constant 0 : i32
    %c0_i32_0 = arith.constant 0 : i32
    %c0_i32_1 = arith.constant 0 : i32
    return %c0_i32, %c0_i32_0 : i32, i32
  }
  func.func @transform_2(%arg0: i32) -> (i32, i32) {
    %c0_i32 = arith.constant 0 : i32
    %c0_i32_0 = arith.constant 0 : i32
    %c0_i32_1 = arith.constant 0 : i32
    return %c0_i32, %c0_i32_0 : i32, i32
  }
  func.func @transform_3(%arg0: i32) -> (i32, i32) {
    %c0_i32 = arith.constant 0 : i32
    %c0_i32_0 = arith.constant 0 : i32
    %c0_i32_1 = arith.constant 0 : i32
    return %c0_i32, %c0_i32_0 : i32, i32
  }
  func.func @transform_4(%arg0: i32) -> (i32, i32) {
    %c0_i32 = arith.constant 0 : i32
    %c0_i32_0 = arith.constant 0 : i32
    %c0_i32_1 = arith.constant 0 : i32
    return %c0_i32, %c0_i32_0 : i32, i32
  }
  func.func @transform_5(%arg0: i32) -> (i32, i32) {
    %c0_i32 = arith.constant 0 : i32
    %c0_i32_0 = arith.constant 0 : i32
    %c0_i32_1 = arith.constant 0 : i32
    return %c0_i32, %c0_i32_0 : i32, i32
  }
  func.func @transform_6(%arg0: i32) -> (i32, i32) {
    %c0_i32 = arith.constant 0 : i32
    %c0_i32_0 = arith.constant 0 : i32
    %c0_i32_1 = arith.constant 0 : i32
    return %c0_i32, %c0_i32_0 : i32, i32
  }
  func.func @transform_7(%arg0: i32) -> (i32, i32) {
    %c0_i32 = arith.constant 0 : i32
    %c0_i32_0 = arith.constant 0 : i32
    %c0_i32_1 = arith.constant 0 : i32
    return %c0_i32, %c0_i32_0 : i32, i32
  }
  func.func @transform_8(%arg0: i32) -> (i32, i32) {
    %c0_i32 = arith.constant 0 : i32
    %c0_i32_0 = arith.constant 0 : i32
    %c0_i32_1 = arith.constant 0 : i32
    return %c0_i32, %c0_i32_0 : i32, i32
  }
}

module attributes {stable_mosaic.version = 11 : i64} {
  func.func @_gate_norm_kernel(%arg0: i32, %arg1: i32, %arg2: memref<1x16x32xbf16, #tpu.memory_space<vmem>>, %arg3: memref<1x1x32xf32, #tpu.memory_space<vmem>>, %arg4: memref<1x1x32xf32, #tpu.memory_space<vmem>>, %arg5: memref<1x32xf32, #tpu.memory_space<vmem>>, %arg6: memref<1x32xf32, #tpu.memory_space<vmem>>, %arg7: memref<1x16x32xbf16, #tpu.memory_space<vmem>>, %arg8: memref<1x16x32xbf16, #tpu.memory_space<vmem>>) attributes {dimension_semantics = [#tpu.dimension_semantics<parallel>, #tpu.dimension_semantics<parallel>], iteration_bounds = array<i64: 2, 1>, scalar_prefetch = 0 : i64, scratch_operands = 0 : i64, tpu.core_type = #tpu.core_type<tc>, window_params = [{transform_indices = @transform_0, window_bounds = array<i64: 1, 16, 32>}, {transform_indices = @transform_1, window_bounds = array<i64: 1, 1, 32>}, {transform_indices = @transform_2, window_bounds = array<i64: 1, 1, 32>}, {pipeline_mode = #tpu.pipeline_mode<synchronous>, transform_indices = @transform_3, window_bounds = array<i64: 1, 32>}, {pipeline_mode = #tpu.pipeline_mode<synchronous>, transform_indices = @transform_4, window_bounds = array<i64: 1, 32>}, {transform_indices = @transform_5, window_bounds = array<i64: 1, 16, 32>}, {transform_indices = @transform_6, window_bounds = array<i64: 1, 16, 32>}]} {
    %c0 = arith.constant 0 : index
    %c0_0 = arith.constant 0 : index
    %c0_1 = arith.constant 0 : index
    %0 = vector.load %arg2[%c0, %c0_0, %c0_1] : memref<1x16x32xbf16, #tpu.memory_space<vmem>>, vector<1x16x32xbf16>
    %1 = vector.shape_cast %0 : vector<1x16x32xbf16> to vector<16x32xbf16>
    %2 = arith.extf %1 : vector<16x32xbf16> to vector<16x32xf32>
    %c0_2 = arith.constant 0 : index
    %c0_3 = arith.constant 0 : index
    %c0_4 = arith.constant 0 : index
    %3 = vector.load %arg3[%c0_2, %c0_3, %c0_4] : memref<1x1x32xf32, #tpu.memory_space<vmem>>, vector<1x1x32xf32>
    %4 = vector.shape_cast %3 : vector<1x1x32xf32> to vector<1x32xf32>
    %c0_5 = arith.constant 0 : index
    %c0_6 = arith.constant 0 : index
    %c0_7 = arith.constant 0 : index
    %5 = vector.load %arg4[%c0_5, %c0_6, %c0_7] : memref<1x1x32xf32, #tpu.memory_space<vmem>>, vector<1x1x32xf32>
    %6 = vector.shape_cast %5 : vector<1x1x32xf32> to vector<1x32xf32>
    %7 = vector.broadcast %6 : vector<1x32xf32> to vector<16x32xf32>
    %8 = arith.mulf %7, %2 : vector<16x32xf32>
    %9 = vector.broadcast %4 : vector<1x32xf32> to vector<16x32xf32>
    %10 = arith.addf %9, %8 : vector<16x32xf32>
    %11 = arith.truncf %10 : vector<16x32xf32> to vector<16x32xbf16>
    %c0_8 = arith.constant 0 : index
    %c0_9 = arith.constant 0 : index
    %c0_10 = arith.constant 0 : index
    %12 = vector.load %arg7[%c0_8, %c0_9, %c0_10] : memref<1x16x32xbf16, #tpu.memory_space<vmem>>, vector<1x16x32xbf16>
    %13 = vector.shape_cast %12 : vector<1x16x32xbf16> to vector<16x32xbf16>
    %14 = vector.shape_cast %11 : vector<16x32xbf16> to vector<1x16x32xbf16>
    tpu.vector_store %arg7[%c0_8, %c0_9, %c0_10], %14 {strides = array<i32>} : memref<1x16x32xbf16, #tpu.memory_space<vmem>>, vector<1x16x32xbf16>,
    %cst = arith.constant dense<0.000000e+00> : vector<16xf32>
    %15 = vector.multi_reduction <add>, %10, %cst [1] : vector<16x32xf32> to vector<16xf32>
    %16 = vector.shape_cast %15 : vector<16xf32> to vector<16x1xf32>
    %cst_11 = arith.constant 3.200000e+01 : f32
    %17 = vector.broadcast %cst_11 : f32 to vector<16x1xf32>
    %18 = arith.divf %16, %17 : vector<16x1xf32>
    %19 = vector.broadcast %18 : vector<16x1xf32> to vector<16x32xf32>
    %20 = arith.subf %10, %19 : vector<16x32xf32>
    %21 = arith.mulf %20, %20 : vector<16x32xf32>
    %cst_12 = arith.constant dense<0.000000e+00> : vector<16xf32>
    %22 = vector.multi_reduction <add>, %21, %cst_12 [1] : vector<16x32xf32> to vector<16xf32>
    %23 = vector.shape_cast %22 : vector<16xf32> to vector<16x1xf32>
    %cst_13 = arith.constant 3.200000e+01 : f32
    %24 = vector.broadcast %cst_13 : f32 to vector<16x1xf32>
    %25 = arith.divf %23, %24 : vector<16x1xf32>
    %26 = vector.broadcast %18 : vector<16x1xf32> to vector<16x32xf32>
    %27 = arith.subf %10, %26 : vector<16x32xf32>
    %cst_14 = arith.constant 9.99999974E-6 : f32
    %28 = vector.broadcast %cst_14 : f32 to vector<16x1xf32>
    %29 = arith.addf %25, %28 : vector<16x1xf32>
    %30 = math.rsqrt %29 : vector<16x1xf32>
    %31 = vector.broadcast %30 : vector<16x1xf32> to vector<16x32xf32>
    %32 = arith.mulf %27, %31 : vector<16x32xf32>
    %c0_15 = arith.constant 0 : index
    %c0_16 = arith.constant 0 : index
    %33 = vector.load %arg5[%c0_15, %c0_16] : memref<1x32xf32, #tpu.memory_space<vmem>>, vector<1x32xf32>
    %34 = vector.broadcast %33 : vector<1x32xf32> to vector<16x32xf32>
    %35 = arith.mulf %32, %34 : vector<16x32xf32>
    %c0_17 = arith.constant 0 : index
    %c0_18 = arith.constant 0 : index
    %36 = vector.load %arg6[%c0_17, %c0_18] : memref<1x32xf32, #tpu.memory_space<vmem>>, vector<1x32xf32>
    %37 = vector.broadcast %36 : vector<1x32xf32> to vector<16x32xf32>
    %38 = arith.addf %35, %37 : vector<16x32xf32>
    %39 = arith.truncf %38 : vector<16x32xf32> to vector<16x32xbf16>
    %c0_19 = arith.constant 0 : index
    %c0_20 = arith.constant 0 : index
    %c0_21 = arith.constant 0 : index
    %40 = vector.load %arg8[%c0_19, %c0_20, %c0_21] : memref<1x16x32xbf16, #tpu.memory_space<vmem>>, vector<1x16x32xbf16>
    %41 = vector.shape_cast %40 : vector<1x16x32xbf16> to vector<16x32xbf16>
    %42 = vector.shape_cast %39 : vector<16x32xbf16> to vector<1x16x32xbf16>
    tpu.vector_store %arg8[%c0_19, %c0_20, %c0_21], %42 {strides = array<i32>} : memref<1x16x32xbf16, #tpu.memory_space<vmem>>, vector<1x16x32xbf16>,
    return
  }
  func.func @transform_0(%arg0: i32, %arg1: i32) -> (i32, i32, i32) {
    %c0_i32 = arith.constant 0 : i32
    %c0_i32_0 = arith.constant 0 : i32
    return %arg0, %arg1, %c0_i32 : i32, i32, i32
  }
  func.func @transform_1(%arg0: i32, %arg1: i32) -> (i32, i32, i32) {
    %c0_i32 = arith.constant 0 : i32
    %c0_i32_0 = arith.constant 0 : i32
    %c0_i32_1 = arith.constant 0 : i32
    return %arg0, %c0_i32, %c0_i32_0 : i32, i32, i32
  }
  func.func @transform_2(%arg0: i32, %arg1: i32) -> (i32, i32, i32) {
    %c0_i32 = arith.constant 0 : i32
    %c0_i32_0 = arith.constant 0 : i32
    %c0_i32_1 = arith.constant 0 : i32
    return %arg0, %c0_i32, %c0_i32_0 : i32, i32, i32
  }
  func.func @transform_3(%arg0: i32, %arg1: i32) -> (i32, i32) {
    %c0_i32 = arith.constant 0 : i32
    %c0_i32_0 = arith.constant 0 : i32
    %c0_i32_1 = arith.constant 0 : i32
    return %c0_i32, %c0_i32_0 : i32, i32
  }
  func.func @transform_4(%arg0: i32, %arg1: i32) -> (i32, i32) {
    %c0_i32 = arith.constant 0 : i32
    %c0_i32_0 = arith.constant 0 : i32
    %c0_i32_1 = arith.constant 0 : i32
    return %c0_i32, %c0_i32_0 : i32, i32
  }
  func.func @transform_5(%arg0: i32, %arg1: i32) -> (i32, i32, i32) {
    %c0_i32 = arith.constant 0 : i32
    %c0_i32_0 = arith.constant 0 : i32
    return %arg0, %arg1, %c0_i32 : i32, i32, i32
  }
  func.func @transform_6(%arg0: i32, %arg1: i32) -> (i32, i32, i32) {
    %c0_i32 = arith.constant 0 : i32
    %c0_i32_0 = arith.constant 0 : i32
    return %arg0, %arg1, %c0_i32 : i32, i32, i32
  }
}

module attributes {stable_mosaic.version = 11 : i64} {
  func.func @_gemm_kernel(%arg0: i32, %arg1: i32, %arg2: i32, %arg3: memref<32x128xbf16, #tpu.memory_space<vmem>>, %arg4: memref<128x128xbf16, #tpu.memory_space<vmem>>, %arg5: memref<1x128xf32, #tpu.memory_space<vmem>>, %arg6: memref<32x128xf32, #tpu.memory_space<vmem>>, %arg7: memref<32x128xf32, #tpu.memory_space<vmem>>) attributes {dimension_semantics = [#tpu.dimension_semantics<parallel>, #tpu.dimension_semantics<parallel>, #tpu.dimension_semantics<arbitrary>], iteration_bounds = array<i64: 1, 1, 1>, scalar_prefetch = 0 : i64, scratch_operands = 1 : i64, tpu.core_type = #tpu.core_type<tc>, window_params = [{transform_indices = @transform_0, window_bounds = array<i64: 32, 128>}, {transform_indices = @transform_1, window_bounds = array<i64: 128, 128>}, {transform_indices = @transform_2, window_bounds = array<i64: 1, 128>}, {transform_indices = @transform_3, window_bounds = array<i64: 32, 128>}]} {
    %c0_i32 = arith.constant 0 : i32
    %0 = arith.cmpi eq, %arg2, %c0_i32 : i32
    %1 = arith.extui %0 : i1 to i32
    %c0_i32_0 = arith.constant 0 : i32
    %2 = arith.cmpi ne, %1, %c0_i32_0 : i32
    scf.if %2 {
      %cst_10 = arith.constant 0.000000e+00 : f32
      %12 = vector.broadcast %cst_10 : f32 to vector<32x128xf32>
      %c0_11 = arith.constant 0 : index
      %c0_12 = arith.constant 0 : index
      %13 = vector.load %arg7[%c0_11, %c0_12] : memref<32x128xf32, #tpu.memory_space<vmem>>, vector<32x128xf32>
      tpu.vector_store %arg7[%c0_11, %c0_12], %12 {strides = array<i32>} : memref<32x128xf32, #tpu.memory_space<vmem>>, vector<32x128xf32>,
    } else {
    }
    %c0 = arith.constant 0 : index
    %c0_1 = arith.constant 0 : index
    %3 = vector.load %arg7[%c0, %c0_1] : memref<32x128xf32, #tpu.memory_space<vmem>>, vector<32x128xf32>
    %c0_2 = arith.constant 0 : index
    %c0_3 = arith.constant 0 : index
    %4 = vector.load %arg3[%c0_2, %c0_3] : memref<32x128xbf16, #tpu.memory_space<vmem>>, vector<32x128xbf16>
    %c0_4 = arith.constant 0 : index
    %c0_5 = arith.constant 0 : index
    %5 = vector.load %arg4[%c0_4, %c0_5] : memref<128x128xbf16, #tpu.memory_space<vmem>>, vector<128x128xbf16>
    %cst = arith.constant dense<0.000000e+00> : vector<32x128xf32>
    %6 = tpu.matmul %4, %5, %cst {dimension_numbers = #tpu.dot_dimension_numbers<[1], [0], [0], [1], [0, 0, 1, 1], [], []>} : vector<32x128xbf16>, vector<128x128xbf16>, vector<32x128xf32> -> vector<32x128xf32>
    %7 = arith.addf %3, %6 : vector<32x128xf32>
    %c0_6 = arith.constant 0 : index
    %c0_7 = arith.constant 0 : index
    %8 = vector.load %arg7[%c0_6, %c0_7] : memref<32x128xf32, #tpu.memory_space<vmem>>, vector<32x128xf32>
    tpu.vector_store %arg7[%c0_6, %c0_7], %7 {strides = array<i32>} : memref<32x128xf32, #tpu.memory_space<vmem>>, vector<32x128xf32>,
    %c0_i32_8 = arith.constant 0 : i32
    %9 = arith.cmpi eq, %arg2, %c0_i32_8 : i32
    %10 = arith.extui %9 : i1 to i32
    %c0_i32_9 = arith.constant 0 : i32
    %11 = arith.cmpi ne, %10, %c0_i32_9 : i32
    scf.if %11 {
      %c0_10 = arith.constant 0 : index
      %c0_11 = arith.constant 0 : index
      %12 = vector.load %arg7[%c0_10, %c0_11] : memref<32x128xf32, #tpu.memory_space<vmem>>, vector<32x128xf32>
      %c0_12 = arith.constant 0 : index
      %c0_13 = arith.constant 0 : index
      %13 = vector.load %arg5[%c0_12, %c0_13] : memref<1x128xf32, #tpu.memory_space<vmem>>, vector<1x128xf32>
      %14 = vector.broadcast %13 : vector<1x128xf32> to vector<32x128xf32>
      %15 = arith.addf %12, %14 : vector<32x128xf32>
      %c0_14 = arith.constant 0 : index
      %c0_15 = arith.constant 0 : index
      %16 = vector.load %arg6[%c0_14, %c0_15] : memref<32x128xf32, #tpu.memory_space<vmem>>, vector<32x128xf32>
      tpu.vector_store %arg6[%c0_14, %c0_15], %15 {strides = array<i32>} : memref<32x128xf32, #tpu.memory_space<vmem>>, vector<32x128xf32>,
    } else {
    }
    return
  }
  func.func @transform_0(%arg0: i32, %arg1: i32, %arg2: i32) -> (i32, i32) {
    %c0_i32 = arith.constant 0 : i32
    return %arg0, %arg2 : i32, i32
  }
  func.func @transform_1(%arg0: i32, %arg1: i32, %arg2: i32) -> (i32, i32) {
    %c0_i32 = arith.constant 0 : i32
    return %arg2, %arg1 : i32, i32
  }
  func.func @transform_2(%arg0: i32, %arg1: i32, %arg2: i32) -> (i32, i32) {
    %c0_i32 = arith.constant 0 : i32
    %c0_i32_0 = arith.constant 0 : i32
    return %c0_i32, %arg1 : i32, i32
  }
  func.func @transform_3(%arg0: i32, %arg1: i32, %arg2: i32) -> (i32, i32) {
    %c0_i32 = arith.constant 0 : i32
    return %arg0, %arg1 : i32, i32
  }
}

module attributes {stable_mosaic.version = 11 : i64} {
  func.func @_moe_kernel(%arg0: i32, %arg1: i32, %arg2: i32, %arg3: memref<32x32xbf16, #tpu.memory_space<vmem>>, %arg4: memref<1x32x1xf32, #tpu.memory_space<vmem>>, %arg5: memref<1x32x128xbf16, #tpu.memory_space<vmem>>, %arg6: memref<1x1x128xf32, #tpu.memory_space<vmem>>, %arg7: memref<1x128x32xbf16, #tpu.memory_space<vmem>>, %arg8: memref<1x1x32xf32, #tpu.memory_space<vmem>>, %arg9: memref<32x32xbf16, #tpu.memory_space<vmem>>, %arg10: memref<32x32xbf16, #tpu.memory_space<vmem>>, %arg11: memref<32x32xf32, #tpu.memory_space<vmem>>) attributes {dimension_semantics = [#tpu.dimension_semantics<parallel>, #tpu.dimension_semantics<arbitrary>, #tpu.dimension_semantics<arbitrary>], iteration_bounds = array<i64: 1, 6, 1>, scalar_prefetch = 0 : i64, scratch_operands = 1 : i64, tpu.core_type = #tpu.core_type<tc>, window_params = [{transform_indices = @transform_0, window_bounds = array<i64: 32, 32>}, {transform_indices = @transform_1, window_bounds = array<i64: 1, 32, 1>}, {transform_indices = @transform_2, window_bounds = array<i64: 1, 32, 128>}, {transform_indices = @transform_3, window_bounds = array<i64: 1, 1, 128>}, {transform_indices = @transform_4, window_bounds = array<i64: 1, 128, 32>}, {transform_indices = @transform_5, window_bounds = array<i64: 1, 1, 32>}, {transform_indices = @transform_6, window_bounds = array<i64: 32, 32>}, {transform_indices = @transform_7, window_bounds = array<i64: 32, 32>}]} {
    %c0_i32 = arith.constant 0 : i32
    %0 = arith.cmpi eq, %arg1, %c0_i32 : i32
    %c0_i32_0 = arith.constant 0 : i32
    %1 = arith.cmpi eq, %arg2, %c0_i32_0 : i32
    %2 = arith.andi %0, %1 : i1
    %3 = arith.extui %2 : i1 to i32
    %c0_i32_1 = arith.constant 0 : i32
    %4 = arith.cmpi ne, %3, %c0_i32_1 : i32
    scf.if %4 {
      %cst_39 = arith.constant 0.000000e+00 : f32
      %72 = vector.broadcast %cst_39 : f32 to vector<32x32xf32>
      %c0_40 = arith.constant 0 : index
      %c0_41 = arith.constant 0 : index
      %73 = vector.load %arg11[%c0_40, %c0_41] : memref<32x32xf32, #tpu.memory_space<vmem>>, vector<32x32xf32>
      tpu.vector_store %arg11[%c0_40, %c0_41], %72 {strides = array<i32>} : memref<32x32xf32, #tpu.memory_space<vmem>>, vector<32x32xf32>,
    } else {
    }
    %c0 = arith.constant 0 : index
    %c0_2 = arith.constant 0 : index
    %c0_3 = arith.constant 0 : index
    %5 = vector.load %arg4[%c0, %c0_2, %c0_3] : memref<1x32x1xf32, #tpu.memory_space<vmem>>, vector<1x32x1xf32>
    %6 = vector.shape_cast %5 : vector<1x32x1xf32> to vector<32x1xf32>
    %c0_i32_4 = arith.constant 0 : i32
    %7 = arith.cmpi eq, %arg2, %c0_i32_4 : i32
    %8 = arith.extui %7 : i1 to i32
    %c0_i32_5 = arith.constant 0 : i32
    %9 = arith.cmpi ne, %8, %c0_i32_5 : i32
    scf.if %9 {
      %c0_39 = arith.constant 0 : index
      %c0_40 = arith.constant 0 : index
      %72 = vector.load %arg11[%c0_39, %c0_40] : memref<32x32xf32, #tpu.memory_space<vmem>>, vector<32x32xf32>
      %c0_41 = arith.constant 0 : index
      %c0_42 = arith.constant 0 : index
      %c0_43 = arith.constant 0 : index
      %73 = vector.load %arg8[%c0_41, %c0_42, %c0_43] : memref<1x1x32xf32, #tpu.memory_space<vmem>>, vector<1x1x32xf32>
      %74 = vector.shape_cast %73 : vector<1x1x32xf32> to vector<1x32xf32>
      %75 = vector.broadcast %6 : vector<32x1xf32> to vector<32x32xf32>
      %76 = vector.broadcast %74 : vector<1x32xf32> to vector<32x32xf32>
      %77 = arith.mulf %75, %76 : vector<32x32xf32>
      %78 = arith.addf %72, %77 : vector<32x32xf32>
      %c0_44 = arith.constant 0 : index
      %c0_45 = arith.constant 0 : index
      %79 = vector.load %arg11[%c0_44, %c0_45] : memref<32x32xf32, #tpu.memory_space<vmem>>, vector<32x32xf32>
      tpu.vector_store %arg11[%c0_44, %c0_45], %78 {strides = array<i32>} : memref<32x32xf32, #tpu.memory_space<vmem>>, vector<32x32xf32>,
    } else {
    }
    %c0_6 = arith.constant 0 : index
    %c0_7 = arith.constant 0 : index
    %10 = vector.load %arg3[%c0_6, %c0_7] : memref<32x32xbf16, #tpu.memory_space<vmem>>, vector<32x32xbf16>
    %c0_8 = arith.constant 0 : index
    %c0_9 = arith.constant 0 : index
    %c0_10 = arith.constant 0 : index
    %11 = vector.load %arg5[%c0_8, %c0_9, %c0_10] : memref<1x32x128xbf16, #tpu.memory_space<vmem>>, vector<1x32x128xbf16>
    %12 = vector.shape_cast %11 : vector<1x32x128xbf16> to vector<32x128xbf16>
    %cst = arith.constant dense<0.000000e+00> : vector<32x128xf32>
    %13 = tpu.matmul %10, %12, %cst {dimension_numbers = #tpu.dot_dimension_numbers<[1], [0], [0], [1], [0, 0, 1, 1], [], []>} : vector<32x32xbf16>, vector<32x128xbf16>, vector<32x128xf32> -> vector<32x128xf32>
    %c0_11 = arith.constant 0 : index
    %c0_12 = arith.constant 0 : index
    %c0_13 = arith.constant 0 : index
    %14 = vector.load %arg6[%c0_11, %c0_12, %c0_13] : memref<1x1x128xf32, #tpu.memory_space<vmem>>, vector<1x1x128xf32>
    %15 = vector.shape_cast %14 : vector<1x1x128xf32> to vector<1x128xf32>
    %16 = vector.broadcast %15 : vector<1x128xf32> to vector<32x128xf32>
    %17 = arith.addf %13, %16 : vector<32x128xf32>
    %cst_14 = arith.constant 5.000000e-01 : f32
    %18 = vector.broadcast %cst_14 : f32 to vector<32x128xf32>
    %19 = arith.mulf %18, %17 : vector<32x128xf32>
    %cst_15 = arith.constant 0.707106769 : f32
    %20 = vector.broadcast %cst_15 : f32 to vector<32x128xf32>
    %21 = arith.mulf %17, %20 : vector<32x128xf32>
    %cst_16 = arith.constant 0.000000e+00 : f32
    %22 = vector.broadcast %cst_16 : f32 to vector<32x128xf32>
    %23 = arith.cmpf oge, %21, %22 : vector<32x128xf32>
    %cst_17 = arith.constant 1.000000e+00 : f32
    %cst_18 = arith.constant -1.000000e+00 : f32
    %24 = vector.broadcast %cst_17 : f32 to vector<32x128xf32>
    %25 = vector.broadcast %cst_18 : f32 to vector<32x128xf32>
    %26 = arith.select %23, %24, %25 : vector<32x128xi1>, vector<32x128xf32>
    %27 = math.absf %21 : vector<32x128xf32>
    %cst_19 = arith.constant 0.327591091 : f32
    %28 = vector.broadcast %cst_19 : f32 to vector<32x128xf32>
    %29 = arith.mulf %28, %27 : vector<32x128xf32>
    %cst_20 = arith.constant 1.000000e+00 : f32
    %30 = vector.broadcast %cst_20 : f32 to vector<32x128xf32>
    %31 = arith.addf %30, %29 : vector<32x128xf32>
    %32 = tpu.reciprocal %31 {approx = true} : vector<32x128xf32> -> vector<32x128xf32>
    %cst_21 = arith.constant 1.06140542 : f32
    %33 = vector.broadcast %cst_21 : f32 to vector<32x128xf32>
    %34 = arith.mulf %33, %32 : vector<32x128xf32>
    %cst_22 = arith.constant -1.45315206 : f32
    %35 = vector.broadcast %cst_22 : f32 to vector<32x128xf32>
    %36 = arith.addf %34, %35 : vector<32x128xf32>
    %37 = arith.mulf %36, %32 : vector<32x128xf32>
    %cst_23 = arith.constant 1.42141378 : f32
    %38 = vector.broadcast %cst_23 : f32 to vector<32x128xf32>
    %39 = arith.addf %37, %38 : vector<32x128xf32>
    %40 = arith.mulf %39, %32 : vector<32x128xf32>
    %cst_24 = arith.constant -0.284496725 : f32
    %41 = vector.broadcast %cst_24 : f32 to vector<32x128xf32>
    %42 = arith.addf %40, %41 : vector<32x128xf32>
    %43 = arith.mulf %42, %32 : vector<32x128xf32>
    %cst_25 = arith.constant 0.254829586 : f32
    %44 = vector.broadcast %cst_25 : f32 to vector<32x128xf32>
    %45 = arith.addf %43, %44 : vector<32x128xf32>
    %46 = arith.mulf %45, %32 : vector<32x128xf32>
    %cst_26 = arith.constant 0.000000e+00 : f32
    %47 = vector.broadcast %cst_26 : f32 to vector<32x128xf32>
    %48 = arith.subf %47, %27 : vector<32x128xf32>
    %49 = arith.mulf %48, %27 : vector<32x128xf32>
    %50 = math.exp %49 : vector<32x128xf32>
    %51 = arith.mulf %46, %50 : vector<32x128xf32>
    %cst_27 = arith.constant 1.000000e+00 : f32
    %52 = vector.broadcast %cst_27 : f32 to vector<32x128xf32>
    %53 = arith.subf %52, %51 : vector<32x128xf32>
    %54 = arith.mulf %26, %53 : vector<32x128xf32>
    %cst_28 = arith.constant 1.000000e+00 : f32
    %55 = vector.broadcast %cst_28 : f32 to vector<32x128xf32>
    %56 = arith.addf %55, %54 : vector<32x128xf32>
    %57 = arith.mulf %19, %56 : vector<32x128xf32>
    %58 = arith.truncf %57 : vector<32x128xf32> to vector<32x128xbf16>
    %c0_29 = arith.constant 0 : index
    %c0_30 = arith.constant 0 : index
    %c0_31 = arith.constant 0 : index
    %59 = vector.load %arg7[%c0_29, %c0_30, %c0_31] : memref<1x128x32xbf16, #tpu.memory_space<vmem>>, vector<1x128x32xbf16>
    %60 = vector.shape_cast %59 : vector<1x128x32xbf16> to vector<128x32xbf16>
    %cst_32 = arith.constant dense<0.000000e+00> : vector<32x32xf32>
    %61 = tpu.matmul %58, %60, %cst_32 {dimension_numbers = #tpu.dot_dimension_numbers<[1], [0], [0], [1], [0, 0, 1, 1], [], []>} : vector<32x128xbf16>, vector<128x32xbf16>, vector<32x32xf32> -> vector<32x32xf32>
    %c0_33 = arith.constant 0 : index
    %c0_34 = arith.constant 0 : index
    %62 = vector.load %arg11[%c0_33, %c0_34] : memref<32x32xf32, #tpu.memory_space<vmem>>, vector<32x32xf32>
    %63 = vector.broadcast %6 : vector<32x1xf32> to vector<32x32xf32>
    %64 = arith.mulf %63, %61 : vector<32x32xf32>
    %65 = arith.addf %62, %64 : vector<32x32xf32>
    %c0_35 = arith.constant 0 : index
    %c0_36 = arith.constant 0 : index
    %66 = vector.load %arg11[%c0_35, %c0_36] : memref<32x32xf32, #tpu.memory_space<vmem>>, vector<32x32xf32>
    tpu.vector_store %arg11[%c0_35, %c0_36], %65 {strides = array<i32>} : memref<32x32xf32, #tpu.memory_space<vmem>>, vector<32x32xf32>,
    %c5_i32 = arith.constant 5 : i32
    %67 = arith.cmpi eq, %arg1, %c5_i32 : i32
    %c0_i32_37 = arith.constant 0 : i32
    %68 = arith.cmpi eq, %arg2, %c0_i32_37 : i32
    %69 = arith.andi %67, %68 : i1
    %70 = arith.extui %69 : i1 to i32
    %c0_i32_38 = arith.constant 0 : i32
    %71 = arith.cmpi ne, %70, %c0_i32_38 : i32
    scf.if %71 {
      %c0_39 = arith.constant 0 : index
      %c0_40 = arith.constant 0 : index
      %72 = vector.load %arg11[%c0_39, %c0_40] : memref<32x32xf32, #tpu.memory_space<vmem>>, vector<32x32xf32>
      %c0_41 = arith.constant 0 : index
      %c0_42 = arith.constant 0 : index
      %73 = vector.load %arg9[%c0_41, %c0_42] : memref<32x32xbf16, #tpu.memory_space<vmem>>, vector<32x32xbf16>
      %74 = arith.extf %73 : vector<32x32xbf16> to vector<32x32xf32>
      %75 = arith.addf %72, %74 : vector<32x32xf32>
      %76 = arith.truncf %75 : vector<32x32xf32> to vector<32x32xbf16>
      %c0_43 = arith.constant 0 : index
      %c0_44 = arith.constant 0 : index
      %77 = vector.load %arg10[%c0_43, %c0_44] : memref<32x32xbf16, #tpu.memory_space<vmem>>, vector<32x32xbf16>
      tpu.vector_store %arg10[%c0_43, %c0_44], %76 {strides = array<i32>} : memref<32x32xbf16, #tpu.memory_space<vmem>>, vector<32x32xbf16>,
    } else {
    }
    return
  }
  func.func @transform_0(%arg0: i32, %arg1: i32, %arg2: i32) -> (i32, i32) {
    %c0_i32 = arith.constant 0 : i32
    %c0_i32_0 = arith.constant 0 : i32
    return %arg0, %c0_i32 : i32, i32
  }
  func.func @transform_1(%arg0: i32, %arg1: i32, %arg2: i32) -> (i32, i32, i32) {
    %c0_i32 = arith.constant 0 : i32
    %c0_i32_0 = arith.constant 0 : i32
    return %arg1, %arg0, %c0_i32 : i32, i32, i32
  }
  func.func @transform_2(%arg0: i32, %arg1: i32, %arg2: i32) -> (i32, i32, i32) {
    %c0_i32 = arith.constant 0 : i32
    %c0_i32_0 = arith.constant 0 : i32
    return %arg1, %c0_i32, %arg2 : i32, i32, i32
  }
  func.func @transform_3(%arg0: i32, %arg1: i32, %arg2: i32) -> (i32, i32, i32) {
    %c0_i32 = arith.constant 0 : i32
    %c0_i32_0 = arith.constant 0 : i32
    return %arg1, %c0_i32, %arg2 : i32, i32, i32
  }
  func.func @transform_4(%arg0: i32, %arg1: i32, %arg2: i32) -> (i32, i32, i32) {
    %c0_i32 = arith.constant 0 : i32
    %c0_i32_0 = arith.constant 0 : i32
    return %arg1, %arg2, %c0_i32 : i32, i32, i32
  }
  func.func @transform_5(%arg0: i32, %arg1: i32, %arg2: i32) -> (i32, i32, i32) {
    %c0_i32 = arith.constant 0 : i32
    %c0_i32_0 = arith.constant 0 : i32
    %c0_i32_1 = arith.constant 0 : i32
    return %arg1, %c0_i32, %c0_i32_0 : i32, i32, i32
  }
  func.func @transform_6(%arg0: i32, %arg1: i32, %arg2: i32) -> (i32, i32) {
    %c0_i32 = arith.constant 0 : i32
    %c0_i32_0 = arith.constant 0 : i32
    return %arg0, %c0_i32 : i32, i32
  }
  func.func @transform_7(%arg0: i32, %arg1: i32, %arg2: i32) -> (i32, i32) {
    %c0_i32 = arith.constant 0 : i32
    %c0_i32_0 = arith.constant 0 : i32
    return %arg0, %c0_i32 : i32, i32
  }
}

module attributes {stable_mosaic.version = 11 : i64} {
  func.func @_ffn_kernel(%arg0: i32, %arg1: i32, %arg2: memref<32x32xbf16, #tpu.memory_space<vmem>>, %arg3: memref<1x32xf32, #tpu.memory_space<vmem>>, %arg4: memref<1x32xf32, #tpu.memory_space<vmem>>, %arg5: memref<32x128xbf16, #tpu.memory_space<vmem>>, %arg6: memref<1x128xf32, #tpu.memory_space<vmem>>, %arg7: memref<128x32xbf16, #tpu.memory_space<vmem>>, %arg8: memref<1x32xf32, #tpu.memory_space<vmem>>, %arg9: memref<32x32xbf16, #tpu.memory_space<vmem>>, %arg10: memref<32x32xf32, #tpu.memory_space<vmem>>, %arg11: memref<32x32xbf16, #tpu.memory_space<vmem>>) attributes {dimension_semantics = [#tpu.dimension_semantics<parallel>, #tpu.dimension_semantics<arbitrary>], iteration_bounds = array<i64: 1, 1>, scalar_prefetch = 0 : i64, scratch_operands = 2 : i64, tpu.core_type = #tpu.core_type<tc>, window_params = [{transform_indices = @transform_0, window_bounds = array<i64: 32, 32>}, {pipeline_mode = #tpu.pipeline_mode<synchronous>, transform_indices = @transform_1, window_bounds = array<i64: 1, 32>}, {pipeline_mode = #tpu.pipeline_mode<synchronous>, transform_indices = @transform_2, window_bounds = array<i64: 1, 32>}, {transform_indices = @transform_3, window_bounds = array<i64: 32, 128>}, {transform_indices = @transform_4, window_bounds = array<i64: 1, 128>}, {transform_indices = @transform_5, window_bounds = array<i64: 128, 32>}, {pipeline_mode = #tpu.pipeline_mode<synchronous>, transform_indices = @transform_6, window_bounds = array<i64: 1, 32>}, {transform_indices = @transform_7, window_bounds = array<i64: 32, 32>}]} {
    %c0_i32 = arith.constant 0 : i32
    %0 = arith.cmpi eq, %arg1, %c0_i32 : i32
    %1 = arith.extui %0 : i1 to i32
    %c0_i32_0 = arith.constant 0 : i32
    %2 = arith.cmpi ne, %1, %c0_i32_0 : i32
    scf.if %2 {
      %c0_30 = arith.constant 0 : index
      %c0_31 = arith.constant 0 : index
      %58 = vector.load %arg2[%c0_30, %c0_31] : memref<32x32xbf16, #tpu.memory_space<vmem>>, vector<32x32xbf16>
      %59 = arith.extf %58 : vector<32x32xbf16> to vector<32x32xf32>
      %cst_32 = arith.constant dense<0.000000e+00> : vector<32xf32>
      %60 = vector.multi_reduction <add>, %59, %cst_32 [1] : vector<32x32xf32> to vector<32xf32>
      %61 = vector.shape_cast %60 : vector<32xf32> to vector<32x1xf32>
      %cst_33 = arith.constant 3.200000e+01 : f32
      %62 = vector.broadcast %cst_33 : f32 to vector<32x1xf32>
      %63 = arith.divf %61, %62 : vector<32x1xf32>
      %64 = vector.broadcast %63 : vector<32x1xf32> to vector<32x32xf32>
      %65 = arith.subf %59, %64 : vector<32x32xf32>
      %66 = arith.mulf %65, %65 : vector<32x32xf32>
      %cst_34 = arith.constant dense<0.000000e+00> : vector<32xf32>
      %67 = vector.multi_reduction <add>, %66, %cst_34 [1] : vector<32x32xf32> to vector<32xf32>
      %68 = vector.shape_cast %67 : vector<32xf32> to vector<32x1xf32>
      %cst_35 = arith.constant 3.200000e+01 : f32
      %69 = vector.broadcast %cst_35 : f32 to vector<32x1xf32>
      %70 = arith.divf %68, %69 : vector<32x1xf32>
      %71 = vector.broadcast %63 : vector<32x1xf32> to vector<32x32xf32>
      %72 = arith.subf %59, %71 : vector<32x32xf32>
      %cst_36 = arith.constant 9.99999974E-6 : f32
      %73 = vector.broadcast %cst_36 : f32 to vector<32x1xf32>
      %74 = arith.addf %70, %73 : vector<32x1xf32>
      %75 = math.rsqrt %74 : vector<32x1xf32>
      %76 = vector.broadcast %75 : vector<32x1xf32> to vector<32x32xf32>
      %77 = arith.mulf %72, %76 : vector<32x32xf32>
      %c0_37 = arith.constant 0 : index
      %c0_38 = arith.constant 0 : index
      %78 = vector.load %arg3[%c0_37, %c0_38] : memref<1x32xf32, #tpu.memory_space<vmem>>, vector<1x32xf32>
      %79 = vector.broadcast %78 : vector<1x32xf32> to vector<32x32xf32>
      %80 = arith.mulf %77, %79 : vector<32x32xf32>
      %c0_39 = arith.constant 0 : index
      %c0_40 = arith.constant 0 : index
      %81 = vector.load %arg4[%c0_39, %c0_40] : memref<1x32xf32, #tpu.memory_space<vmem>>, vector<1x32xf32>
      %82 = vector.broadcast %81 : vector<1x32xf32> to vector<32x32xf32>
      %83 = arith.addf %80, %82 : vector<32x32xf32>
      %84 = arith.truncf %83 : vector<32x32xf32> to vector<32x32xbf16>
      %c0_41 = arith.constant 0 : index
      %c0_42 = arith.constant 0 : index
      %85 = vector.load %arg11[%c0_41, %c0_42] : memref<32x32xbf16, #tpu.memory_space<vmem>>, vector<32x32xbf16>
      tpu.vector_store %arg11[%c0_41, %c0_42], %84 {strides = array<i32>} : memref<32x32xbf16, #tpu.memory_space<vmem>>, vector<32x32xbf16>,
      %cst_43 = arith.constant 0.000000e+00 : f32
      %86 = vector.broadcast %cst_43 : f32 to vector<32x32xf32>
      %c0_44 = arith.constant 0 : index
      %c0_45 = arith.constant 0 : index
      %87 = vector.load %arg10[%c0_44, %c0_45] : memref<32x32xf32, #tpu.memory_space<vmem>>, vector<32x32xf32>
      tpu.vector_store %arg10[%c0_44, %c0_45], %86 {strides = array<i32>} : memref<32x32xf32, #tpu.memory_space<vmem>>, vector<32x32xf32>,
    } else {
    }
    %c0 = arith.constant 0 : index
    %c0_1 = arith.constant 0 : index
    %3 = vector.load %arg11[%c0, %c0_1] : memref<32x32xbf16, #tpu.memory_space<vmem>>, vector<32x32xbf16>
    %c0_2 = arith.constant 0 : index
    %c0_3 = arith.constant 0 : index
    %4 = vector.load %arg5[%c0_2, %c0_3] : memref<32x128xbf16, #tpu.memory_space<vmem>>, vector<32x128xbf16>
    %cst = arith.constant dense<0.000000e+00> : vector<32x128xf32>
    %5 = tpu.matmul %3, %4, %cst {dimension_numbers = #tpu.dot_dimension_numbers<[1], [0], [0], [1], [0, 0, 1, 1], [], []>} : vector<32x32xbf16>, vector<32x128xbf16>, vector<32x128xf32> -> vector<32x128xf32>
    %c0_4 = arith.constant 0 : index
    %c0_5 = arith.constant 0 : index
    %6 = vector.load %arg6[%c0_4, %c0_5] : memref<1x128xf32, #tpu.memory_space<vmem>>, vector<1x128xf32>
    %7 = vector.broadcast %6 : vector<1x128xf32> to vector<32x128xf32>
    %8 = arith.addf %5, %7 : vector<32x128xf32>
    %cst_6 = arith.constant 5.000000e-01 : f32
    %9 = vector.broadcast %cst_6 : f32 to vector<32x128xf32>
    %10 = arith.mulf %9, %8 : vector<32x128xf32>
    %cst_7 = arith.constant 0.707106769 : f32
    %11 = vector.broadcast %cst_7 : f32 to vector<32x128xf32>
    %12 = arith.mulf %8, %11 : vector<32x128xf32>
    %cst_8 = arith.constant 0.000000e+00 : f32
    %13 = vector.broadcast %cst_8 : f32 to vector<32x128xf32>
    %14 = arith.cmpf oge, %12, %13 : vector<32x128xf32>
    %cst_9 = arith.constant 1.000000e+00 : f32
    %cst_10 = arith.constant -1.000000e+00 : f32
    %15 = vector.broadcast %cst_9 : f32 to vector<32x128xf32>
    %16 = vector.broadcast %cst_10 : f32 to vector<32x128xf32>
    %17 = arith.select %14, %15, %16 : vector<32x128xi1>, vector<32x128xf32>
    %18 = math.absf %12 : vector<32x128xf32>
    %cst_11 = arith.constant 0.327591091 : f32
    %19 = vector.broadcast %cst_11 : f32 to vector<32x128xf32>
    %20 = arith.mulf %19, %18 : vector<32x128xf32>
    %cst_12 = arith.constant 1.000000e+00 : f32
    %21 = vector.broadcast %cst_12 : f32 to vector<32x128xf32>
    %22 = arith.addf %21, %20 : vector<32x128xf32>
    %23 = tpu.reciprocal %22 {approx = true} : vector<32x128xf32> -> vector<32x128xf32>
    %cst_13 = arith.constant 1.06140542 : f32
    %24 = vector.broadcast %cst_13 : f32 to vector<32x128xf32>
    %25 = arith.mulf %24, %23 : vector<32x128xf32>
    %cst_14 = arith.constant -1.45315206 : f32
    %26 = vector.broadcast %cst_14 : f32 to vector<32x128xf32>
    %27 = arith.addf %25, %26 : vector<32x128xf32>
    %28 = arith.mulf %27, %23 : vector<32x128xf32>
    %cst_15 = arith.constant 1.42141378 : f32
    %29 = vector.broadcast %cst_15 : f32 to vector<32x128xf32>
    %30 = arith.addf %28, %29 : vector<32x128xf32>
    %31 = arith.mulf %30, %23 : vector<32x128xf32>
    %cst_16 = arith.constant -0.284496725 : f32
    %32 = vector.broadcast %cst_16 : f32 to vector<32x128xf32>
    %33 = arith.addf %31, %32 : vector<32x128xf32>
    %34 = arith.mulf %33, %23 : vector<32x128xf32>
    %cst_17 = arith.constant 0.254829586 : f32
    %35 = vector.broadcast %cst_17 : f32 to vector<32x128xf32>
    %36 = arith.addf %34, %35 : vector<32x128xf32>
    %37 = arith.mulf %36, %23 : vector<32x128xf32>
    %cst_18 = arith.constant 0.000000e+00 : f32
    %38 = vector.broadcast %cst_18 : f32 to vector<32x128xf32>
    %39 = arith.subf %38, %18 : vector<32x128xf32>
    %40 = arith.mulf %39, %18 : vector<32x128xf32>
    %41 = math.exp %40 : vector<32x128xf32>
    %42 = arith.mulf %37, %41 : vector<32x128xf32>
    %cst_19 = arith.constant 1.000000e+00 : f32
    %43 = vector.broadcast %cst_19 : f32 to vector<32x128xf32>
    %44 = arith.subf %43, %42 : vector<32x128xf32>
    %45 = arith.mulf %17, %44 : vector<32x128xf32>
    %cst_20 = arith.constant 1.000000e+00 : f32
    %46 = vector.broadcast %cst_20 : f32 to vector<32x128xf32>
    %47 = arith.addf %46, %45 : vector<32x128xf32>
    %48 = arith.mulf %10, %47 : vector<32x128xf32>
    %c0_21 = arith.constant 0 : index
    %c0_22 = arith.constant 0 : index
    %49 = vector.load %arg10[%c0_21, %c0_22] : memref<32x32xf32, #tpu.memory_space<vmem>>, vector<32x32xf32>
    %50 = arith.truncf %48 : vector<32x128xf32> to vector<32x128xbf16>
    %c0_23 = arith.constant 0 : index
    %c0_24 = arith.constant 0 : index
    %51 = vector.load %arg7[%c0_23, %c0_24] : memref<128x32xbf16, #tpu.memory_space<vmem>>, vector<128x32xbf16>
    %cst_25 = arith.constant dense<0.000000e+00> : vector<32x32xf32>
    %52 = tpu.matmul %50, %51, %cst_25 {dimension_numbers = #tpu.dot_dimension_numbers<[1], [0], [0], [1], [0, 0, 1, 1], [], []>} : vector<32x128xbf16>, vector<128x32xbf16>, vector<32x32xf32> -> vector<32x32xf32>
    %53 = arith.addf %49, %52 : vector<32x32xf32>
    %c0_26 = arith.constant 0 : index
    %c0_27 = arith.constant 0 : index
    %54 = vector.load %arg10[%c0_26, %c0_27] : memref<32x32xf32, #tpu.memory_space<vmem>>, vector<32x32xf32>
    tpu.vector_store %arg10[%c0_26, %c0_27], %53 {strides = array<i32>} : memref<32x32xf32, #tpu.memory_space<vmem>>, vector<32x32xf32>,
    %c0_i32_28 = arith.constant 0 : i32
    %55 = arith.cmpi eq, %arg1, %c0_i32_28 : i32
    %56 = arith.extui %55 : i1 to i32
    %c0_i32_29 = arith.constant 0 : i32
    %57 = arith.cmpi ne, %56, %c0_i32_29 : i32
    scf.if %57 {
      %c0_30 = arith.constant 0 : index
      %c0_31 = arith.constant 0 : index
      %58 = vector.load %arg2[%c0_30, %c0_31] : memref<32x32xbf16, #tpu.memory_space<vmem>>, vector<32x32xbf16>
      %59 = arith.extf %58 : vector<32x32xbf16> to vector<32x32xf32>
      %c0_32 = arith.constant 0 : index
      %c0_33 = arith.constant 0 : index
      %60 = vector.load %arg10[%c0_32, %c0_33] : memref<32x32xf32, #tpu.memory_space<vmem>>, vector<32x32xf32>
      %61 = arith.addf %59, %60 : vector<32x32xf32>
      %c0_34 = arith.constant 0 : index
      %c0_35 = arith.constant 0 : index
      %62 = vector.load %arg8[%c0_34, %c0_35] : memref<1x32xf32, #tpu.memory_space<vmem>>, vector<1x32xf32>
      %63 = vector.broadcast %62 : vector<1x32xf32> to vector<32x32xf32>
      %64 = arith.addf %61, %63 : vector<32x32xf32>
      %65 = arith.truncf %64 : vector<32x32xf32> to vector<32x32xbf16>
      %c0_36 = arith.constant 0 : index
      %c0_37 = arith.constant 0 : index
      %66 = vector.load %arg9[%c0_36, %c0_37] : memref<32x32xbf16, #tpu.memory_space<vmem>>, vector<32x32xbf16>
      tpu.vector_store %arg9[%c0_36, %c0_37], %65 {strides = array<i32>} : memref<32x32xbf16, #tpu.memory_space<vmem>>, vector<32x32xbf16>,
    } else {
    }
    return
  }
  func.func @transform_0(%arg0: i32, %arg1: i32) -> (i32, i32) {
    %c0_i32 = arith.constant 0 : i32
    %c0_i32_0 = arith.constant 0 : i32
    return %arg0, %c0_i32 : i32, i32
  }
  func.func @transform_1(%arg0: i32, %arg1: i32) -> (i32, i32) {
    %c0_i32 = arith.constant 0 : i32
    %c0_i32_0 = arith.constant 0 : i32
    %c0_i32_1 = arith.constant 0 : i32
    return %c0_i32, %c0_i32_0 : i32, i32
  }
  func.func @transform_2(%arg0: i32, %arg1: i32) -> (i32, i32) {
    %c0_i32 = arith.constant 0 : i32
    %c0_i32_0 = arith.constant 0 : i32
    %c0_i32_1 = arith.constant 0 : i32
    return %c0_i32, %c0_i32_0 : i32, i32
  }
  func.func @transform_3(%arg0: i32, %arg1: i32) -> (i32, i32) {
    %c0_i32 = arith.constant 0 : i32
    %c0_i32_0 = arith.constant 0 : i32
    return %c0_i32, %arg1 : i32, i32
  }
  func.func @transform_4(%arg0: i32, %arg1: i32) -> (i32, i32) {
    %c0_i32 = arith.constant 0 : i32
    %c0_i32_0 = arith.constant 0 : i32
    return %c0_i32, %arg1 : i32, i32
  }
  func.func @transform_5(%arg0: i32, %arg1: i32) -> (i32, i32) {
    %c0_i32 = arith.constant 0 : i32
    %c0_i32_0 = arith.constant 0 : i32
    return %arg1, %c0_i32 : i32, i32
  }
  func.func @transform_6(%arg0: i32, %arg1: i32) -> (i32, i32) {
    %c0_i32 = arith.constant 0 : i32
    %c0_i32_0 = arith.constant 0 : i32
    %c0_i32_1 = arith.constant 0 : i32
    return %c0_i32, %c0_i32_0 : i32, i32
  }
  func.func @transform_7(%arg0: i32, %arg1: i32) -> (i32, i32) {
    %c0_i32 = arith.constant 0 : i32
    %c0_i32_0 = arith.constant 0 : i32
    return %arg0, %c0_i32 : i32, i32
  }
}

module attributes {stable_mosaic.version = 11 : i64} {
  func.func @_ln_gemm_kernel(%arg0: i32, %arg1: i32, %arg2: memref<16x32xf32, #tpu.memory_space<vmem>>, %arg3: memref<1x32xf32, #tpu.memory_space<vmem>>, %arg4: memref<1x32xf32, #tpu.memory_space<vmem>>, %arg5: memref<32x128xbf16, #tpu.memory_space<vmem>>, %arg6: memref<1x128xf32, #tpu.memory_space<vmem>>, %arg7: memref<16x128xf32, #tpu.memory_space<vmem>>, %arg8: memref<16x32xbf16, #tpu.memory_space<vmem>>) attributes {dimension_semantics = [#tpu.dimension_semantics<parallel>, #tpu.dimension_semantics<arbitrary>], iteration_bounds = array<i64: 1, 1>, scalar_prefetch = 0 : i64, scratch_operands = 1 : i64, tpu.core_type = #tpu.core_type<tc>, window_params = [{transform_indices = @transform_0, window_bounds = array<i64: 16, 32>}, {pipeline_mode = #tpu.pipeline_mode<synchronous>, transform_indices = @transform_1, window_bounds = array<i64: 1, 32>}, {pipeline_mode = #tpu.pipeline_mode<synchronous>, transform_indices = @transform_2, window_bounds = array<i64: 1, 32>}, {transform_indices = @transform_3, window_bounds = array<i64: 32, 128>}, {transform_indices = @transform_4, window_bounds = array<i64: 1, 128>}, {transform_indices = @transform_5, window_bounds = array<i64: 16, 128>}]} {
    %c0_i32 = arith.constant 0 : i32
    %0 = arith.cmpi eq, %arg1, %c0_i32 : i32
    %1 = arith.extui %0 : i1 to i32
    %c0_i32_0 = arith.constant 0 : i32
    %2 = arith.cmpi ne, %1, %c0_i32_0 : i32
    scf.if %2 {
      %c0_8 = arith.constant 0 : index
      %c0_9 = arith.constant 0 : index
      %10 = vector.load %arg2[%c0_8, %c0_9] : memref<16x32xf32, #tpu.memory_space<vmem>>, vector<16x32xf32>
      %cst_10 = arith.constant dense<0.000000e+00> : vector<16xf32>
      %11 = vector.multi_reduction <add>, %10, %cst_10 [1] : vector<16x32xf32> to vector<16xf32>
      %12 = vector.shape_cast %11 : vector<16xf32> to vector<16x1xf32>
      %cst_11 = arith.constant 3.200000e+01 : f32
      %13 = vector.broadcast %cst_11 : f32 to vector<16x1xf32>
      %14 = arith.divf %12, %13 : vector<16x1xf32>
      %15 = vector.broadcast %14 : vector<16x1xf32> to vector<16x32xf32>
      %16 = arith.subf %10, %15 : vector<16x32xf32>
      %17 = arith.mulf %16, %16 : vector<16x32xf32>
      %cst_12 = arith.constant dense<0.000000e+00> : vector<16xf32>
      %18 = vector.multi_reduction <add>, %17, %cst_12 [1] : vector<16x32xf32> to vector<16xf32>
      %19 = vector.shape_cast %18 : vector<16xf32> to vector<16x1xf32>
      %cst_13 = arith.constant 3.200000e+01 : f32
      %20 = vector.broadcast %cst_13 : f32 to vector<16x1xf32>
      %21 = arith.divf %19, %20 : vector<16x1xf32>
      %22 = vector.broadcast %14 : vector<16x1xf32> to vector<16x32xf32>
      %23 = arith.subf %10, %22 : vector<16x32xf32>
      %cst_14 = arith.constant 9.99999974E-6 : f32
      %24 = vector.broadcast %cst_14 : f32 to vector<16x1xf32>
      %25 = arith.addf %21, %24 : vector<16x1xf32>
      %26 = math.rsqrt %25 : vector<16x1xf32>
      %27 = vector.broadcast %26 : vector<16x1xf32> to vector<16x32xf32>
      %28 = arith.mulf %23, %27 : vector<16x32xf32>
      %c0_15 = arith.constant 0 : index
      %c0_16 = arith.constant 0 : index
      %29 = vector.load %arg3[%c0_15, %c0_16] : memref<1x32xf32, #tpu.memory_space<vmem>>, vector<1x32xf32>
      %30 = vector.broadcast %29 : vector<1x32xf32> to vector<16x32xf32>
      %31 = arith.mulf %28, %30 : vector<16x32xf32>
      %c0_17 = arith.constant 0 : index
      %c0_18 = arith.constant 0 : index
      %32 = vector.load %arg4[%c0_17, %c0_18] : memref<1x32xf32, #tpu.memory_space<vmem>>, vector<1x32xf32>
      %33 = vector.broadcast %32 : vector<1x32xf32> to vector<16x32xf32>
      %34 = arith.addf %31, %33 : vector<16x32xf32>
      %35 = arith.truncf %34 : vector<16x32xf32> to vector<16x32xbf16>
      %c0_19 = arith.constant 0 : index
      %c0_20 = arith.constant 0 : index
      %36 = vector.load %arg8[%c0_19, %c0_20] : memref<16x32xbf16, #tpu.memory_space<vmem>>, vector<16x32xbf16>
      tpu.vector_store %arg8[%c0_19, %c0_20], %35 {strides = array<i32>} : memref<16x32xbf16, #tpu.memory_space<vmem>>, vector<16x32xbf16>,
    } else {
    }
    %c0 = arith.constant 0 : index
    %c0_1 = arith.constant 0 : index
    %3 = vector.load %arg8[%c0, %c0_1] : memref<16x32xbf16, #tpu.memory_space<vmem>>, vector<16x32xbf16>
    %c0_2 = arith.constant 0 : index
    %c0_3 = arith.constant 0 : index
    %4 = vector.load %arg5[%c0_2, %c0_3] : memref<32x128xbf16, #tpu.memory_space<vmem>>, vector<32x128xbf16>
    %cst = arith.constant dense<0.000000e+00> : vector<16x128xf32>
    %5 = tpu.matmul %3, %4, %cst {dimension_numbers = #tpu.dot_dimension_numbers<[1], [0], [0], [1], [0, 0, 1, 1], [], []>} : vector<16x32xbf16>, vector<32x128xbf16>, vector<16x128xf32> -> vector<16x128xf32>
    %c0_4 = arith.constant 0 : index
    %c0_5 = arith.constant 0 : index
    %6 = vector.load %arg6[%c0_4, %c0_5] : memref<1x128xf32, #tpu.memory_space<vmem>>, vector<1x128xf32>
    %7 = vector.broadcast %6 : vector<1x128xf32> to vector<16x128xf32>
    %8 = arith.addf %5, %7 : vector<16x128xf32>
    %c0_6 = arith.constant 0 : index
    %c0_7 = arith.constant 0 : index
    %9 = vector.load %arg7[%c0_6, %c0_7] : memref<16x128xf32, #tpu.memory_space<vmem>>, vector<16x128xf32>
    tpu.vector_store %arg7[%c0_6, %c0_7], %8 {strides = array<i32>} : memref<16x128xf32, #tpu.memory_space<vmem>>, vector<16x128xf32>,
    return
  }
  func.func @transform_0(%arg0: i32, %arg1: i32) -> (i32, i32) {
    %c0_i32 = arith.constant 0 : i32
    %c0_i32_0 = arith.constant 0 : i32
    return %arg0, %c0_i32 : i32, i32
  }
  func.func @transform_1(%arg0: i32, %arg1: i32) -> (i32, i32) {
    %c0_i32 = arith.constant 0 : i32
    %c0_i32_0 = arith.constant 0 : i32
    %c0_i32_1 = arith.constant 0 : i32
    return %c0_i32, %c0_i32_0 : i32, i32
  }
  func.func @transform_2(%arg0: i32, %arg1: i32) -> (i32, i32) {
    %c0_i32 = arith.constant 0 : i32
    %c0_i32_0 = arith.constant 0 : i32
    %c0_i32_1 = arith.constant 0 : i32
    return %c0_i32, %c0_i32_0 : i32, i32
  }
  func.func @transform_3(%arg0: i32, %arg1: i32) -> (i32, i32) {
    %c0_i32 = arith.constant 0 : i32
    %c0_i32_0 = arith.constant 0 : i32
    return %c0_i32, %arg1 : i32, i32
  }
  func.func @transform_4(%arg0: i32, %arg1: i32) -> (i32, i32) {
    %c0_i32 = arith.constant 0 : i32
    %c0_i32_0 = arith.constant 0 : i32
    return %c0_i32, %arg1 : i32, i32
  }
  func.func @transform_5(%arg0: i32, %arg1: i32) -> (i32, i32) {
    %c0_i32 = arith.constant 0 : i32
    return %arg0, %arg1 : i32, i32
  }
}

</mosaic_0001>

<bundles_post_ra>
// kernel: multimodal_moe_forward.18
= control target key start
LH: loop header
LB: loop body
LE: loop exit
PB: predicated region body
PF: predicated region fallthrough
CT: control target
= control target key end

     0   :  { %s363_s1 = inlined_call_operand.vmem [shape: bf16[128,128], index: 1, kind: input, shape index: {}]   ;;  %s364_s0 = inlined_call_operand.vmem [shape: bf16[32,128], index: 0, kind: input, shape index: {}]   ;;  %s365_s2 = inlined_call_operand.vmem [shape: f32[1,128], index: 2, kind: input, shape index: {}]   ;;  %s366_s3 = inlined_call_operand.vmem [shape: f32[32,128], index: 3, kind: input, shape index: {}]   ;;  %s367_s4 = inlined_call_operand.vmem [shape: bf16[32,128], index: 4, kind: output, shape index: {}]  }
   0x1   :  { %v277_v0 = vld [vmem:[%s363_s1 + $0x38] sm:$0xff]   ;;  %v278_v1 = vld [vmem:[%s363_s1 + $0x30] sm:$0xff]   ;;  %v279_v2 = vld [vmem:[%s363_s1 + $0x28] sm:$0xff]  }
   0x2   :  { %257 = vmatprep.subr.bf16.mxu0 %v277_v0  ;;  %v280_v3 = vld [vmem:[%s363_s1 + $0x20] sm:$0xff]   ;;  %v281_v5 = vld [vmem:[%s363_s1 + $0x18] sm:$0xff]   ;;  %v282_v6 = vld [vmem:[%s363_s1 + $0x10] sm:$0xff]  }
   0x3   :  { %258 = vmatpush3.bf16.msra.mxu0 %v277_v0  ;;  %v285_v4 = vld [vmem:[%s364_s0] sm:$0xff]   ;;  %v283_v7 = vld [vmem:[%s363_s1 + $0x8] sm:$0xff]   ;;  %v187_v14 = vld [vmem:[%s366_s3 + $0x10] sm:$0xff] }
   0x4   :  { %259 = vmatprep.subr.bf16.mxu0 %v278_v1  ;;  %273 = vmatprep.mubr.bf16.mxu0 %v285_v4  ;;  %v284_v8 = vld [vmem:[%s363_s1] sm:$0xff]   ;;  %v286_v9 = vld [vmem:[%s364_s0 + $0x8] sm:$0xff]   ;;  %v188_v16 = vld [vmem:[%s366_s3 + $0x18] sm:$0xff] }
   0x5   :  { %v227_v11 = vld [vmem:[%s365_s2] ss:$0 sm:$0xff]  ;;  %v186_v21 = vld [vmem:[%s366_s3 + $0x8] sm:$0xff] }
   0x6   :  { %v185_v19 = vld [vmem:[%s366_s3] sm:$0xff] }
   0x7   :  { %260 = vmatpush3.bf16.msra.mxu0 %v278_v1 }
   0x8   :  { %261 = vmatprep.subr.bf16.mxu0 %v279_v2 }
   0xb   :  { %262 = vmatpush3.bf16.msra.mxu0 %v279_v2 }
   0xc   :  { %263 = vmatprep.subr.bf16.mxu0 %v280_v3 }
   0xf   :  { %264 = vmatpush3.bf16.msra.mxu0 %v280_v3 }
  0x10   :  { %265 = vmatprep.subr.bf16.mxu0 %v281_v5 }
  0x13   :  { %266 = vmatpush3.bf16.msra.mxu0 %v281_v5 }
  0x14   :  { %267 = vmatprep.subr.bf16.mxu0 %v282_v6 }
  0x17   :  { %268 = vmatpush3.bf16.msra.mxu0 %v282_v6 }
  0x18   :  { %269 = vmatprep.subr.bf16.mxu0 %v283_v7 }
  0x1b   :  { %270 = vmatpush3.bf16.msra.mxu0 %v283_v7 }
  0x1c   :  { %271 = vmatprep.subr.bf16.mxu0 %v284_v8 }
  0x1f   :  { %272 = vmatpush3.bf16.msra.mxu0 %v284_v8 }
  0x22   :  { %274 = vmatmul.mubr.bf16.vlgmr.msra.gmra.mxu0 %v286_v9 }
  0xe2   :  { %v275_v10 = vpop.f32.mrf.mxu0 }
  0xe3   :  { %v183_v13 = vadd.f32 %v275_v10, %v227_v11 }
  0xe4   :  { %v144_v12 = vpop.f32.mrf.mxu0 }
  0xe5   :  { %v181_v17 = vadd.f32 %v227_v11, %v144_v12  ;;  %v191_v22 = vadd.f32 %v187_v14, %v183_v13 }
  0xe6   :  { %v276_v15 = vpop.f32.mrf.mxu0 }
  0xe7   :  { %v184_v18 = vadd.f32 %v276_v15, %v227_v11  ;;  %v189_v25 = vadd.f32 %v185_v19, %v181_v17 }
  0xe8   :  { %v147_v20 = vpop.f32.mrf.mxu0 }
  0xe9   :  { %v192_v23 = vadd.f32 %v188_v16, %v184_v18  ;;  %v182_v24 = vadd.f32 %v227_v11, %v147_v20 }
  0xeb   :  { %v244_v26 = vpack.c.bf16 %v192_v23, %v191_v22  ;;  %v190_v27 = vadd.f32 %v186_v21, %v182_v24 }
  0xed   :  { %246 = vst [vmem:[%s367_s4 + $0x8] sm:$0xff] %v244_v26   ;;  %v239_v28 = vpack.c.bf16 %v190_v27, %v189_v25 }
  0xef   :  { %240 = vst [vmem:[%s367_s4] sm:$0xff] %v239_v28  }

// kernel: multimodal_moe_forward.19
= control target key start
LH: loop header
LB: loop body
LE: loop exit
PB: predicated region body
PF: predicated region fallthrough
CT: control target
= control target key end

     0   :  { %vm33_vm0 = vcmask 261120   ;;  %vm125_vm1 = vcmask 257024   ;;  %s387_s0 = inlined_call_operand.vmem [shape: bf16[32,32], index: 0, kind: input, shape index: {}]   ;;  %s388_s3 = inlined_call_operand.vmem [shape: bf16[32,128], index: 3, kind: input, shape index: {}]   ;;  %s389_s1 = inlined_call_operand.vmem [shape: f32[1,32], index: 1, kind: input, shape index: {}]   ;;  %s390_s2 = inlined_call_operand.vmem [shape: f32[1,32], index: 2, kind: input, shape index: {}]   ;;  %s391_s4 = inlined_call_operand.vmem [shape: f32[1,128], index: 4, kind: input, shape index: {}]   ;;  %s392_s5 = inlined_call_operand.vmem [shape: bf16[32,128], index: 5, kind: output, shape index: {}]  }
   0x1   :  { %v273_v0 = vld [vmem:[%s387_s0] sm:$0xff]   ;;  %v290_v1 = vld [vmem:[%s387_s0 + $0x8] sm:$0xff]  }
   0x2   :  { %v274_v2 = vunpack.c.l.bf16 %v273_v0  ;;  %v278_v3 = vunpack.c.l.bf16 %v290_v1  ;;  %v275_v4 = vunpack.c.h.bf16 %v273_v0  ;;  %v279_v5 = vunpack.c.h.bf16 %v290_v1  ;;  %v304_v30 = vld [vmem:[%s388_s3 + $0x8] sm:$0xff]   ;;  %v305_v31 = vld [vmem:[%s388_s3] sm:$0xff]  }
   0x3   :  { %296 = vmatprep.subr.bf16.mxu0 %v304_v30  ;;  %v247_v45 = vld [vmem:[%s389_s1] ss:$0 sm:$0xff] }
   0x4   :  { %v34_v6 = vsel %vm33_vm0, %v274_v2, 0.0  ;;  %v40_v7 = vsel %vm33_vm0, %v278_v3, 0.0  ;;  %v37_v8 = vsel %vm33_vm0, %v275_v4, 0.0  ;;  %v43_v9 = vsel %vm33_vm0, %v279_v5, 0.0  ;;  %297 = vmatpush3.bf16.msra.mxu0 %v304_v30  ;;  %v248_v47 = vld [vmem:[%s390_s2] ss:$0 sm:$0xff] }
   0x5   :  { %35 = vadd.xlane.f32.xlu0 %v34_v6  ;;  %41 = vadd.xlane.f32.xlu1 %v40_v7 }
   0x6   :  { %298 = vmatprep.subr.bf16.mxu0 %v305_v31 }
   0x8   :  { %299 = vmatpush3.bf16.msra.mxu0 %v305_v31 }
   0x9   :  { %38 = vadd.xlane.f32.xlu0 %v37_v8  ;;  %44 = vadd.xlane.f32.xlu1 %v43_v9 }
  0x8e   :  { %v36_v10 = vpop.xlane.xlu0 %35  ;;  %v42_v11 = vpop.xlane.xlu1 %41 }
  0x8f   :  { %v47_v12 = vmul.f32 0.03125, %v36_v10  ;;  %v49_v13 = vmul.f32 0.03125, %v42_v11 }
  0x91   :  { %v51_v14 = vsub.f32 %v274_v2, %v47_v12  ;;  %v53_v15 = vsub.f32 %v278_v3, %v49_v13 }
  0x92   :  { %v39_v16 = vpop.xlane.xlu0 %38  ;;  %v45_v17 = vpop.xlane.xlu1 %44 }
  0x93   :  { %v48_v18 = vmul.f32 0.03125, %v39_v16  ;;  %v50_v19 = vmul.f32 0.03125, %v45_v17  ;;  %v55_v20 = vmul.f32 %v51_v14, %v51_v14  ;;  %v57_v21 = vmul.f32 %v53_v15, %v53_v15 }
  0x95   :  { %v52_v22 = vsub.f32 %v275_v4, %v48_v18  ;;  %v54_v23 = vsub.f32 %v279_v5, %v50_v19  ;;  %v59_v24 = vsel %vm33_vm0, %v55_v20, 0.0  ;;  %v65_v25 = vsel %vm33_vm0, %v57_v21, 0.0  ;;  %v253_v5 = vld [vmem:[%s391_s4] ss:$0 sm:$0xff] }
  0x96   :  { %60 = vadd.xlane.f32.xlu0 %v59_v24 }
  0x97   :  { %v56_v26 = vmul.f32 %v52_v22, %v52_v22  ;;  %v58_v27 = vmul.f32 %v54_v23, %v54_v23 }
  0x99   :  { %v62_v28 = vsel %vm33_vm0, %v56_v26, 0.0  ;;  %v68_v29 = vsel %vm33_vm0, %v58_v27, 0.0 }
  0x9a   :  { %66 = vadd.xlane.f32.xlu0 %v65_v25  ;;  %63 = vadd.xlane.f32.xlu1 %v62_v28 }
  0x9e   :  { %69 = vadd.xlane.f32.xlu1 %v68_v29 }
 0x11f   :  { %v61_v32 = vpop.xlane.xlu0 %60 }
 0x120   :  { %v71_v33 = vmul.f32 0.03125, %v61_v32 }
 0x122   :  { %v75_v34 = vadd.f32 1e-05, %v71_v33 }
 0x123   :  { %v64_v35 = vpop.xlane.xlu1 %63  ;;  %v67_v36 = vpop.xlane.xlu0 %66 }
 0x124   :  { %308 = vrsqrt.f32 %v75_v34  ;;  %v72_v37 = vmul.f32 0.03125, %v64_v35  ;;  %v73_v38 = vmul.f32 0.03125, %v67_v36 }
 0x126   :  { %v76_v39 = vadd.f32 1e-05, %v72_v37  ;;  %v77_v40 = vadd.f32 1e-05, %v73_v38 }
 0x127   :  { %v70_v41 = vpop.xlane.xlu1 %69 }
 0x128   :  { %310 = vrsqrt.f32 %v76_v39  ;;  %v74_v42 = vmul.f32 0.03125, %v70_v41 }
 0x129   :  { %312 = vrsqrt.f32 %v77_v40 }
 0x12a   :  { %v78_v43 = vadd.f32 1e-05, %v74_v42 }
 0x12c   :  { %314 = vrsqrt.f32 %v78_v43 }
 0x131   :  { %v309_v44 = vpop.eup %308 }
 0x132   :  { %v83_v46 = vmul.f32 %v309_v44, %v51_v14 }
 0x134   :  { %v94_v48 = vmul.f32 %v247_v45, %v83_v46 }
 0x135   :  { %v311_v49 = vpop.eup %310 }
 0x136   :  { %v313_v50 = vpop.eup %312  ;;  %v105_v51 = vadd.f32 %v248_v47, %v94_v48  ;;  %v84_v52 = vmul.f32 %v311_v49, %v52_v22 }
 0x137   :  { %v85_v53 = vmul.f32 %v313_v50, %v53_v15 }
 0x138   :  { %v264_v54 = vpack.c.bf16 %v105_v51, %v105_v51  ;;  %v95_v55 = vmul.f32 %v247_v45, %v84_v52 }
 0x139   :  { %v315_v56 = vpop.eup %314  ;;  %v96_v57 = vmul.f32 %v247_v45, %v85_v53 }
 0x13a   :  { %126 = vst.msk [vmem:[#allocation2] sm:$0xf] %vm125_vm1, %v264_v54  ;;  %v106_v58 = vadd.f32 %v248_v47, %v95_v55  ;;  %v86_v59 = vmul.f32 %v315_v56, %v54_v23 }
 0x13b   :  { %v107_v60 = vadd.f32 %v248_v47, %v96_v57 }
 0x13c   :  { %v265_v61 = vpack.c.bf16 %v106_v58, %v106_v58  ;;  %v97_v62 = vmul.f32 %v247_v45, %v86_v59 }
 0x13d   :  { %v266_v63 = vpack.c.bf16 %v107_v60, %v107_v60 }
 0x13e   :  { %127 = vst.msk [vmem:[#allocation2 + $0x4] sm:$0xf] %vm125_vm1, %v265_v61  ;;  %v108_v0 = vadd.f32 %v248_v47, %v97_v62 }
 0x13f   :  { %128 = vst.msk [vmem:[#allocation2 + $0x8] sm:$0xf] %vm125_vm1, %v266_v63 }
 0x140   :  { %v267_v1 = vpack.c.bf16 %v108_v0, %v108_v0 }
 0x142   :  { %129 = vst.msk [vmem:[#allocation2 + $0xc] sm:$0xf] %vm125_vm1, %v267_v1 }
 0x145   :  { %v306_v2 = vld [vmem:[#allocation2] sm:$0xff]  }
 0x146   :  { %300 = vmatprep.mubr.msk.bf16.mxu0 %vm33_vm0, %v306_v2 }
 0x149   :  { %v307_v3 = vld [vmem:[#allocation2 + $0x8] sm:$0xff]  }
 0x14a   :  { %301 = vmatmul.mubr.msk.bf16.vlgmr.msra.gmra.mxu0 %vm33_vm0, %v307_v3 }
 0x20a   :  { %v302_v4 = vpop.f32.mrf.mxu0 }
 0x20b   :  { %v217_v8 = vadd.f32 %v302_v4, %v253_v5 }
 0x20c   :  { %v208_v6 = vpop.f32.mrf.mxu0 }
 0x20d   :  { %v209_v11 = vadd.f32 %v253_v5, %v208_v6 }
 0x20e   :  { %v303_v7 = vpop.f32.mrf.mxu0 }
 0x20f   :  { %v220_v9 = vadd.f32 %v303_v7, %v253_v5 }
 0x210   :  { %v211_v10 = vpop.f32.mrf.mxu0 }
 0x211   :  { %v288_v12 = vpack.c.bf16 %v220_v9, %v217_v8  ;;  %v212_v13 = vadd.f32 %v253_v5, %v211_v10 }
 0x213   :  { %291 = vst [vmem:[%s392_s5 + $0x8] sm:$0xff] %v288_v12   ;;  %v283_v14 = vpack.c.bf16 %v212_v13, %v209_v11 }
 0x215   :  { %284 = vst [vmem:[%s392_s5] sm:$0xff] %v283_v14  }

// kernel: multimodal_moe_forward.21
= control target key start
LH: loop header
LB: loop body
LE: loop exit
PB: predicated region body
PF: predicated region fallthrough
CT: control target
= control target key end

     0   :  { %s370_s1 = inlined_call_operand.vmem [shape: bf16[128,128], index: 1, kind: input, shape index: {}]   ;;  %s371_s0 = inlined_call_operand.vmem [shape: bf16[32,128], index: 0, kind: input, shape index: {}]   ;;  %s372_s2 = inlined_call_operand.vmem [shape: f32[1,128], index: 2, kind: input, shape index: {}]   ;;  %s373_s3 = inlined_call_operand.vmem [shape: bf16[32,128], index: 3, kind: input, shape index: {}]   ;;  %s374_s4 = inlined_call_operand.vmem [shape: bf16[32,128], index: 4, kind: output, shape index: {}]  }
   0x1   :  { %v290_v0 = vld [vmem:[%s370_s1 + $0x38] sm:$0xff]   ;;  %v291_v1 = vld [vmem:[%s370_s1 + $0x30] sm:$0xff]   ;;  %v292_v2 = vld [vmem:[%s370_s1 + $0x28] sm:$0xff]  }
   0x2   :  { %270 = vmatprep.subr.bf16.mxu0 %v290_v0  ;;  %v293_v3 = vld [vmem:[%s370_s1 + $0x20] sm:$0xff]   ;;  %v294_v5 = vld [vmem:[%s370_s1 + $0x18] sm:$0xff]   ;;  %v295_v6 = vld [vmem:[%s370_s1 + $0x10] sm:$0xff]  }
   0x3   :  { %271 = vmatpush3.bf16.msra.mxu0 %v290_v0  ;;  %v298_v4 = vld [vmem:[%s371_s0] sm:$0xff]   ;;  %v296_v7 = vld [vmem:[%s370_s1 + $0x8] sm:$0xff]  }
   0x4   :  { %272 = vmatprep.subr.bf16.mxu0 %v291_v1  ;;  %286 = vmatprep.mubr.bf16.mxu0 %v298_v4  ;;  %v297_v8 = vld [vmem:[%s370_s1] sm:$0xff]   ;;  %v299_v9 = vld [vmem:[%s371_s0 + $0x8] sm:$0xff]  }
   0x5   :  { %v231_v11 = vld [vmem:[%s372_s2] ss:$0 sm:$0xff]  ;;  %v258_v12 = vld [vmem:[%s373_s3 + $0x8] sm:$0xff]  }
   0x6   :  { %v241_v14 = vld [vmem:[%s373_s3] sm:$0xff]   ;;  %v246_v16 = vunpack.c.l.bf16 %v258_v12  ;;  %v247_v17 = vunpack.c.h.bf16 %v258_v12 }
   0x7   :  { %273 = vmatpush3.bf16.msra.mxu0 %v291_v1  ;;  %v242_v20 = vunpack.c.l.bf16 %v241_v14  ;;  %v243_v22 = vunpack.c.h.bf16 %v241_v14 }
   0x8   :  { %274 = vmatprep.subr.bf16.mxu0 %v292_v2 }
   0xb   :  { %275 = vmatpush3.bf16.msra.mxu0 %v292_v2 }
   0xc   :  { %276 = vmatprep.subr.bf16.mxu0 %v293_v3 }
   0xf   :  { %277 = vmatpush3.bf16.msra.mxu0 %v293_v3 }
  0x10   :  { %278 = vmatprep.subr.bf16.mxu0 %v294_v5 }
  0x13   :  { %279 = vmatpush3.bf16.msra.mxu0 %v294_v5 }
  0x14   :  { %280 = vmatprep.subr.bf16.mxu0 %v295_v6 }
  0x17   :  { %281 = vmatpush3.bf16.msra.mxu0 %v295_v6 }
  0x18   :  { %282 = vmatprep.subr.bf16.mxu0 %v296_v7 }
  0x1b   :  { %283 = vmatpush3.bf16.msra.mxu0 %v296_v7 }
  0x1c   :  { %284 = vmatprep.subr.bf16.mxu0 %v297_v8 }
  0x1f   :  { %285 = vmatpush3.bf16.msra.mxu0 %v297_v8 }
  0x22   :  { %287 = vmatmul.mubr.bf16.vlgmr.msra.gmra.mxu0 %v299_v9 }
  0xe2   :  { %v288_v10 = vpop.f32.mrf.mxu0 }
  0xe3   :  { %v183_v15 = vadd.f32 %v288_v10, %v231_v11 }
  0xe4   :  { %v144_v13 = vpop.f32.mrf.mxu0 }
  0xe5   :  { %v181_v19 = vadd.f32 %v231_v11, %v144_v13  ;;  %v195_v24 = vadd.f32 %v246_v16, %v183_v15 }
  0xe6   :  { %v289_v18 = vpop.f32.mrf.mxu0 }
  0xe7   :  { %v184_v21 = vadd.f32 %v289_v18, %v231_v11  ;;  %v193_v27 = vadd.f32 %v242_v20, %v181_v19 }
  0xe8   :  { %v147_v23 = vpop.f32.mrf.mxu0 }
  0xe9   :  { %v196_v25 = vadd.f32 %v247_v17, %v184_v21  ;;  %v182_v26 = vadd.f32 %v231_v11, %v147_v23 }
  0xeb   :  { %v256_v28 = vpack.c.bf16 %v196_v25, %v195_v24  ;;  %v194_v29 = vadd.f32 %v243_v22, %v182_v26 }
  0xed   :  { %259 = vst [vmem:[%s374_s4 + $0x8] sm:$0xff] %v256_v28   ;;  %v251_v30 = vpack.c.bf16 %v194_v29, %v193_v27 }
  0xef   :  { %252 = vst [vmem:[%s374_s4] sm:$0xff] %v251_v30  }

// kernel: multimodal_moe_forward.20
= control target key start
LH: loop header
LB: loop body
LE: loop exit
PB: predicated region body
PF: predicated region fallthrough
CT: control target
= control target key end

     0   :  { %s1084_s9 = smov 0   ;;  %s1086_s10 = smov 0   ;;  %s1197_s0 = inlined_call_operand.vmem [shape: bf16[2,16,96], index: 0, kind: input, shape index: {}, may-alias: {0,1}]   ;;  %s1198_s1 = inlined_call_operand.vmem [shape: bf16[2,16,96], index: 1, kind: input, shape index: {}, may-alias: {0,1}]   ;;  %s1199_s2 = inlined_call_operand.vmem [shape: bf16[2,16,32], index: 2, kind: output, shape index: {}]  }
   0x1   :  { %s1088_s11 = smov 0  }
   0x2 LB: > { %s24_s12 = sadd.s32 1, %s1047_s10  ;;  %p848_p0 = scmp.ge.s32.totalorder %s1051_s11, 1  ;;  %s1051_s11 = sphi %s1088_s11, %s12_s11   ;;  %s1047_s10 = sphi %s1086_s10, %s1201_s10   ;;  %s1043_s9 = sphi %s1084_s9, %s1200_s9  }
   0x3   : > { %p26_p1 = scmp.ge.s32.totalorder %s24_s12, 2  ;;  %p143_p2 = scmp.lt.s32.totalorder %s1051_s11, 3 }
   0x5   : > { %s1203_s12 = smov (%p26_p1, %s24_s12), 0  ;;  %p144_p3 = pnand %p848_p0, %p143_p2 }
   0x6   : > { %p179_p4 = scmp.lt.s32.totalorder (!%p144_p3), %s1043_s9, 1  ;;  %s1055_s17 = smov (!%p144_p3), 96  }
   0x7   : > { %147 = sbr.rel (%p144_p3) target bundleno = 1505 (0x5e1), region = 28  ;;  %s1056_s21 = smov (!%p144_p3), 64  }
   0x8   : > { %s1057_s22 = smov (!%p144_p3), 80   ;;  %s1058_s23 = smov (!%p144_p3), 88  }
   0x9   : > { %s1059_s24 = smov (!%p144_p3), 120   ;;  %s1060_s25 = smov (!%p144_p3), 112  }
   0xa   : > { %s1061_s26 = smov (!%p144_p3), 72   ;;  %s1062_s27 = smov (!%p144_p3), 104  }
   0xb   : > { %s1063_s28 = smov (!%p144_p3), 56   ;;  %s1064_s29 = smov (!%p144_p3), 40  }
   0xc   : > { %v1053_v0 = vmov 0.0   ;;  %vm1054_vm0 = vmmov 0   ;;  %s1205_s9 = smov (!%p179_p4, %s1043_s9), 1  ;;  %vm220_vm1 = vcmask 64512   ;;  %vm268_vm2 = vcmask 130048   ;;  %s1065_s30 = smov 48  }
   0xd   : > { %893 = vmatprep.subr.bf16.mxu0 %v1053_v0  ;;  %895 = vmatprep.mubr.msk.bf16.mxu0 %vm1054_vm0, %v1053_v0  ;;  %s1108_s13 = sshll.u32 %s1205_s9, 3  ;;  %s1066_s3 = smov 8   ;;  %vm731_vm3 = vcmask 195584   ;;  %vm742_vm4 = vcmask 257024  }
   0xe   : > { %899 = vmatprep.subr.bf16.mxu1 %v1053_v0  ;;  %901 = vmatprep.mubr.msk.bf16.mxu1 %vm1054_vm0, %v1053_v0  ;;  %s192_s16 = scalar_lea.vmem %s1198_s1, %s1108_s13  ;;  %s186_s20 = scalar_lea.vmem %s1197_s0, %s1108_s13 }
   0xf   : > { %v1114_v1 = vld [vmem:[%s192_s16] sm:$0xff]   ;;  %s1067_s4 = smov 16   ;;  %s1068_s5 = smov 24  }
  0x10   : > { %218 = vrot.lane.b32.xlu0 %v1114_v1, %s1055_s17  ;;  %v874_v2 = vld [vmem:[%s186_s20] sm:$0xff]   ;;  %s201_s8 = scalar_lea.vmem %s1199_s2, %s1108_s13 }
  0x11   : > { %v875_v3 = vunpack.c.l.bf16 %v874_v2  ;;  %v876_v4 = vunpack.c.h.bf16 %v874_v2 }
  0x13   : > { %v208_v7 = vmul.f32 0.35355338, %v875_v3  ;;  %v209_v8 = vmul.f32 0.35355338, %v876_v4 }
  0x15   : > { %v210_v9 = vpack.c.bf16 %v209_v8, %v208_v7 }
  0x82   : > { %v219_v5 = vpop.permute.xlu0 %218 }
  0x83   : > { %v225_v6 = vsel %vm220_vm1, %v219_v5, 0 }
  0x84   : > { %894 = vmatpush3.bf16.xpose.msra.mxu0 %v225_v6 }
  0x85   : > { %911 = vmatprep.subr.bf16.mxu0 %v1053_v0 }
  0x8b   : > { %896 = vmatmul.mubr.msk.bf16.vlgmr.msra.gmra.mxu0 %vm220_vm1, %v210_v9 }
  0x8c   : > { %913 = vmatprep.mubr.msk.bf16.mxu0 %vm1054_vm0, %v1053_v0 }
 0x14b   : > { %v261_v10 = vpop.f32.mrf.mxu0 }
 0x14c   : > { %v269_v11 = vsel %vm268_vm2, %v261_v10, -inf }
 0x14d   : > { %270 = vmax.xlane.f32.xlu0 %v269_v11  ;;  %v897_v12 = vpop.f32.mrf.mxu0 }
 0x14f   : > { %v264_v13 = vpop.f32.mrf.mxu0 }
 0x150   : > { %v272_v14 = vsel %vm268_vm2, %v264_v13, -inf }
 0x151   : > { %273 = vmax.xlane.f32.xlu1 %v272_v14  ;;  %v898_v15 = vpop.f32.mrf.mxu0 }
 0x162   : > { %292 = vrot.lane.b32.xlu1 %v1114_v1, %s1056_s21 }
 0x163   : > { %463 = vrot.lane.b32.xlu0 %v1114_v1, %s1057_s22 }
 0x1d6   : > { %v271_v16 = vpop.xlane.xlu0 %270 }
 0x1d7   : > { %v275_v17 = vsub.f32 %v261_v10, %v271_v16 }
 0x1d9   : > { %v277_v18 = vmul.f32 1.442695, %v275_v17 }
 0x1da   : > { %v274_v19 = vpop.xlane.xlu1 %273  ;;  %v464_v37 = vpop.permute.xlu0 %463 }
 0x1db   : > { %997 = vpow2.f32 %v277_v18  ;;  %v276_v20 = vsub.f32 %v264_v13, %v274_v19  ;;  %v469_v39 = vsel %vm220_vm1, %v464_v37, 0 }
 0x1dd   : > { %v279_v21 = vmul.f32 1.442695, %v276_v20 }
 0x1de   : > { %v293_v22 = vpop.permute.xlu1 %292 }
 0x1df   : > { %999 = vpow2.f32 %v279_v21  ;;  %900 = vmatpush3.bf16.msra.mxu1 %v293_v22 }
 0x1e0   : > { %905 = vmatprep.subr.bf16.mxu1 %v1053_v0 }
 0x1e8   : > { %v998_v23 = vpop.eup %997 }
 0x1e9   : > { %v281_v24 = vsel %vm268_vm2, %v998_v23, 0.0 }
 0x1ea   : > { %282 = vadd.xlane.f32.xlu1 %v281_v24 }
 0x1ec   : > { %v1000_v25 = vpop.eup %999 }
 0x1ed   : > { %v284_v26 = vsel %vm268_vm2, %v1000_v25, 0.0 }
 0x1ee   : > { %285 = vadd.xlane.f32.xlu1 %v284_v26 }
 0x1ff   : > { %342 = vrot.lane.b32.xlu1 %v1114_v1, %s1058_s23 }
 0x203   : > { %340 = vrot.lane.b32.xlu1 %v210_v9, %s1059_s24 }
 0x207   : > { %461 = vrot.lane.b32.xlu1 %v210_v9, %s1060_s25 }
 0x20b   : > { %584 = vrot.lane.b32.xlu1 %v1114_v1, %s1061_s26 }
 0x20f   : > { %582 = vrot.lane.b32.xlu1 %v210_v9, %s1062_s27 }
 0x273   : > { %v283_v27 = vpop.xlane.xlu1 %282 }
 0x274   : > { %1001 = vrcp.f32 %v283_v27 }
 0x277   : > { %v286_v28 = vpop.xlane.xlu1 %285 }
 0x278   : > { %1003 = vrcp.f32 %v286_v28 }
 0x27b   : > { %v343_v31 = vpop.permute.xlu1 %342 }
 0x27c   : > { %v348_v34 = vsel %vm220_vm1, %v343_v31, 0 }
 0x27f   : > { %v341_v36 = vpop.permute.xlu1 %340 }
 0x281   : > { %v1002_v29 = vpop.eup %1001 }
 0x282   : > { %v289_v32 = vmul.f32 %v1002_v29, %v998_v23 }
 0x283   : > { %v462_v38 = vpop.permute.xlu1 %461 }
 0x285   : > { %v1004_v30 = vpop.eup %1003 }
 0x286   : > { %v290_v33 = vmul.f32 %v1004_v30, %v1000_v25 }
 0x287   : > { %v585_v40 = vpop.permute.xlu1 %584 }
 0x288   : > { %v291_v35 = vpack.c.bf16 %v290_v33, %v289_v32  ;;  %v590_v41 = vsel %vm220_vm1, %v585_v40, 0 }
 0x28a   : > { %902 = vmatmul.mubr.msk.bf16.vlgmr.msra.gmra.mxu1 %vm268_vm2, %v291_v35 }
 0x28b   : > { %906 = vmatpush3.bf16.xpose.msra.mxu1 %v348_v34  ;;  %907 = vmatprep.mubr.msk.bf16.mxu1 %vm1054_vm0, %v1053_v0  ;;  %v583_v42 = vpop.permute.xlu1 %582 }
 0x28c   : > { %917 = vmatprep.subr.bf16.mxu1 %v1053_v0 }
 0x292   : > { %908 = vmatmul.mubr.msk.bf16.vlgmr.msra.gmra.mxu1 %vm220_vm1, %v341_v36 }
 0x293   : > { %918 = vmatpush3.bf16.xpose.msra.mxu1 %v469_v39  ;;  %919 = vmatprep.mubr.msk.bf16.mxu1 %vm1054_vm0, %v1053_v0 }
 0x294   : > { %929 = vmatprep.subr.bf16.mxu1 %v1053_v0 }
 0x29a   : > { %920 = vmatmul.mubr.msk.bf16.vlgmr.msra.gmra.mxu1 %vm220_vm1, %v462_v38 }
 0x29b   : > { %930 = vmatpush3.bf16.xpose.msra.mxu1 %v590_v41  ;;  %931 = vmatprep.mubr.msk.bf16.mxu1 %vm1054_vm0, %v1053_v0 }
 0x2a2   : > { %932 = vmatmul.mubr.msk.bf16.vlgmr.msra.gmra.mxu1 %vm220_vm1, %v583_v42 }
 0x34a   : > { %v1150_v43 = vpop.f32.mrf.mxu1 }
 0x34c   : > { %v903_v44 = vpop.f32.mrf.mxu1 }
 0x34e   : > { %v1152_v45 = vpop.f32.mrf.mxu1 }
 0x350   : > { %v904_v46 = vpop.f32.mrf.mxu1 }
 0x352   : > { %v384_v47 = vpop.f32.mrf.mxu1 }
 0x353   : > { %v391_v48 = vsel %vm268_vm2, %v384_v47, -inf }
 0x354   : > { %392 = vmax.xlane.f32.xlu1 %v391_v48  ;;  %v909_v49 = vpop.f32.mrf.mxu1 }
 0x356   : > { %v387_v50 = vpop.f32.mrf.mxu1 }
 0x357   : > { %v394_v51 = vsel %vm268_vm2, %v387_v50, -inf }
 0x358   : > { %395 = vmax.xlane.f32.xlu0 %v394_v51  ;;  %v910_v52 = vpop.f32.mrf.mxu1 }
 0x35a   : > { %v505_v53 = vpop.f32.mrf.mxu1 }
 0x35b   : > { %v512_v54 = vsel %vm268_vm2, %v505_v53, -inf }
 0x35c   : > { %513 = vmax.xlane.f32.xlu1 %v512_v54  ;;  %v921_v55 = vpop.f32.mrf.mxu1 }
 0x35e   : > { %v508_v56 = vpop.f32.mrf.mxu1 }
 0x35f   : > { %v515_v57 = vsel %vm268_vm2, %v508_v56, -inf }
 0x360   : > { %516 = vmax.xlane.f32.xlu0 %v515_v57  ;;  %v922_v58 = vpop.f32.mrf.mxu1 }
 0x362   : > { %v626_v59 = vpop.f32.mrf.mxu1 }
 0x363   : > { %v633_v60 = vsel %vm268_vm2, %v626_v59, -inf }
 0x364   : > { %634 = vmax.xlane.f32.xlu1 %v633_v60  ;;  %v933_v61 = vpop.f32.mrf.mxu1 }
 0x366   : > { %v629_v62 = vpop.f32.mrf.mxu1 }
 0x367   : > { %v636_v63 = vsel %vm268_vm2, %v629_v62, -inf }
 0x368   : > { %637 = vmax.xlane.f32.xlu0 %v636_v63  ;;  %v934_v2 = vpop.f32.mrf.mxu1 }
 0x375   : > { %414 = vrot.lane.b32.xlu1 %v1114_v1, %s1063_s28 }
 0x3dd   : > { %v393_v3 = vpop.xlane.xlu1 %392 }
 0x3de   : > { %v397_v4 = vsub.f32 %v384_v47, %v393_v3 }
 0x3e0   : > { %v399_v5 = vmul.f32 1.442695, %v397_v4 }
 0x3e1   : > { %v396_v6 = vpop.xlane.xlu0 %395 }
 0x3e2   : > { %1005 = vpow2.f32 %v399_v5  ;;  %v398_v7 = vsub.f32 %v387_v50, %v396_v6 }
 0x3e4   : > { %v401_v8 = vmul.f32 1.442695, %v398_v7 }
 0x3e5   : > { %v514_v9 = vpop.xlane.xlu1 %513 }
 0x3e6   : > { %1007 = vpow2.f32 %v401_v8  ;;  %v518_v10 = vsub.f32 %v505_v53, %v514_v9 }
 0x3e8   : > { %v520_v11 = vmul.f32 1.442695, %v518_v10 }
 0x3e9   : > { %v517_v12 = vpop.xlane.xlu0 %516 }
 0x3ea   : > { %1009 = vpow2.f32 %v520_v11  ;;  %v519_v13 = vsub.f32 %v508_v56, %v517_v12 }
 0x3ec   : > { %v522_v14 = vmul.f32 1.442695, %v519_v13 }
 0x3ed   : > { %v635_v15 = vpop.xlane.xlu1 %634 }
 0x3ee   : > { %1011 = vpow2.f32 %v522_v14  ;;  %v639_v16 = vsub.f32 %v626_v59, %v635_v15 }
 0x3ef   : > { %v1006_v17 = vpop.eup %1005 }
 0x3f0   : > { %v641_v18 = vmul.f32 1.442695, %v639_v16  ;;  %v403_v19 = vsel %vm268_vm2, %v1006_v17, 0.0 }
 0x3f1   : > { %v638_v20 = vpop.xlane.xlu0 %637  ;;  %404 = vadd.xlane.f32.xlu1 %v403_v19  ;;  %v415_v21 = vpop.permute.xlu1 %414 }
 0x3f2   : > { %1013 = vpow2.f32 %v641_v18  ;;  %v640_v22 = vsub.f32 %v629_v62, %v638_v20  ;;  %912 = vmatpush3.bf16.msra.mxu0 %v415_v21 }
 0x3f3   : > { %v1008_v23 = vpop.eup %1007  ;;  %923 = vmatprep.subr.bf16.mxu0 %v1053_v0 }
 0x3f4   : > { %v643_v24 = vmul.f32 1.442695, %v640_v22  ;;  %v406_v25 = vsel %vm268_vm2, %v1008_v23, 0.0 }
 0x3f5   : > { %407 = vadd.xlane.f32.xlu0 %v406_v25 }
 0x3f6   : > { %1015 = vpow2.f32 %v643_v24 }
 0x3f7   : > { %v1010_v26 = vpop.eup %1009 }
 0x3f8   : > { %v524_v27 = vsel %vm268_vm2, %v1010_v26, 0.0 }
 0x3f9   : > { %525 = vadd.xlane.f32.xlu1 %v524_v27 }
 0x3fb   : > { %v1012_v28 = vpop.eup %1011 }
 0x3fc   : > { %v527_v29 = vsel %vm268_vm2, %v1012_v28, 0.0 }
 0x3fd   : > { %528 = vadd.xlane.f32.xlu0 %v527_v29 }
 0x3ff   : > { %v1014_v30 = vpop.eup %1013 }
 0x400   : > { %v645_v31 = vsel %vm268_vm2, %v1014_v30, 0.0 }
 0x401   : > { %646 = vadd.xlane.f32.xlu1 %v645_v31 }
 0x403   : > { %v1016_v32 = vpop.eup %1015 }
 0x404   : > { %v648_v33 = vsel %vm268_vm2, %v1016_v32, 0.0 }
 0x405   : > { %649 = vadd.xlane.f32.xlu0 %v648_v33 }
 0x412   : > { %656 = vrot.lane.b32.xlu1 %v1114_v1, %s1064_s29 }
 0x41b   : > { %535 = vrot.lane.b32.xlu0 %v1114_v1, %s1065_s30 }
 0x47a   : > { %v405_v34 = vpop.xlane.xlu1 %404 }
 0x47b   : > { %1017 = vrcp.f32 %v405_v34 }
 0x47e   : > { %v408_v35 = vpop.xlane.xlu0 %407 }
 0x47f   : > { %1019 = vrcp.f32 %v408_v35 }
 0x482   : > { %v526_v36 = vpop.xlane.xlu1 %525 }
 0x483   : > { %1021 = vrcp.f32 %v526_v36 }
 0x486   : > { %v529_v37 = vpop.xlane.xlu0 %528 }
 0x487   : > { %1023 = vrcp.f32 %v529_v37 }
 0x488   : > { %v1018_v38 = vpop.eup %1017 }
 0x489   : > { %v411_v41 = vmul.f32 %v1018_v38, %v1006_v17 }
 0x48a   : > { %v647_v39 = vpop.xlane.xlu1 %646 }
 0x48b   : > { %1025 = vrcp.f32 %v647_v39 }
 0x48c   : > { %v1020_v40 = vpop.eup %1019 }
 0x48d   : > { %v412_v42 = vmul.f32 %v1020_v40, %v1008_v23 }
 0x48e   : > { %v650_v44 = vpop.xlane.xlu0 %649  ;;  %v657_v52 = vpop.permute.xlu1 %656 }
 0x48f   : > { %1027 = vrcp.f32 %v650_v44  ;;  %v413_v46 = vpack.c.bf16 %v412_v42, %v411_v41 }
 0x490   : > { %v1022_v1 = vpop.eup %1021 }
 0x491   : > { %914 = vmatmul.mubr.msk.bf16.vlgmr.msra.gmra.mxu0 %vm268_vm2, %v413_v46  ;;  %v532_v49 = vmul.f32 %v1022_v1, %v1010_v26 }
 0x492   : > { %v536_v47 = vpop.permute.xlu0 %535  ;;  %925 = vmatprep.mubr.msk.bf16.mxu0 %vm1054_vm0, %v1053_v0 }
 0x493   : > { %924 = vmatpush3.bf16.msra.mxu0 %v536_v47 }
 0x494   : > { %v1024_v48 = vpop.eup %1023  ;;  %935 = vmatprep.subr.bf16.mxu0 %v1053_v0 }
 0x495   : > { %v533_v50 = vmul.f32 %v1024_v48, %v1012_v28 }
 0x497   : > { %v534_v51 = vpack.c.bf16 %v533_v50, %v532_v49 }
 0x498   : > { %v1026_v53 = vpop.eup %1025 }
 0x499   : > { %926 = vmatmul.mubr.msk.bf16.vlgmr.msra.gmra.mxu0 %vm268_vm2, %v534_v51  ;;  %v653_v55 = vmul.f32 %v1026_v53, %v1014_v30 }
 0x49a   : > { %936 = vmatpush3.bf16.msra.mxu0 %v657_v52  ;;  %937 = vmatprep.mubr.msk.bf16.mxu0 %vm1054_vm0, %v1053_v0 }
 0x49c   : > { %v1028_v54 = vpop.eup %1027 }
 0x49d   : > { %v654_v56 = vmul.f32 %v1028_v54, %v1016_v32 }
 0x49f   : > { %v655_v57 = vpack.c.bf16 %v654_v56, %v653_v55 }
 0x4a1   : > { %938 = vmatmul.mubr.msk.bf16.vlgmr.msra.gmra.mxu0 %vm268_vm2, %v655_v57 }
 0x551   : > { %v454_v58 = vpop.f32.mrf.mxu0 }
 0x553   : > { %v915_v59 = vpop.f32.mrf.mxu0 }
 0x555   : > { %v457_v60 = vpop.f32.mrf.mxu0 }
 0x556   : > { %v981_v61 = vpack.i.bf16 %v457_v60, %v454_v58 }
 0x557   : > { %v916_v62 = vpop.f32.mrf.mxu0 }
 0x558   : > { %982 = vrot.lane.b32.xlu1 %v981_v61, %s1066_s3 }
 0x559   : > { %v575_v63 = vpop.f32.mrf.mxu0 }
 0x55b   : > { %v927_v2 = vpop.f32.mrf.mxu0 }
 0x55d   : > { %v578_v3 = vpop.f32.mrf.mxu0 }
 0x55e   : > { %v986_v4 = vpack.i.bf16 %v578_v3, %v575_v63 }
 0x55f   : > { %v928_v5 = vpop.f32.mrf.mxu0 }
 0x560   : > { %987 = vrot.lane.b32.xlu0 %v986_v4, %s1067_s4 }
 0x561   : > { %v696_v0 = vpop.f32.mrf.mxu0 }
 0x563   : > { %v939_v6 = vpop.f32.mrf.mxu0 }
 0x565   : > { %v699_v7 = vpop.f32.mrf.mxu0 }
 0x566   : > { %v991_v8 = vpack.i.bf16 %v699_v7, %v696_v0 }
 0x567   : > { %v940_v9 = vpop.f32.mrf.mxu0 }
 0x568   : > { %992 = vrot.lane.b32.xlu1 %v991_v8, %s1068_s5 }
 0x5ca   : > { %v983_v10 = vpop.permute.xlu1 %982 }
 0x5cb   : > { %v985_v12 = vunpack.i.h.bf16 %v983_v10  ;;  %v984_v13 = vunpack.i.l.bf16 %v983_v10 }
 0x5cd   : > { %v728_v17 = vsel %vm220_vm1, %v1152_v45, %v985_v12  ;;  %v727_v18 = vsel %vm220_vm1, %v1150_v43, %v984_v13 }
 0x5d2   : > { %v988_v11 = vpop.permute.xlu0 %987 }
 0x5d3   : > { %v990_v14 = vunpack.i.h.bf16 %v988_v11  ;;  %v989_v15 = vunpack.i.l.bf16 %v988_v11 }
 0x5d5   : > { %v730_v21 = vsel %vm268_vm2, %v728_v17, %v990_v14  ;;  %v729_v22 = vsel %vm268_vm2, %v727_v18, %v989_v15 }
 0x5da   : > { %v993_v16 = vpop.permute.xlu1 %992 }
 0x5db   : > { %v995_v19 = vunpack.i.h.bf16 %v993_v16  ;;  %v994_v20 = vunpack.i.l.bf16 %v993_v16 }
 0x5dd   : > { %v733_v23 = vsel %vm731_vm3, %v730_v21, %v995_v19  ;;  %v732_v24 = vsel %vm731_vm3, %v729_v22, %v994_v20 }
 0x5de   : > { %v872_v25 = vpack.c.bf16 %v733_v23, %v733_v23  ;;  %v871_v26 = vpack.c.bf16 %v732_v24, %v732_v24 }
 0x5e0   : > { %744 = vst.msk [vmem:[%s201_s8 + $0x4] sm:$0xf] %vm742_vm4, %v872_v25  ;;  %743 = vst.msk [vmem:[%s201_s8] sm:$0xf] %vm742_vm4, %v871_v26 }
 0x5e1 PF: > { %s12_s11 = sadd.s32 1, %s1051_s11   ;;  %s1200_s9 = smov %s1047_s10 }
 0x5e2   : > { %p9_p5 = scmp.ge.s32.totalorder %s12_s11, 4   ;;  %s1201_s10 = smov %s1203_s12 }
 0x5e4   :  { %11 = sbr.rel (!%p9_p5) target bundleno = 2 (0x2), region = 61 }

// kernel: multimodal_moe_forward.22
= control target key start
LH: loop header
LB: loop body
LE: loop exit
PB: predicated region body
PF: predicated region fallthrough
CT: control target
= control target key end

     0   :  { %v333_v0 = vmov 0.0   ;;  %vm334_vm0 = vmmov 0   ;;  %vm59_vm1 = vcmask 261120   ;;  %s429_s1 = inlined_call_operand.vmem [shape: bf16[32,32], index: 1, kind: input, shape index: {}]   ;;  %s430_s0 = inlined_call_operand.vmem [shape: bf16[16,32], index: 0, kind: input, shape index: {}]   ;;  %s431_s3 = inlined_call_operand.vmem [shape: bf16[32,32], index: 3, kind: input, shape index: {}]   ;;  %s432_s2 = inlined_call_operand.vmem [shape: f32[1,32], index: 2, kind: input, shape index: {}]   ;;  %s433_s5 = inlined_call_operand.vmem [shape: bf16[32,32], index: 5, kind: input, shape index: {}]   ;;  %s434_s4 = inlined_call_operand.vmem [shape: f32[1,32], index: 4, kind: input, shape index: {}]   ;;  %s435_s6 = inlined_call_operand.vmem [shape: f32[1,32], index: 6, kind: input, shape index: {}]   ;;  %s436_s7 = inlined_call_operand.vmem [shape: f32[16,32], index: 7, kind: output, shape index: {0}]   ;;  %s437_s8 = inlined_call_operand.vmem [shape: f32[16,32], index: 8, kind: output, shape index: {1}]  }
   0x1   :  { %292 = vmatprep.subr.bf16.mxu0 %v333_v0  ;;  %v318_v1 = vld [vmem:[%s429_s1 + $0x8] sm:$0xff]   ;;  %296 = vmatprep.mubr.msk.bf16.mxu0 %vm334_vm0, %v333_v0  ;;  %v319_v2 = vld [vmem:[%s429_s1] sm:$0xff]  }
   0x2   :  { %300 = vmatprep.subr.bf16.mxu1 %v333_v0  ;;  %304 = vmatprep.mubr.msk.bf16.mxu1 %vm334_vm0, %v333_v0  ;;  %v320_v3 = vld [vmem:[%s430_s0] sm:$0xff]   ;;  %v321_v4 = vld [vmem:[%s431_s3 + $0x8] sm:$0xff]  }
   0x3   :  { %293 = vmatpush3.bf16.msra.mxu0 %v318_v1  ;;  %301 = vmatpush3.bf16.msra.mxu1 %v321_v4  ;;  %v322_v5 = vld [vmem:[%s431_s3] sm:$0xff]   ;;  %v323_v14 = vld [vmem:[%s433_s5 + $0x8] sm:$0xff]  }
   0x4   :  { %294 = vmatprep.subr.bf16.mxu0 %v333_v0  ;;  %302 = vmatprep.subr.bf16.mxu1 %v333_v0  ;;  %v268_v7 = vld [vmem:[%s432_s2] ss:$0 sm:$0xff] }
   0x5   :  { %v324_v15 = vld [vmem:[%s433_s5] sm:$0xff]  }
   0x6   :  { %v273_v17 = vld [vmem:[%s434_s4] ss:$0 sm:$0xff] }
   0x7   :  { %295 = vmatpush3.bf16.msra.mxu0 %v319_v2  ;;  %303 = vmatpush3.bf16.msra.mxu1 %v322_v5  ;;  %v277_v24 = vld [vmem:[%s435_s6] ss:$0 sm:$0xff] }
   0x8   :  { %308 = vmatprep.subr.bf16.mxu0 %v333_v0 }
   0xa   :  { %297 = vmatmul.mubr.msk.bf16.vlgmr.msra.gmra.mxu0 %vm59_vm1, %v320_v3 }
   0xb   :  { %312 = vmatprep.mubr.msk.bf16.mxu0 %vm334_vm0, %v333_v0  ;;  %309 = vmatpush3.bf16.msra.mxu0 %v323_v14 }
   0xc   :  { %310 = vmatprep.subr.bf16.mxu0 %v333_v0 }
   0xf   :  { %311 = vmatpush3.bf16.msra.mxu0 %v324_v15 }
  0xca   :  { %v97_v6 = vpop.f32.mrf.mxu0 }
  0xcb   :  { %v98_v10 = vadd.f32 %v268_v7, %v97_v6 }
  0xcc   :  { %v298_v8 = vpop.f32.mrf.mxu0 }
  0xce   :  { %v100_v9 = vpop.f32.mrf.mxu0 }
  0xcf   :  { %v101_v11 = vadd.f32 %v268_v7, %v100_v9 }
  0xd0   :  { %v299_v12 = vpop.f32.mrf.mxu0 }
  0xd1   :  { %v104_v13 = vpack.c.bf16 %v101_v11, %v98_v10 }
  0xd3   :  { %305 = vmatmul.mubr.msk.bf16.vlgmr.msra.gmra.mxu1 %vm59_vm1, %v104_v13 }
 0x193   :  { %v165_v16 = vpop.f32.mrf.mxu1 }
 0x194   :  { %v166_v20 = vadd.f32 %v273_v17, %v165_v16 }
 0x195   :  { %v306_v18 = vpop.f32.mrf.mxu1 }
 0x197   :  { %v168_v19 = vpop.f32.mrf.mxu1 }
 0x198   :  { %v169_v21 = vadd.f32 %v273_v17, %v168_v19 }
 0x199   :  { %v307_v22 = vpop.f32.mrf.mxu1 }
 0x19a   :  { %v172_v23 = vpack.c.bf16 %v169_v21, %v166_v20 }
 0x19c   :  { %313 = vmatmul.mubr.msk.bf16.vlgmr.msra.gmra.mxu0 %vm59_vm1, %v172_v23 }
 0x25c   :  { %v233_v25 = vpop.f32.mrf.mxu0 }
 0x25d   :  { %v234_v26 = vadd.f32 %v277_v24, %v233_v25 }
 0x25e   :  { %v314_v27 = vpop.f32.mrf.mxu0 }
 0x25f   :  { %v281_v28 = vmul.f32 -1.442695, %v234_v26 }
 0x260   :  { %v236_v29 = vpop.f32.mrf.mxu0 }
 0x261   :  { %325 = vpow2.f32 %v281_v28  ;;  %v237_v30 = vadd.f32 %v277_v24, %v236_v29 }
 0x262   :  { %v315_v31 = vpop.f32.mrf.mxu0 }
 0x263   :  { %v282_v32 = vmul.f32 -1.442695, %v237_v30 }
 0x265   :  { %327 = vpow2.f32 %v282_v32 }
 0x26e   :  { %v326_v33 = vpop.eup %325 }
 0x26f   :  { %v246_v34 = vadd.f32 1.0, %v326_v33 }
 0x271   :  { %329 = vrcp.f32 %v246_v34 }
 0x272   :  { %v328_v35 = vpop.eup %327 }
 0x273   :  { %v247_v36 = vadd.f32 1.0, %v328_v35 }
 0x275   :  { %331 = vrcp.f32 %v247_v36 }
 0x27e   :  { %v330_v37 = vpop.eup %329 }
 0x27f   :  { %v252_v38 = vmul.f32 %v330_v37, %v166_v20  ;;  %v256_v39 = vsub.f32 1.0, %v330_v37 }
 0x281   :  { %254 = vst.msk [vmem:[%s436_s7] sm:$0xff] %vm59_vm1, %v252_v38  ;;  %258 = vst.msk [vmem:[%s437_s8] sm:$0xff] %vm59_vm1, %v256_v39 }
 0x282   :  { %v332_v40 = vpop.eup %331 }
 0x283   :  { %v253_v41 = vmul.f32 %v332_v40, %v169_v21  ;;  %v257_v42 = vsub.f32 1.0, %v332_v40 }
 0x285   :  { %255 = vst.msk [vmem:[%s436_s7 + $0x8] sm:$0xff] %vm59_vm1, %v253_v41  ;;  %259 = vst.msk [vmem:[%s437_s8 + $0x8] sm:$0xff] %vm59_vm1, %v257_v42 }

// kernel: multimodal_moe_forward.23
= control target key start
LH: loop header
LB: loop body
LE: loop exit
PB: predicated region body
PF: predicated region fallthrough
CT: control target
= control target key end

     0   :  { %s706_s21 = smov 0   ;;  %s708_s22 = smov 0   ;;  %s767_s0 = inlined_call_operand.vmem [shape: bf16[2,16,32], index: 0, kind: input, shape index: {}]   ;;  %s768_s1 = inlined_call_operand.vmem [shape: f32[2,1,32], index: 1, kind: input, shape index: {}]   ;;  %s769_s2 = inlined_call_operand.vmem [shape: f32[2,1,32], index: 2, kind: input, shape index: {}]   ;;  %s770_s3 = inlined_call_operand.vmem [shape: f32[1,32], index: 3, kind: input, shape index: {}]   ;;  %s771_s4 = inlined_call_operand.vmem [shape: f32[1,32], index: 4, kind: input, shape index: {}]   ;;  %s772_s5 = inlined_call_operand.vmem [shape: bf16[2,16,32], index: 5, kind: output, shape index: {0}]   ;;  %s773_s6 = inlined_call_operand.vmem [shape: bf16[2,16,32], index: 6, kind: output, shape index: {1}]  }
   0x1   :  { %s710_s23 = smov 0  }
   0x2 LB: > { %s29_s24 = sadd.s32 1, %s665_s22  ;;  %p591_p0 = scmp.ge.s32.totalorder %s669_s23, 1  ;;  %s669_s23 = sphi %s710_s23, %s17_s23   ;;  %s665_s22 = sphi %s708_s22, %s775_s22   ;;  %s661_s21 = sphi %s706_s21, %s774_s21  }
   0x3   : > { %p31_p1 = scmp.ge.s32.totalorder %s29_s24, 2  ;;  %p254_p2 = scmp.lt.s32.totalorder %s669_s23, 3 }
   0x5   : > { %s777_s24 = smov (%p31_p1, %s29_s24), 0  ;;  %p255_p3 = pnand %p591_p0, %p254_p2 }
   0x6   : > { %p308_p4 = scmp.lt.s32.totalorder (!%p255_p3), %s661_s21, 1 }
   0x7   : > { %258 = sbr.rel (%p255_p3) target bundleno = 337 (0x151), region = 40 }
   0xc   : > { %s779_s21 = smov (!%p308_p4, %s661_s21), 1  ;;  %vm376_vm0 = vcmask 261120   ;;  %vm373_vm1 = vcmask 257024   ;;  %v602_v30 = vld [vmem:[%s770_s3] ss:$0 sm:$0xff] }
   0xd   : > { %s724_s25 = sshll.u32 %s779_s21, 3  ;;  %s319_s28 = scalar_lea.vmem %s768_s1, %s779_s21  ;;  %v603_v32 = vld [vmem:[%s771_s4] ss:$0 sm:$0xff] }
   0xe   : > { %s315_s7 = scalar_lea.vmem %s767_s0, %s724_s25  ;;  %s322_s10 = scalar_lea.vmem %s769_s2, %s779_s21  ;;  %v599_v4 = vld [vmem:[%s319_s28] ss:$0 sm:$0xff] }
   0xf   : > { %v616_v0 = vld [vmem:[%s315_s7] sm:$0xff]   ;;  %s331_s13 = scalar_lea.vmem %s772_s5, %s724_s25  ;;  %s341_s20 = scalar_lea.vmem %s773_s6, %s724_s25 }
  0x10   : > { %v598_v1 = vld [vmem:[%s322_s10] ss:$0 sm:$0xff]  ;;  %v617_v2 = vunpack.c.l.bf16 %v616_v0  ;;  %v618_v3 = vunpack.c.h.bf16 %v616_v0 }
  0x12   : > { %v355_v5 = vmul.f32 %v617_v2, %v598_v1  ;;  %v356_v6 = vmul.f32 %v618_v3, %v598_v1 }
  0x14   : > { %v363_v7 = vadd.f32 %v599_v4, %v355_v5  ;;  %v364_v8 = vadd.f32 %v599_v4, %v356_v6 }
  0x16   : > { %v377_v9 = vsel %vm376_vm0, %v363_v7, 0.0  ;;  %v611_v10 = vpack.c.bf16 %v363_v7, %v363_v7  ;;  %v612_v11 = vpack.c.bf16 %v364_v8, %v364_v8  ;;  %v380_v12 = vsel %vm376_vm0, %v364_v8, 0.0 }
  0x17   : > { %378 = vadd.xlane.f32.xlu0 %v377_v9 }
  0x18   : > { %374 = vst.msk [vmem:[%s331_s13] sm:$0xf] %vm373_vm1, %v611_v10  ;;  %375 = vst.msk [vmem:[%s331_s13 + $0x4] sm:$0xf] %vm373_vm1, %v612_v11 }
  0x1b   : > { %381 = vadd.xlane.f32.xlu0 %v380_v12 }
  0xa0   : > { %v379_v13 = vpop.xlane.xlu0 %378 }
  0xa1   : > { %v384_v14 = vmul.f32 0.03125, %v379_v13 }
  0xa3   : > { %v386_v15 = vsub.f32 %v363_v7, %v384_v14 }
  0xa4   : > { %v382_v16 = vpop.xlane.xlu0 %381 }
  0xa5   : > { %v385_v17 = vmul.f32 0.03125, %v382_v16  ;;  %v388_v18 = vmul.f32 %v386_v15, %v386_v15 }
  0xa7   : > { %v387_v19 = vsub.f32 %v364_v8, %v385_v17  ;;  %v390_v20 = vsel %vm376_vm0, %v388_v18, 0.0 }
  0xa8   : > { %391 = vadd.xlane.f32.xlu1 %v390_v20 }
  0xa9   : > { %v389_v21 = vmul.f32 %v387_v19, %v387_v19 }
  0xab   : > { %v393_v22 = vsel %vm376_vm0, %v389_v21, 0.0 }
  0xac   : > { %394 = vadd.xlane.f32.xlu1 %v393_v22 }
 0x131   : > { %v392_v23 = vpop.xlane.xlu1 %391 }
 0x132   : > { %v396_v24 = vmul.f32 0.03125, %v392_v23 }
 0x134   : > { %v398_v25 = vadd.f32 1e-05, %v396_v24 }
 0x135   : > { %v395_v26 = vpop.xlane.xlu1 %394 }
 0x136   : > { %643 = vrsqrt.f32 %v398_v25  ;;  %v397_v27 = vmul.f32 0.03125, %v395_v26 }
 0x138   : > { %v399_v28 = vadd.f32 1e-05, %v397_v27 }
 0x13a   : > { %645 = vrsqrt.f32 %v399_v28 }
 0x143   : > { %v644_v29 = vpop.eup %643 }
 0x144   : > { %v402_v31 = vmul.f32 %v644_v29, %v386_v15 }
 0x146   : > { %v411_v33 = vmul.f32 %v602_v30, %v402_v31 }
 0x147   : > { %v646_v34 = vpop.eup %645 }
 0x148   : > { %v420_v35 = vadd.f32 %v603_v32, %v411_v33  ;;  %v403_v36 = vmul.f32 %v646_v34, %v387_v19 }
 0x14a   : > { %v613_v37 = vpack.c.bf16 %v420_v35, %v420_v35  ;;  %v412_v38 = vmul.f32 %v602_v30, %v403_v36 }
 0x14c   : > { %430 = vst.msk [vmem:[%s341_s20] sm:$0xf] %vm373_vm1, %v613_v37  ;;  %v421_v39 = vadd.f32 %v603_v32, %v412_v38 }
 0x14e   : > { %v614_v40 = vpack.c.bf16 %v421_v39, %v421_v39 }
 0x150   : > { %431 = vst.msk [vmem:[%s341_s20 + $0x4] sm:$0xf] %vm373_vm1, %v614_v40 }
 0x151 PF: > { %s17_s23 = sadd.s32 1, %s669_s23   ;;  %s774_s21 = smov %s665_s22 }
 0x152   : > { %p14_p5 = scmp.ge.s32.totalorder %s17_s23, 4   ;;  %s775_s22 = smov %s777_s24 }
 0x154   :  { %16 = sbr.rel (!%p14_p5) target bundleno = 2 (0x2), region = 88 }

// kernel: multimodal_moe_forward.24
= control target key start
LH: loop header
LB: loop body
LE: loop exit
PB: predicated region body
PF: predicated region fallthrough
CT: control target
= control target key end

     0   :  { %s306_s1 = inlined_call_operand.vmem [shape: bf16[128,128], index: 1, kind: input, shape index: {}]   ;;  %s307_s0 = inlined_call_operand.vmem [shape: bf16[32,128], index: 0, kind: input, shape index: {}]   ;;  %s308_s2 = inlined_call_operand.vmem [shape: f32[1,128], index: 2, kind: input, shape index: {}]   ;;  %s309_s3 = inlined_call_operand.vmem [shape: f32[32,128], index: 3, kind: output, shape index: {}]  }
   0x1   :  { %v231_v0 = vld [vmem:[%s306_s1 + $0x38] sm:$0xff]   ;;  %v232_v1 = vld [vmem:[%s306_s1 + $0x30] sm:$0xff]   ;;  %v233_v2 = vld [vmem:[%s306_s1 + $0x28] sm:$0xff]  }
   0x2   :  { %211 = vmatprep.subr.bf16.mxu0 %v231_v0  ;;  %v234_v3 = vld [vmem:[%s306_s1 + $0x20] sm:$0xff]   ;;  %v235_v5 = vld [vmem:[%s306_s1 + $0x18] sm:$0xff]   ;;  %v236_v6 = vld [vmem:[%s306_s1 + $0x10] sm:$0xff]  }
   0x3   :  { %212 = vmatpush3.bf16.msra.mxu0 %v231_v0  ;;  %v239_v4 = vld [vmem:[%s307_s0] sm:$0xff]   ;;  %v237_v7 = vld [vmem:[%s306_s1 + $0x8] sm:$0xff]  }
   0x4   :  { %213 = vmatprep.subr.bf16.mxu0 %v232_v1  ;;  %227 = vmatprep.mubr.bf16.mxu0 %v239_v4  ;;  %v238_v8 = vld [vmem:[%s306_s1] sm:$0xff]   ;;  %v240_v9 = vld [vmem:[%s307_s0 + $0x8] sm:$0xff]  }
   0x5   :  { %v200_v10 = vld [vmem:[%s308_s2] ss:$0 sm:$0xff] }
   0x7   :  { %214 = vmatpush3.bf16.msra.mxu0 %v232_v1 }
   0x8   :  { %215 = vmatprep.subr.bf16.mxu0 %v233_v2 }
   0xb   :  { %216 = vmatpush3.bf16.msra.mxu0 %v233_v2 }
   0xc   :  { %217 = vmatprep.subr.bf16.mxu0 %v234_v3 }
   0xf   :  { %218 = vmatpush3.bf16.msra.mxu0 %v234_v3 }
  0x10   :  { %219 = vmatprep.subr.bf16.mxu0 %v235_v5 }
  0x13   :  { %220 = vmatpush3.bf16.msra.mxu0 %v235_v5 }
  0x14   :  { %221 = vmatprep.subr.bf16.mxu0 %v236_v6 }
  0x17   :  { %222 = vmatpush3.bf16.msra.mxu0 %v236_v6 }
  0x18   :  { %223 = vmatprep.subr.bf16.mxu0 %v237_v7 }
  0x1b   :  { %224 = vmatpush3.bf16.msra.mxu0 %v237_v7 }
  0x1c   :  { %225 = vmatprep.subr.bf16.mxu0 %v238_v8 }
  0x1f   :  { %226 = vmatpush3.bf16.msra.mxu0 %v238_v8 }
  0x22   :  { %228 = vmatmul.mubr.bf16.vlgmr.msra.gmra.mxu0 %v240_v9 }
  0xe2   :  { %v229_v11 = vpop.f32.mrf.mxu0 }
  0xe3   :  { %v180_v12 = vadd.f32 %v229_v11, %v200_v10 }
  0xe4   :  { %v141_v13 = vpop.f32.mrf.mxu0 }
  0xe5   :  { %184 = vst [vmem:[%s309_s3 + $0x10] sm:$0xff] %v180_v12  ;;  %v178_v14 = vadd.f32 %v200_v10, %v141_v13 }
  0xe6   :  { %v230_v15 = vpop.f32.mrf.mxu0 }
  0xe7   :  { %182 = vst [vmem:[%s309_s3] sm:$0xff] %v178_v14  ;;  %v181_v16 = vadd.f32 %v230_v15, %v200_v10 }
  0xe8   :  { %v144_v17 = vpop.f32.mrf.mxu0 }
  0xe9   :  { %185 = vst [vmem:[%s309_s3 + $0x18] sm:$0xff] %v181_v16  ;;  %v179_v18 = vadd.f32 %v200_v10, %v144_v17 }
  0xeb   :  { %183 = vst [vmem:[%s309_s3 + $0x8] sm:$0xff] %v179_v18 }

// kernel: mul.12
= control target key start
LH: loop header
LB: loop body
LE: loop exit
PB: predicated region body
PF: predicated region fallthrough
CT: control target
= control target key end

     0   :  { %s100_s0 = inlined_call_operand.vmem [shape: f32[32,4], index: 0, kind: input, shape index: {}]   ;;  %s101_s1 = inlined_call_operand.vmem [shape: f32[32,4], index: 1, kind: input, shape index: {}]   ;;  %s102_s2 = inlined_call_operand.vmem [shape: f32[32,4], index: 2, kind: output, shape index: {}]  }
   0x1   :  { %v3_v0 = vld [vmem:[%s100_s0] sm:$0xff]  ;;  %v40_v2 = vld [vmem:[%s100_s0 + $0x8] sm:$0xff]  ;;  %v43_v5 = vld [vmem:[%s100_s0 + $0x10] sm:$0xff] }
   0x2   :  { %v4_v1 = vld [vmem:[%s101_s1] sm:$0xff]  ;;  %v41_v4 = vld [vmem:[%s101_s1 + $0x8] sm:$0xff]  ;;  %v44_v6 = vld [vmem:[%s101_s1 + $0x10] sm:$0xff] }
   0x3   :  { %v7_v3 = vmul.f32 %v4_v1, %v3_v0  ;;  %v16_v7 = vmul.f32 %v41_v4, %v40_v2  ;;  %v26_v8 = vmul.f32 %v44_v6, %v43_v5  ;;  %v46_v9 = vld [vmem:[%s100_s0 + $0x18] sm:$0xff] }
   0x4   :  { %v47_v10 = vld [vmem:[%s101_s1 + $0x18] sm:$0xff] }
   0x5   :  { %9 = vst [vmem:[%s102_s2] sm:$0xff] %v7_v3  ;;  %v36_v11 = vmul.f32 %v47_v10, %v46_v9  ;;  %42 = vst [vmem:[%s102_s2 + $0x8] sm:$0xff] %v16_v7 }
   0x6   :  { %45 = vst [vmem:[%s102_s2 + $0x10] sm:$0xff] %v26_v8 }
   0x7   :  { %48 = vst [vmem:[%s102_s2 + $0x18] sm:$0xff] %v36_v11 }

// kernel: mul.15
= control target key start
LH: loop header
LB: loop body
LE: loop exit
PB: predicated region body
PF: predicated region fallthrough
CT: control target
= control target key end

     0   :  { %s100_s0 = inlined_call_operand.vmem [shape: f32[32,2], index: 0, kind: input, shape index: {}]   ;;  %s101_s1 = inlined_call_operand.vmem [shape: f32[32,2], index: 1, kind: input, shape index: {}]   ;;  %s102_s2 = inlined_call_operand.vmem [shape: f32[32,2], index: 2, kind: output, shape index: {}]  }
   0x1   :  { %v3_v0 = vld [vmem:[%s100_s0] sm:$0xff]  ;;  %v40_v2 = vld [vmem:[%s100_s0 + $0x8] sm:$0xff]  ;;  %v43_v5 = vld [vmem:[%s100_s0 + $0x10] sm:$0xff] }
   0x2   :  { %v4_v1 = vld [vmem:[%s101_s1] sm:$0xff]  ;;  %v41_v4 = vld [vmem:[%s101_s1 + $0x8] sm:$0xff]  ;;  %v44_v6 = vld [vmem:[%s101_s1 + $0x10] sm:$0xff] }
   0x3   :  { %v7_v3 = vmul.f32 %v4_v1, %v3_v0  ;;  %v16_v7 = vmul.f32 %v41_v4, %v40_v2  ;;  %v26_v8 = vmul.f32 %v44_v6, %v43_v5  ;;  %v46_v9 = vld [vmem:[%s100_s0 + $0x18] sm:$0xff] }
   0x4   :  { %v47_v10 = vld [vmem:[%s101_s1 + $0x18] sm:$0xff] }
   0x5   :  { %9 = vst [vmem:[%s102_s2] sm:$0xff] %v7_v3  ;;  %v36_v11 = vmul.f32 %v47_v10, %v46_v9  ;;  %42 = vst [vmem:[%s102_s2 + $0x8] sm:$0xff] %v16_v7 }
   0x6   :  { %45 = vst [vmem:[%s102_s2 + $0x10] sm:$0xff] %v26_v8 }
   0x7   :  { %48 = vst [vmem:[%s102_s2 + $0x18] sm:$0xff] %v36_v11 }

// kernel: multimodal_moe_forward.25
= control target key start
LH: loop header
LB: loop body
LE: loop exit
PB: predicated region body
PF: predicated region fallthrough
CT: control target
= control target key end

     0   :  { %s1298_s24 = smov 0   ;;  %s1300_s25 = smov 0   ;;  %s1447_s0 = inlined_call_operand.vmem [shape: bf16[32,32], index: 0, kind: input, shape index: {}]   ;;  %s1448_s1 = inlined_call_operand.vmem [shape: f32[6,32,1], index: 1, kind: input, shape index: {}]   ;;  %s1449_s2 = inlined_call_operand.vmem [shape: bf16[6,32,128], index: 2, kind: input, shape index: {}]   ;;  %s1450_s3 = inlined_call_operand.vmem [shape: f32[6,1,128], index: 3, kind: input, shape index: {}]   ;;  %s1451_s4 = inlined_call_operand.vmem [shape: bf16[6,128,32], index: 4, kind: input, shape index: {}]   ;;  %s1452_s5 = inlined_call_operand.vmem [shape: f32[6,1,32], index: 5, kind: input, shape index: {}]   ;;  %s1453_s6 = inlined_call_operand.vmem [shape: bf16[32,32], index: 6, kind: input, shape index: {}]   ;;  %s1454_s7 = inlined_call_operand.vmem [shape: bf16[32,32], index: 7, kind: output, shape index: {}]  }
   0x1   :  { %s1302_s26 = smov 0  }
   0x2 LB: > { %s32_s27 = sadd.s32 1, %s1249_s25  ;;  %p1081_p0 = scmp.ge.s32.totalorder %s1253_s26, 1  ;;  %s1253_s26 = sphi %s1302_s26, %s17_s26   ;;  %s1249_s25 = sphi %s1300_s25, %s1456_s25   ;;  %s1245_s24 = sphi %s1298_s24, %s1455_s24  }
   0x3   : > { %p34_p1 = scmp.ge.s32.totalorder %s32_s27, 6  ;;  %p338_p2 = scmp.lt.s32.totalorder %s1253_s26, 7 }
   0x5   : > { %s1458_s27 = smov (%p34_p1, %s32_s27), 0  ;;  %p339_p3 = pnand %p1081_p0, %p338_p2 }
   0x6   : > { %p417_p4 = scmp.lt.s32.totalorder (!%p339_p3), %s1245_s24, 5  ;;  %p466_p5 = scmp.eq.s32.totalorder (!%p339_p3), %s1245_s24, 0 }
   0x7   : > { %342 = sbr.rel (%p339_p3) target bundleno = 498 (0x1f2), region = 48 }
   0xc   : > { %s1321_s28 = scalar_select %p417_p4, %s1245_s24, 5  ;;  %vm472_vm0 = vcmask (%p466_p5), 261120   ;;  %v1255_v0 = vmov (%p466_p5), 0.0  }
   0xd   : > { %471 = sbr.rel (!%p466_p5) target bundleno = 18 (0x12), region = 52  ;;  %473 = vst.msk [vmem:[#allocation2] sm:$0xff] (%p466_p5), %vm472_vm0, %v1255_v0  ;;  %474 = vst.msk [vmem:[#allocation2 + $0x8] sm:$0xff] (%p466_p5), %vm472_vm0, %v1255_v0 }
   0xe   : > { %s1114_s29 = sshll.u32 %s1321_s28, 5  ;;  %s1115_s30 = sshll.u32 %s1321_s28, 4  ;;  %475 = vst.msk [vmem:[#allocation2 + $0x10] sm:$0xff] (%p466_p5), %vm472_vm0, %v1255_v0  ;;  %476 = vst.msk [vmem:[#allocation2 + $0x18] sm:$0xff] (%p466_p5), %vm472_vm0, %v1255_v0 }
   0xf   : > { %s1328_s10 = scalar_lea.vmem %s1448_s1, %s1114_s29  ;;  %s433_s13 = scalar_lea.vmem %s1449_s2, %s1115_s30 }
  0x10   : > { %s439_s16 = scalar_lea.vmem %s1450_s3, %s1321_s28  ;;  %s1116_s17 = sshll.u32 %s1321_s28, 6 }
  0x11   : > { %s1341_s20 = scalar_lea.vmem %s1451_s4, %s1116_s17  ;;  %s452_s23 = scalar_lea.vmem %s1452_s5, %s1321_s28 }
  0x12 PF: > { %v1203_v1 = vld [vmem:[%s433_s13 + $0x8] sm:$0xff]   ;;  %v1204_v2 = vld [vmem:[%s433_s13] sm:$0xff]   ;;  %vm523_vm1 = vcmask 261120   ;;  %v1207_v5 = vld [vmem:[%s1341_s20 + $0x38] sm:$0xff]   ;;  %v1256_v15 = vmov 0   ;;  %p876_p6 = scmp.eq.s32.totalorder %s1245_s24, 5 }
  0x13   : > { %1146 = vmatprep.subr.bf16.mxu0 %v1203_v1  ;;  %v1205_v3 = vld [vmem:[%s1447_s0] sm:$0xff]   ;;  %v1206_v4 = vld [vmem:[%s1447_s0 + $0x8] sm:$0xff]   ;;  %1154 = vmatprep.subr.bf16.mxu1 %v1207_v5  ;;  %v1208_v6 = vld [vmem:[%s1341_s20 + $0x30] sm:$0xff]   ;;  %vm913_vm6 = vcmask (%p876_p6), 257024  }
  0x14   : > { %1147 = vmatpush3.bf16.msra.mxu0 %v1203_v1  ;;  %1150 = vmatprep.mubr.msk.bf16.mxu0 %vm523_vm1, %v1205_v3  ;;  %v1209_v7 = vld [vmem:[%s1341_s20 + $0x28] sm:$0xff]   ;;  %v1210_v8 = vld [vmem:[%s1341_s20 + $0x20] sm:$0xff]   ;;  %v1211_v9 = vld [vmem:[%s1341_s20 + $0x18] sm:$0xff]  }
  0x15   : > { %1148 = vmatprep.subr.bf16.mxu0 %v1204_v2  ;;  %1155 = vmatpush3.bf16.msra.mxu1 %v1207_v5  ;;  %v1212_v10 = vld [vmem:[%s1341_s20 + $0x10] sm:$0xff]   ;;  %v1213_v11 = vld [vmem:[%s1341_s20 + $0x8] sm:$0xff]   ;;  %v1214_v12 = vld [vmem:[%s1341_s20] sm:$0xff]  }
  0x16   : > { %1156 = vmatprep.subr.bf16.mxu1 %v1208_v6  ;;  %v479_v13 = vld [vmem:[%s1328_s10 + $0x10] sm:$0xff]  ;;  %v477_v14 = vld [vmem:[%s1328_s10] sm:$0xff]  ;;  %1202 = vset.pattern.permute.xlu1 %v1256_v15  ;;  %v480_v16 = vld [vmem:[%s1328_s10 + $0x18] sm:$0xff] }
  0x17   : > { %1201 = vset.pattern.permute.xlu0 %v1256_v15  ;;  %501 = vperm.xlu1 %1202, %v479_v13   ;;  %v478_v17 = vld [vmem:[%s1328_s10 + $0x8] sm:$0xff]  ;;  %v1090_v18 = vld [vmem:[%s439_s16] ss:$0 sm:$0xff] }
  0x18   : > { %1149 = vmatpush3.bf16.msra.mxu0 %v1204_v2  ;;  %491 = vperm.xlu0 %1201, %v477_v14  }
  0x19   : > { %1157 = vmatpush3.bf16.msra.mxu1 %v1208_v6 }
  0x1a   : > { %1158 = vmatprep.subr.bf16.mxu1 %v1209_v7 }
  0x1b   : > { %1151 = vmatmul.mubr.msk.bf16.vlgmr.msra.gmra.mxu0 %vm523_vm1, %v1206_v4  ;;  %506 = vperm.xlu1 %1202, %v480_v16  }
  0x1c   : > { %496 = vperm.xlu0 %1201, %v478_v17  }
  0x1d   : > { %1159 = vmatpush3.bf16.msra.mxu1 %v1209_v7 }
  0x1e   : > { %1160 = vmatprep.subr.bf16.mxu1 %v1210_v8 }
  0x1f   : > { %851 = vperm.xlu1 %1202, %v478_v17  }
  0x20   : > { %846 = vperm.xlu0 %1201, %v477_v14  }
  0x21   : > { %1161 = vmatpush3.bf16.msra.mxu1 %v1210_v8 }
  0x22   : > { %1162 = vmatprep.subr.bf16.mxu1 %v1211_v9 }
  0x23   : > { %861 = vperm.xlu1 %1202, %v480_v16  }
  0x24   : > { %856 = vperm.xlu0 %1201, %v479_v13  }
  0x25   : > { %1163 = vmatpush3.bf16.msra.mxu1 %v1211_v9 }
  0x26   : > { %1164 = vmatprep.subr.bf16.mxu1 %v1212_v10 }
  0x29   : > { %1165 = vmatpush3.bf16.msra.mxu1 %v1212_v10 }
  0x2a   : > { %1166 = vmatprep.subr.bf16.mxu1 %v1213_v11 }
  0x2d   : > { %1167 = vmatpush3.bf16.msra.mxu1 %v1213_v11 }
  0x2e   : > { %1168 = vmatprep.subr.bf16.mxu1 %v1214_v12 }
  0x31   : > { %1169 = vmatpush3.bf16.msra.mxu1 %v1214_v12 }
  0xdb   : > { %v1152_v19 = vpop.f32.mrf.mxu0 }
  0xdc   : > { %v1372_v20 = vadd.f32 %v1152_v19, %v1090_v18 }
  0xdd   : > { %v606_v21 = vpop.f32.mrf.mxu0 }
  0xde   : > { %v1375_v22 = vmul.f32 0.70710677, %v1372_v20  ;;  %v1377_v23 = vadd.f32 %v1090_v18, %v606_v21 }
  0xdf   : > { %v1153_v24 = vpop.f32.mrf.mxu0 }
  0xe0   : > { %v639_v25 = vand.u32 2147483647, %v1375_v22  ;;  %v1381_v26 = vmul.f32 0.70710677, %v1377_v23  ;;  %v1383_v27 = vadd.f32 %v1153_v24, %v1090_v18  ;;  %vm631_vm2 = vcmp.ge.f32.partialorder %v1375_v22, 0.0 }
  0xe1   : > { %v609_v28 = vpop.f32.mrf.mxu0 }
  0xe2   : > { %v643_v29 = vmul.f32 0.3275911, %v639_v25  ;;  %v637_v30 = vand.u32 2147483647, %v1381_v26  ;;  %v1387_v31 = vmul.f32 0.70710677, %v1383_v27  ;;  %v1389_v32 = vadd.f32 %v1090_v18, %v609_v28 }
  0xe3   : > { %v691_v43 = vsub.f32 0.0, %v639_v25  ;;  %vm629_vm3 = vcmp.ge.f32.partialorder %v1381_v26, 0.0 }
  0xe4   : > { %v647_v33 = vadd.f32 1.0, %v643_v29  ;;  %v641_v34 = vmul.f32 0.3275911, %v637_v30  ;;  %v640_v35 = vand.u32 2147483647, %v1387_v31  ;;  %v689_v44 = vsub.f32 0.0, %v637_v30 }
  0xe5   : > { %v1393_v36 = vmul.f32 0.70710677, %v1389_v32  ;;  %v695_v45 = vmul.f32 %v691_v43, %v639_v25  ;;  %vm632_vm4 = vcmp.ge.f32.partialorder %v1387_v31, 0.0 }
  0xe6   : > { %1215 = vrcp.f32 %v647_v33  ;;  %v645_v37 = vadd.f32 1.0, %v641_v34  ;;  %v644_v38 = vmul.f32 0.3275911, %v640_v35  ;;  %v692_v46 = vsub.f32 0.0, %v640_v35 }
  0xe7   : > { %v638_v39 = vand.u32 2147483647, %v1393_v36  ;;  %v693_v48 = vmul.f32 %v689_v44, %v637_v30  ;;  %v701_v51 = vmul.f32 1.442695, %v695_v45  ;;  %vm630_vm5 = vcmp.ge.f32.partialorder %v1393_v36, 0.0 }
  0xe8   : > { %1217 = vrcp.f32 %v645_v37  ;;  %v648_v40 = vadd.f32 1.0, %v644_v38  ;;  %v696_v52 = vmul.f32 %v692_v46, %v640_v35  ;;  %v623_v36 = vmul.f32 0.5, %v1372_v20 }
  0xe9   : > { %v642_v41 = vmul.f32 0.3275911, %v638_v39  ;;  %v690_v50 = vsub.f32 0.0, %v638_v39  ;;  %v697_v55 = vmul.f32 1.442695, %v693_v48  ;;  %v1257_v48 = vmov -1.0  }
  0xea   : > { %1219 = vrcp.f32 %v648_v40  ;;  %v703_v61 = vmul.f32 1.442695, %v696_v52  ;;  %v636_v52 = vsel %vm632_vm4, 1.0, %v1257_v48 }
  0xeb   : > { %v646_v42 = vadd.f32 1.0, %v642_v41  ;;  %v694_v59 = vmul.f32 %v690_v50, %v638_v39 }
  0xed   : > { %1221 = vrcp.f32 %v646_v42  ;;  %v699_v4 = vmul.f32 1.442695, %v694_v59 }
  0xee   : > { %1223 = vpow2.f32 %v701_v51  ;;  %v633_v51 = vsel %vm629_vm3, 1.0, %v1257_v48 }
  0xef   : > { %1225 = vpow2.f32 %v697_v55 }
  0xf0   : > { %1227 = vpow2.f32 %v703_v61  ;;  %v621_v61 = vmul.f32 0.5, %v1377_v23 }
  0xf1   : > { %1229 = vpow2.f32 %v699_v4 }
  0xf3   : > { %v1216_v47 = vpop.eup %1215 }
  0xf4   : > { %v655_v49 = vmul.f32 1.0614054, %v1216_v47 }
  0xf5   : > { %v1218_v53 = vpop.eup %1217 }
  0xf6   : > { %v659_v54 = vadd.f32 -1.4531521, %v655_v49  ;;  %v653_v56 = vmul.f32 1.0614054, %v1218_v53  ;;  %v635_v49 = vsel %vm631_vm2, 1.0, %v1257_v48 }
  0xf7   : > { %v1220_v57 = vpop.eup %1219 }
  0xf8   : > { %v663_v58 = vmul.f32 %v1216_v47, %v659_v54  ;;  %v656_v60 = vmul.f32 1.0614054, %v1220_v57  ;;  %v657_v62 = vadd.f32 -1.4531521, %v653_v56 }
  0xfa   : > { %v667_v63 = vadd.f32 1.4214138, %v663_v58  ;;  %v1222_v0 = vpop.eup %1221  ;;  %v660_v1 = vadd.f32 -1.4531521, %v656_v60  ;;  %v661_v2 = vmul.f32 %v1218_v53, %v657_v62  ;;  %v624_v60 = vmul.f32 0.5, %v1383_v27  ;;  %v484_v27 = vld [vmem:[#allocation2] sm:$0xff] }
  0xfb   : > { %v654_v5 = vmul.f32 1.0614054, %v1222_v0  ;;  %v1224_v29 = vpop.eup %1223  ;;  %v622_v62 = vmul.f32 0.5, %v1389_v32 }
  0xfc   : > { %v671_v3 = vmul.f32 %v1216_v47, %v667_v63  ;;  %v664_v6 = vmul.f32 %v1220_v57, %v660_v1  ;;  %v665_v7 = vadd.f32 1.4214138, %v661_v2  ;;  %v1226_v37 = vpop.eup %1225 }
  0xfd   : > { %v658_v9 = vadd.f32 -1.4531521, %v654_v5  ;;  %v1228_v41 = vpop.eup %1227 }
  0xfe   : > { %v675_v8 = vadd.f32 -0.28449672, %v671_v3  ;;  %v668_v10 = vadd.f32 1.4214138, %v664_v6  ;;  %v669_v11 = vmul.f32 %v1218_v53, %v665_v7  ;;  %v1089_v3 = vld [vmem:[%s452_s23] ss:$0 sm:$0xff]  ;;  %v502_v7 = vpop.permute.xlu1 %501 }
  0xff   : > { %v662_v13 = vmul.f32 %v1222_v0, %v658_v9  ;;  %v486_v6 = vld [vmem:[#allocation2 + $0x10] sm:$0xff]  ;;  %v517_v9 = vmul.f32 %v1089_v3, %v502_v7 }
 0x100   : > { %v679_v12 = vmul.f32 %v1216_v47, %v675_v8  ;;  %v672_v14 = vmul.f32 %v1220_v57, %v668_v10  ;;  %v673_v15 = vadd.f32 -0.28449672, %v669_v11  ;;  %v492_v8 = vpop.permute.xlu0 %491  ;;  %v487_v11 = vld [vmem:[#allocation2 + $0x18] sm:$0xff] }
 0x101   : > { %v666_v17 = vadd.f32 1.4214138, %v662_v13  ;;  %v515_v32 = vmul.f32 %v1089_v3, %v492_v8  ;;  %v521_v20 = vadd.f32 %v517_v9, %v486_v6  ;;  %v485_v13 = vld [vmem:[#allocation2 + $0x8] sm:$0xff] }
 0x102   : > { %v683_v16 = vadd.f32 0.2548296, %v679_v12  ;;  %v676_v18 = vadd.f32 -0.28449672, %v672_v14  ;;  %v677_v19 = vmul.f32 %v1218_v53, %v673_v15  ;;  %v507_v12 = vpop.permute.xlu1 %506 }
 0x103   : > { %v670_v24 = vmul.f32 %v1222_v0, %v666_v17  ;;  %v519_v10 = vadd.f32 %v515_v32, %v484_v27  ;;  %526 = vst.msk [vmem:[#allocation2 + $0x10] sm:$0xff] %vm523_vm1, %v521_v20  ;;  %v518_v15 = vmul.f32 %v1089_v3, %v507_v12 }
 0x104   : > { %v687_v21 = vmul.f32 %v1216_v47, %v683_v16  ;;  %v680_v25 = vmul.f32 %v1220_v57, %v676_v18  ;;  %v681_v28 = vadd.f32 0.2548296, %v677_v19  ;;  %v1230_v47 = vpop.eup %1229  ;;  %v497_v14 = vpop.permute.xlu0 %496 }
 0x105   : > { %v674_v30 = vadd.f32 -0.28449672, %v670_v24  ;;  %524 = vst.msk [vmem:[#allocation2] sm:$0xff] %vm523_vm1, %v519_v10  ;;  %v516_v16 = vmul.f32 %v1089_v3, %v497_v14  ;;  %v522_v17 = vadd.f32 %v518_v15, %v487_v11 }
 0x106   : > { %v707_v33 = vmul.f32 %v1224_v29, %v687_v21  ;;  %v684_v34 = vadd.f32 0.2548296, %v680_v25  ;;  %v685_v35 = vmul.f32 %v1218_v53, %v681_v28  ;;  %v852_v21 = vpop.permute.xlu1 %851 }
 0x107   : > { %v678_v38 = vmul.f32 %v1222_v0, %v674_v30  ;;  %v520_v18 = vadd.f32 %v516_v16, %v485_v13  ;;  %527 = vst.msk [vmem:[#allocation2 + $0x18] sm:$0xff] %vm523_vm1, %v522_v17 }
 0x108   : > { %v688_v39 = vmul.f32 %v1220_v57, %v684_v34  ;;  %v705_v40 = vmul.f32 %v1226_v37, %v685_v35  ;;  %v711_v43 = vsub.f32 1.0, %v707_v33  ;;  %v634_v57 = vsel %vm630_vm5, 1.0, %v1257_v48  ;;  %v847_v19 = vpop.permute.xlu0 %846  ;;  %v1124_v48 = vld [vmem:[%s1453_s6] sm:$0xff] (%p876_p6)  }
 0x109   : > { %v682_v42 = vadd.f32 0.2548296, %v678_v38  ;;  %525 = vst.msk [vmem:[#allocation2 + $0x8] sm:$0xff] %vm523_vm1, %v520_v18 }
 0x10a   : > { %v708_v44 = vmul.f32 %v1228_v41, %v688_v39  ;;  %v709_v45 = vsub.f32 1.0, %v705_v40  ;;  %v715_v22 = vmul.f32 %v711_v43, %v635_v49  ;;  %v842_v28 = vld [vmem:[#allocation2 + $0x10] sm:$0xff]  ;;  %v862_v37 = vpop.permute.xlu1 %861 }
 0x10b   : > { %v686_v46 = vmul.f32 %v1222_v0, %v682_v42 }
 0x10c   : > { %v712_v50 = vsub.f32 1.0, %v708_v44  ;;  %v713_v54 = vmul.f32 %v709_v45, %v633_v51  ;;  %v719_v59 = vadd.f32 1.0, %v715_v22  ;;  %v857_v24 = vpop.permute.xlu0 %856  ;;  %v840_v33 = vld [vmem:[#allocation2] sm:$0xff]  ;;  %v1126_v51 = vunpack.c.h.bf16 (%p876_p6), %v1124_v48 }
 0x10d   : > { %v706_v53 = vmul.f32 %v1230_v47, %v686_v46 }
 0x10e   : > { %v716_v26 = vmul.f32 %v712_v50, %v636_v52  ;;  %v717_v58 = vadd.f32 1.0, %v713_v54  ;;  %v723_v4 = vmul.f32 %v719_v59, %v623_v36  ;;  %v843_v41 = vld [vmem:[#allocation2 + $0x18] sm:$0xff]  ;;  %v1125_v50 = vunpack.c.l.bf16 (%p876_p6), %v1124_v48 }
 0x10f   : > { %v710_v55 = vsub.f32 1.0, %v706_v53  ;;  %v1131_v53 = vld [vmem:[%s1453_s6 + $0x8] sm:$0xff] (%p876_p6)  }
 0x110   : > { %v720_v56 = vadd.f32 1.0, %v716_v26  ;;  %v721_v1 = vmul.f32 %v717_v58, %v621_v61  ;;  %v841_v45 = vld [vmem:[#allocation2 + $0x8] sm:$0xff]  ;;  %v1129_v22 = vunpack.c.l.bf16 (%p876_p6), %v1131_v53  ;;  %v1130_v26 = vunpack.c.h.bf16 (%p876_p6), %v1131_v53 }
 0x111   : > { %v714_v31 = vmul.f32 %v710_v55, %v634_v57 }
 0x112   : > { %v724_v0 = vmul.f32 %v720_v56, %v624_v60 }
 0x113   : > { %v718_v63 = vadd.f32 1.0, %v714_v31 }
 0x114   : > { %v726_v23 = vpack.c.bf16 %v724_v0, %v723_v4 }
 0x115   : > { %v722_v2 = vmul.f32 %v718_v63, %v622_v62 }
 0x117   : > { %v725_v5 = vpack.c.bf16 %v722_v2, %v721_v1 }
 0x119   : > { %1170 = vmatprep.mubr.bf16.mxu1 %v725_v5 }
 0x11a   : > { %1171 = vmatmul.mubr.bf16.vlgmr.msra.gmra.mxu1 %v726_v23 }
 0x1da   : > { %v1172_v25 = vpop.f32.mrf.mxu1 }
 0x1db   : > { %v866_v29 = vmul.f32 %v1172_v25, %v857_v24 }
 0x1dc   : > { %v825_v30 = vpop.f32.mrf.mxu1 }
 0x1dd   : > { %v870_v34 = vadd.f32 %v866_v29, %v842_v28  ;;  %v864_v35 = vmul.f32 %v847_v19, %v825_v30 }
 0x1de   : > { %v1173_v38 = vpop.f32.mrf.mxu1 }
 0x1df   : > { %874 = vst.msk [vmem:[#allocation2 + $0x10] sm:$0xff] %vm523_vm1, %v870_v34  ;;  %v868_v39 = vadd.f32 %v864_v35, %v840_v33  ;;  %v867_v40 = vmul.f32 %v1173_v38, %v862_v37 }
 0x1e0   : > { %v828_v42 = vpop.f32.mrf.mxu1 }
 0x1e1   : > { %872 = vst.msk [vmem:[#allocation2] sm:$0xff] %vm523_vm1, %v868_v39  ;;  %v871_v43 = vadd.f32 %v867_v40, %v843_v41  ;;  %v865_v44 = vmul.f32 %v852_v21, %v828_v42  ;;  %880 = sbr.rel (!%p876_p6) target bundleno = 498 (0x1f2), region = 60 }
 0x1e3   : > { %875 = vst.msk [vmem:[#allocation2 + $0x18] sm:$0xff] %vm523_vm1, %v871_v43  ;;  %v869_v46 = vadd.f32 %v865_v44, %v841_v45 }
 0x1e5   : > { %873 = vst.msk [vmem:[#allocation2 + $0x8] sm:$0xff] %vm523_vm1, %v869_v46 }
 0x1e6   : > { %v883_v52 = vld [vmem:[#allocation2 + $0x10] sm:$0xff] }
 0x1e7   : > { %v895_v57 = vadd.f32 %v1129_v22, %v883_v52 }
 0x1e8   : > { %v881_v47 = vld [vmem:[#allocation2] sm:$0xff] }
 0x1e9   : > { %v893_v55 = vadd.f32 %v1125_v50, %v881_v47  ;;  %v1121_v60 = vpack.c.bf16 %v895_v57, %v895_v57 }
 0x1ea   : > { %v884_v54 = vld [vmem:[#allocation2 + $0x18] sm:$0xff] }
 0x1eb   : > { %v896_v31 = vadd.f32 %v1130_v26, %v884_v54  ;;  %v1119_v58 = vpack.c.bf16 %v893_v55, %v893_v55  ;;  %916 = vst.msk [vmem:[%s1454_s7 + $0x8] sm:$0xf] %vm913_vm6, %v1121_v60 }
 0x1ec   : > { %v882_v49 = vld [vmem:[#allocation2 + $0x8] sm:$0xff] }
 0x1ed   : > { %v894_v56 = vadd.f32 %v1126_v51, %v882_v49  ;;  %v1122_v61 = vpack.c.bf16 %v896_v31, %v896_v31  ;;  %914 = vst.msk [vmem:[%s1454_s7] sm:$0xf] %vm913_vm6, %v1119_v58 }
 0x1ef   : > { %v1120_v59 = vpack.c.bf16 %v894_v56, %v894_v56  ;;  %917 = vst.msk [vmem:[%s1454_s7 + $0xc] sm:$0xf] %vm913_vm6, %v1122_v61 }
 0x1f1   : > { %915 = vst.msk [vmem:[%s1454_s7 + $0x4] sm:$0xf] %vm913_vm6, %v1120_v59 }
 0x1f2 PF: > { %s17_s26 = sadd.s32 1, %s1253_s26   ;;  %s1455_s24 = smov %s1249_s25 }
 0x1f3   : > { %p14_p7 = scmp.ge.s32.totalorder %s17_s26, 8   ;;  %s1456_s25 = smov %s1458_s27 }
 0x1f5   :  { %16 = sbr.rel (!%p14_p7) target bundleno = 2 (0x2), region = 108 }

// kernel: multimodal_moe_forward.26
= control target key start
LH: loop header
LB: loop body
LE: loop exit
PB: predicated region body
PF: predicated region fallthrough
CT: control target
= control target key end

     0   :  { %vm39_vm0 = vcmask 261120   ;;  %vm131_vm1 = vcmask 257024   ;;  %s831_s0 = inlined_call_operand.vmem [shape: bf16[32,32], index: 0, kind: input, shape index: {}]   ;;  %s832_s3 = inlined_call_operand.vmem [shape: bf16[32,128], index: 3, kind: input, shape index: {}]   ;;  %s833_s1 = inlined_call_operand.vmem [shape: f32[1,32], index: 1, kind: input, shape index: {}]   ;;  %s834_s2 = inlined_call_operand.vmem [shape: f32[1,32], index: 2, kind: input, shape index: {}]   ;;  %s835_s5 = inlined_call_operand.vmem [shape: bf16[128,32], index: 5, kind: input, shape index: {}]   ;;  %s836_s4 = inlined_call_operand.vmem [shape: f32[1,128], index: 4, kind: input, shape index: {}]   ;;  %s837_s6 = inlined_call_operand.vmem [shape: f32[1,32], index: 6, kind: input, shape index: {}]   ;;  %s838_s7 = inlined_call_operand.vmem [shape: bf16[32,32], index: 7, kind: output, shape index: {}]  }
   0x1   :  { %v554_v0 = vld [vmem:[%s831_s0] sm:$0xff]   ;;  %v570_v1 = vld [vmem:[%s831_s0 + $0x8] sm:$0xff]  }
   0x2   :  { %v699_v2 = vunpack.c.l.bf16 %v554_v0  ;;  %v701_v3 = vunpack.c.h.bf16 %v554_v0  ;;  %v703_v4 = vunpack.c.l.bf16 %v570_v1  ;;  %v705_v5 = vunpack.c.h.bf16 %v570_v1  ;;  %v615_v30 = vld [vmem:[%s832_s3 + $0x8] sm:$0xff]   ;;  %v616_v31 = vld [vmem:[%s832_s3] sm:$0xff]  }
   0x3   :  { %585 = vmatprep.subr.bf16.mxu0 %v615_v30  ;;  %v519_v45 = vld [vmem:[%s833_s1] ss:$0 sm:$0xff] }
   0x4   :  { %v40_v6 = vsel %vm39_vm0, %v699_v2, 0.0  ;;  %v46_v7 = vsel %vm39_vm0, %v703_v4, 0.0  ;;  %v43_v8 = vsel %vm39_vm0, %v701_v3, 0.0  ;;  %v49_v9 = vsel %vm39_vm0, %v705_v5, 0.0  ;;  %586 = vmatpush3.bf16.msra.mxu0 %v615_v30  ;;  %v520_v47 = vld [vmem:[%s834_s2] ss:$0 sm:$0xff] }
   0x5   :  { %41 = vadd.xlane.f32.xlu0 %v40_v6  ;;  %47 = vadd.xlane.f32.xlu1 %v46_v7 }
   0x6   :  { %587 = vmatprep.subr.bf16.mxu0 %v616_v31 }
   0x8   :  { %588 = vmatpush3.bf16.msra.mxu0 %v616_v31 }
   0x9   :  { %44 = vadd.xlane.f32.xlu0 %v43_v8  ;;  %50 = vadd.xlane.f32.xlu1 %v49_v9  ;;  %v619_v8 = vld [vmem:[%s835_s5 + $0x38] sm:$0xff]   ;;  %v620_v9 = vld [vmem:[%s835_s5 + $0x30] sm:$0xff]  }
   0xa   :  { %593 = vmatprep.subr.bf16.mxu1 %v619_v8 }
   0xb   :  { %594 = vmatpush3.bf16.msra.mxu1 %v619_v8 }
   0xc   :  { %595 = vmatprep.subr.bf16.mxu1 %v620_v9 }
   0xf   :  { %596 = vmatpush3.bf16.msra.mxu1 %v620_v9 }
  0x8e   :  { %v42_v10 = vpop.xlane.xlu0 %41  ;;  %v48_v11 = vpop.xlane.xlu1 %47 }
  0x8f   :  { %v53_v12 = vmul.f32 0.03125, %v42_v10  ;;  %v55_v13 = vmul.f32 0.03125, %v48_v11  ;;  %v621_v10 = vld [vmem:[%s835_s5 + $0x28] sm:$0xff]   ;;  %v622_v11 = vld [vmem:[%s835_s5 + $0x20] sm:$0xff]  }
  0x90   :  { %597 = vmatprep.subr.bf16.mxu1 %v621_v10 }
  0x91   :  { %v57_v14 = vsub.f32 %v699_v2, %v53_v12  ;;  %v59_v15 = vsub.f32 %v703_v4, %v55_v13  ;;  %598 = vmatpush3.bf16.msra.mxu1 %v621_v10  ;;  %v623_v12 = vld [vmem:[%s835_s5 + $0x18] sm:$0xff]   ;;  %v624_v13 = vld [vmem:[%s835_s5 + $0x10] sm:$0xff]  }
  0x92   :  { %v45_v16 = vpop.xlane.xlu0 %44  ;;  %v51_v17 = vpop.xlane.xlu1 %50  ;;  %599 = vmatprep.subr.bf16.mxu1 %v622_v11 }
  0x93   :  { %v54_v18 = vmul.f32 0.03125, %v45_v16  ;;  %v56_v19 = vmul.f32 0.03125, %v51_v17  ;;  %v61_v20 = vmul.f32 %v57_v14, %v57_v14  ;;  %v63_v21 = vmul.f32 %v59_v15, %v59_v15  ;;  %v525_v17 = vld [vmem:[%s836_s4] ss:$0 sm:$0xff] }
  0x94   :  { %v651_v16 = vmov 0.0  }
  0x95   :  { %v58_v22 = vsub.f32 %v701_v3, %v54_v18  ;;  %v60_v23 = vsub.f32 %v705_v5, %v56_v19  ;;  %v65_v24 = vsel %vm39_vm0, %v61_v20, 0.0  ;;  %v71_v25 = vsel %vm39_vm0, %v63_v21, 0.0  ;;  %600 = vmatpush3.bf16.msra.mxu1 %v622_v11  ;;  %138 = vst.msk [vmem:[#allocation2 + $0x10] sm:$0xff] %vm39_vm0, %v651_v16  ;;  %136 = vst.msk [vmem:[#allocation2] sm:$0xff] %vm39_vm0, %v651_v16 }
  0x96   :  { %66 = vadd.xlane.f32.xlu0 %v65_v24  ;;  %601 = vmatprep.subr.bf16.mxu1 %v623_v12  ;;  %137 = vst.msk [vmem:[#allocation2 + $0x8] sm:$0xff] %vm39_vm0, %v651_v16  ;;  %139 = vst.msk [vmem:[#allocation2 + $0x18] sm:$0xff] %vm39_vm0, %v651_v16 }
  0x97   :  { %v62_v26 = vmul.f32 %v58_v22, %v58_v22  ;;  %v64_v27 = vmul.f32 %v60_v23, %v60_v23 }
  0x99   :  { %v68_v28 = vsel %vm39_vm0, %v62_v26, 0.0  ;;  %v74_v29 = vsel %vm39_vm0, %v64_v27, 0.0  ;;  %602 = vmatpush3.bf16.msra.mxu1 %v623_v12 }
  0x9a   :  { %72 = vadd.xlane.f32.xlu0 %v71_v25  ;;  %69 = vadd.xlane.f32.xlu1 %v68_v28 }
  0x9b   :  { %603 = vmatprep.subr.bf16.mxu1 %v624_v13 }
  0x9d   :  { %604 = vmatpush3.bf16.msra.mxu1 %v624_v13 }
  0x9e   :  { %75 = vadd.xlane.f32.xlu1 %v74_v29 }
 0x11f   :  { %v67_v32 = vpop.xlane.xlu0 %66 }
 0x120   :  { %v77_v33 = vmul.f32 0.03125, %v67_v32 }
 0x122   :  { %v81_v34 = vadd.f32 1e-05, %v77_v33 }
 0x123   :  { %v70_v35 = vpop.xlane.xlu1 %69  ;;  %v73_v36 = vpop.xlane.xlu0 %72 }
 0x124   :  { %627 = vrsqrt.f32 %v81_v34  ;;  %v78_v37 = vmul.f32 0.03125, %v70_v35  ;;  %v79_v38 = vmul.f32 0.03125, %v73_v36 }
 0x126   :  { %v82_v39 = vadd.f32 1e-05, %v78_v37  ;;  %v83_v40 = vadd.f32 1e-05, %v79_v38 }
 0x127   :  { %v76_v41 = vpop.xlane.xlu1 %75 }
 0x128   :  { %629 = vrsqrt.f32 %v82_v39  ;;  %v80_v42 = vmul.f32 0.03125, %v76_v41 }
 0x129   :  { %631 = vrsqrt.f32 %v83_v40 }
 0x12a   :  { %v84_v43 = vadd.f32 1e-05, %v80_v42 }
 0x12c   :  { %633 = vrsqrt.f32 %v84_v43 }
 0x131   :  { %v628_v44 = vpop.eup %627 }
 0x132   :  { %v89_v46 = vmul.f32 %v628_v44, %v57_v14  ;;  %v625_v14 = vld [vmem:[%s835_s5 + $0x8] sm:$0xff]  }
 0x133   :  { %605 = vmatprep.subr.bf16.mxu1 %v625_v14 }
 0x134   :  { %v100_v48 = vmul.f32 %v519_v45, %v89_v46  ;;  %606 = vmatpush3.bf16.msra.mxu1 %v625_v14 }
 0x135   :  { %v630_v49 = vpop.eup %629 }
 0x136   :  { %v632_v50 = vpop.eup %631  ;;  %v111_v51 = vadd.f32 %v520_v47, %v100_v48  ;;  %v90_v52 = vmul.f32 %v630_v49, %v58_v22 }
 0x137   :  { %v91_v53 = vmul.f32 %v632_v50, %v59_v15  ;;  %v626_v15 = vld [vmem:[%s835_s5] sm:$0xff]  }
 0x138   :  { %v545_v54 = vpack.c.bf16 %v111_v51, %v111_v51  ;;  %v101_v55 = vmul.f32 %v519_v45, %v90_v52  ;;  %607 = vmatprep.subr.bf16.mxu1 %v626_v15 }
 0x139   :  { %v634_v56 = vpop.eup %633  ;;  %v102_v57 = vmul.f32 %v519_v45, %v91_v53  ;;  %608 = vmatpush3.bf16.msra.mxu1 %v626_v15 }
 0x13a   :  { %132 = vst.msk [vmem:[#allocation3] sm:$0xf] %vm131_vm1, %v545_v54  ;;  %v112_v58 = vadd.f32 %v520_v47, %v101_v55  ;;  %v92_v59 = vmul.f32 %v634_v56, %v60_v23 }
 0x13b   :  { %v113_v60 = vadd.f32 %v520_v47, %v102_v57 }
 0x13c   :  { %v546_v61 = vpack.c.bf16 %v112_v58, %v112_v58  ;;  %v103_v62 = vmul.f32 %v519_v45, %v92_v59 }
 0x13d   :  { %v547_v63 = vpack.c.bf16 %v113_v60, %v113_v60 }
 0x13e   :  { %133 = vst.msk [vmem:[#allocation3 + $0x4] sm:$0xf] %vm131_vm1, %v546_v61  ;;  %v114_v0 = vadd.f32 %v520_v47, %v103_v62 }
 0x13f   :  { %134 = vst.msk [vmem:[#allocation3 + $0x8] sm:$0xf] %vm131_vm1, %v547_v63 }
 0x140   :  { %v548_v1 = vpack.c.bf16 %v114_v0, %v114_v0 }
 0x142   :  { %135 = vst.msk [vmem:[#allocation3 + $0xc] sm:$0xf] %vm131_vm1, %v548_v1 }
 0x145   :  { %v617_v6 = vld [vmem:[#allocation3] sm:$0xff]  }
 0x146   :  { %589 = vmatprep.mubr.msk.bf16.mxu0 %vm39_vm0, %v617_v6 }
 0x149   :  { %v618_v7 = vld [vmem:[#allocation3 + $0x8] sm:$0xff]  }
 0x14a   :  { %590 = vmatmul.mubr.msk.bf16.vlgmr.msra.gmra.mxu0 %vm39_vm0, %v618_v7 }
 0x20a   :  { %v591_v18 = vpop.f32.mrf.mxu0 }
 0x20b   :  { %v772_v19 = vadd.f32 %v591_v18, %v525_v17 }
 0x20c   :  { %v218_v20 = vpop.f32.mrf.mxu0 }
 0x20d   :  { %v775_v21 = vmul.f32 0.70710677, %v772_v19  ;;  %v777_v22 = vadd.f32 %v525_v17, %v218_v20 }
 0x20e   :  { %v592_v23 = vpop.f32.mrf.mxu0 }
 0x20f   :  { %v251_v24 = vand.u32 2147483647, %v775_v21  ;;  %v781_v25 = vmul.f32 0.70710677, %v777_v22  ;;  %v783_v26 = vadd.f32 %v592_v23, %v525_v17  ;;  %vm243_vm2 = vcmp.ge.f32.partialorder %v775_v21, 0.0 }
 0x210   :  { %v221_v27 = vpop.f32.mrf.mxu0 }
 0x211   :  { %v255_v28 = vmul.f32 0.3275911, %v251_v24  ;;  %v249_v29 = vand.u32 2147483647, %v781_v25  ;;  %v787_v30 = vmul.f32 0.70710677, %v783_v26  ;;  %v789_v31 = vadd.f32 %v525_v17, %v221_v27 }
 0x212   :  { %v303_v42 = vsub.f32 0.0, %v251_v24  ;;  %vm241_vm3 = vcmp.ge.f32.partialorder %v781_v25, 0.0 }
 0x213   :  { %v259_v32 = vadd.f32 1.0, %v255_v28  ;;  %v253_v33 = vmul.f32 0.3275911, %v249_v29  ;;  %v252_v34 = vand.u32 2147483647, %v787_v30  ;;  %v301_v43 = vsub.f32 0.0, %v249_v29 }
 0x214   :  { %v793_v35 = vmul.f32 0.70710677, %v789_v31  ;;  %v307_v44 = vmul.f32 %v303_v42, %v251_v24  ;;  %vm244_vm4 = vcmp.ge.f32.partialorder %v787_v30, 0.0 }
 0x215   :  { %635 = vrcp.f32 %v259_v32  ;;  %v257_v36 = vadd.f32 1.0, %v253_v33  ;;  %v256_v37 = vmul.f32 0.3275911, %v252_v34  ;;  %v304_v45 = vsub.f32 0.0, %v252_v34 }
 0x216   :  { %v250_v38 = vand.u32 2147483647, %v793_v35  ;;  %v305_v47 = vmul.f32 %v301_v43, %v249_v29  ;;  %v313_v50 = vmul.f32 1.442695, %v307_v44  ;;  %vm242_vm5 = vcmp.ge.f32.partialorder %v793_v35, 0.0 }
 0x217   :  { %637 = vrcp.f32 %v257_v36  ;;  %v260_v39 = vadd.f32 1.0, %v256_v37  ;;  %v308_v51 = vmul.f32 %v304_v45, %v252_v34 }
 0x218   :  { %v254_v40 = vmul.f32 0.3275911, %v250_v38  ;;  %v302_v49 = vsub.f32 0.0, %v250_v38  ;;  %v309_v54 = vmul.f32 1.442695, %v305_v47 }
 0x219   :  { %639 = vrcp.f32 %v260_v39  ;;  %v315_v60 = vmul.f32 1.442695, %v308_v51  ;;  %v652_v51 = vmov -1.0  }
 0x21a   :  { %v258_v41 = vadd.f32 1.0, %v254_v40  ;;  %v306_v58 = vmul.f32 %v302_v49, %v250_v38 }
 0x21c   :  { %641 = vrcp.f32 %v258_v41  ;;  %v311_v7 = vmul.f32 1.442695, %v306_v58 }
 0x21d   :  { %643 = vpow2.f32 %v313_v50 }
 0x21e   :  { %645 = vpow2.f32 %v309_v54  ;;  %v245_v54 = vsel %vm241_vm3, 1.0, %v652_v51 }
 0x21f   :  { %647 = vpow2.f32 %v315_v60  ;;  %v246_v60 = vsel %vm242_vm5, 1.0, %v652_v51 }
 0x220   :  { %649 = vpow2.f32 %v311_v7  ;;  %v235_v7 = vmul.f32 0.5, %v772_v19 }
 0x222   :  { %v636_v46 = vpop.eup %635 }
 0x223   :  { %v267_v48 = vmul.f32 1.0614054, %v636_v46 }
 0x224   :  { %v638_v52 = vpop.eup %637 }
 0x225   :  { %v271_v53 = vadd.f32 -1.4531521, %v267_v48  ;;  %v265_v55 = vmul.f32 1.0614054, %v638_v52 }
 0x226   :  { %v640_v56 = vpop.eup %639 }
 0x227   :  { %v275_v57 = vmul.f32 %v636_v46, %v271_v53  ;;  %v268_v59 = vmul.f32 1.0614054, %v640_v56  ;;  %v269_v61 = vadd.f32 -1.4531521, %v265_v55  ;;  %v247_v53 = vsel %vm243_vm2, 1.0, %v652_v51 }
 0x228   :  { %v248_v55 = vsel %vm244_vm4, 1.0, %v652_v51 }
 0x229   :  { %v279_v62 = vadd.f32 1.4214138, %v275_v57  ;;  %v642_v63 = vpop.eup %641  ;;  %v272_v0 = vadd.f32 -1.4531521, %v268_v59  ;;  %v273_v1 = vmul.f32 %v638_v52, %v269_v61 }
 0x22a   :  { %v266_v8 = vmul.f32 1.0614054, %v642_v63  ;;  %v644_v34 = vpop.eup %643 }
 0x22b   :  { %v283_v6 = vmul.f32 %v636_v46, %v279_v62  ;;  %v276_v9 = vmul.f32 %v640_v56, %v272_v0  ;;  %v277_v10 = vadd.f32 1.4214138, %v273_v1  ;;  %v646_v40 = vpop.eup %645  ;;  %v233_v0 = vmul.f32 0.5, %v777_v22 }
 0x22c   :  { %v270_v12 = vadd.f32 -1.4531521, %v266_v8  ;;  %v648_v44 = vpop.eup %647  ;;  %v234_v1 = vmul.f32 0.5, %v789_v31 }
 0x22d   :  { %v287_v11 = vadd.f32 -0.28449672, %v283_v6  ;;  %v280_v13 = vadd.f32 1.4214138, %v276_v9  ;;  %v281_v14 = vmul.f32 %v638_v52, %v277_v10  ;;  %v650_v50 = vpop.eup %649 }
 0x22e   :  { %v274_v16 = vmul.f32 %v642_v63, %v270_v12 }
 0x22f   :  { %v291_v15 = vmul.f32 %v636_v46, %v287_v11  ;;  %v284_v17 = vmul.f32 %v640_v56, %v280_v13  ;;  %v285_v18 = vadd.f32 -0.28449672, %v281_v14  ;;  %v339_v13 = vld [vmem:[#allocation2 + $0x10] sm:$0xff] }
 0x230   :  { %v278_v23 = vadd.f32 1.4214138, %v274_v16 }
 0x231   :  { %v295_v20 = vadd.f32 0.2548296, %v291_v15  ;;  %v288_v24 = vadd.f32 -0.28449672, %v284_v17  ;;  %v289_v27 = vmul.f32 %v638_v52, %v285_v18  ;;  %v337_v15 = vld [vmem:[#allocation2] sm:$0xff]  ;;  %v340_v17 = vld [vmem:[#allocation2 + $0x18] sm:$0xff] }
 0x232   :  { %v282_v29 = vmul.f32 %v642_v63, %v278_v23  ;;  %v338_v18 = vld [vmem:[#allocation2 + $0x8] sm:$0xff] }
 0x233   :  { %v299_v28 = vmul.f32 %v636_v46, %v295_v20  ;;  %v292_v32 = vmul.f32 %v640_v56, %v288_v24  ;;  %v293_v33 = vadd.f32 0.2548296, %v289_v27  ;;  %v540_v27 = vld [vmem:[%s837_s6] ss:$0 sm:$0xff] }
 0x234   :  { %v286_v36 = vadd.f32 -0.28449672, %v282_v29 }
 0x235   :  { %v319_v37 = vmul.f32 %v644_v34, %v299_v28  ;;  %v296_v38 = vadd.f32 0.2548296, %v292_v32  ;;  %v297_v39 = vmul.f32 %v638_v52, %v293_v33 }
 0x236   :  { %v290_v41 = vmul.f32 %v642_v63, %v286_v36 }
 0x237   :  { %v300_v42 = vmul.f32 %v640_v56, %v296_v38  ;;  %v317_v43 = vmul.f32 %v646_v40, %v297_v39  ;;  %v323_v47 = vsub.f32 1.0, %v319_v37 }
 0x238   :  { %v294_v45 = vadd.f32 0.2548296, %v290_v41 }
 0x239   :  { %v320_v46 = vmul.f32 %v648_v44, %v300_v42  ;;  %v321_v48 = vsub.f32 1.0, %v317_v43  ;;  %v327_v21 = vmul.f32 %v323_v47, %v247_v53 }
 0x23a   :  { %v298_v49 = vmul.f32 %v642_v63, %v294_v45  ;;  %v236_v63 = vmul.f32 0.5, %v783_v26 }
 0x23b   :  { %v324_v52 = vsub.f32 1.0, %v320_v46  ;;  %v325_v57 = vmul.f32 %v321_v48, %v245_v54  ;;  %v331_v62 = vadd.f32 1.0, %v327_v21 }
 0x23c   :  { %v318_v56 = vmul.f32 %v650_v50, %v298_v49 }
 0x23d   :  { %v328_v58 = vmul.f32 %v324_v52, %v248_v55  ;;  %v329_v30 = vadd.f32 1.0, %v325_v57  ;;  %v335_v10 = vmul.f32 %v331_v62, %v235_v7 }
 0x23e   :  { %v322_v25 = vsub.f32 1.0, %v318_v56 }
 0x23f   :  { %v332_v59 = vadd.f32 1.0, %v328_v58  ;;  %v333_v8 = vmul.f32 %v329_v30, %v233_v0 }
 0x240   :  { %v326_v61 = vmul.f32 %v322_v25, %v246_v60 }
 0x241   :  { %v336_v35 = vmul.f32 %v332_v59, %v236_v63 }
 0x242   :  { %v330_v6 = vadd.f32 1.0, %v326_v61 }
 0x243   :  { %v342_v12 = vpack.c.bf16 %v336_v35, %v335_v10 }
 0x244   :  { %v334_v9 = vmul.f32 %v330_v6, %v234_v1 }
 0x246   :  { %v341_v11 = vpack.c.bf16 %v334_v9, %v333_v8 }
 0x248   :  { %609 = vmatprep.mubr.bf16.mxu1 %v341_v11 }
 0x249   :  { %610 = vmatmul.mubr.bf16.vlgmr.msra.gmra.mxu1 %v342_v12 }
 0x309   :  { %v611_v14 = vpop.f32.mrf.mxu1 }
 0x30a   :  { %v458_v16 = vadd.f32 %v611_v14, %v339_v13 }
 0x30b   :  { %v441_v26 = vpop.f32.mrf.mxu1 }
 0x30c   :  { %462 = vst.msk [vmem:[#allocation2 + $0x10] sm:$0xff] %vm39_vm0, %v458_v16  ;;  %v456_v22 = vadd.f32 %v441_v26, %v337_v15 }
 0x30d   :  { %v612_v31 = vpop.f32.mrf.mxu1 }
 0x30e   :  { %460 = vst.msk [vmem:[#allocation2] sm:$0xff] %vm39_vm0, %v456_v22  ;;  %v459_v19 = vadd.f32 %v612_v31, %v340_v17 }
 0x30f   :  { %v444_v20 = vpop.f32.mrf.mxu1 }
 0x310   :  { %463 = vst.msk [vmem:[#allocation2 + $0x18] sm:$0xff] %vm39_vm0, %v459_v19  ;;  %v457_v23 = vadd.f32 %v444_v20, %v338_v18 }
 0x312   :  { %461 = vst.msk [vmem:[#allocation2 + $0x8] sm:$0xff] %vm39_vm0, %v457_v23 }
 0x313   :  { %v477_v24 = vld [vmem:[#allocation2 + $0x10] sm:$0xff] }
 0x314   :  { %v481_v28 = vadd.f32 %v703_v4, %v477_v24 }
 0x315   :  { %v475_v29 = vld [vmem:[#allocation2] sm:$0xff] }
 0x316   :  { %v492_v32 = vadd.f32 %v540_v27, %v481_v28  ;;  %v479_v33 = vadd.f32 %v699_v2, %v475_v29 }
 0x317   :  { %v478_v34 = vld [vmem:[#allocation2 + $0x18] sm:$0xff] }
 0x318   :  { %v551_v36 = vpack.c.bf16 %v492_v32, %v492_v32  ;;  %v490_v37 = vadd.f32 %v540_v27, %v479_v33  ;;  %v482_v38 = vadd.f32 %v705_v5, %v478_v34 }
 0x319   :  { %v476_v39 = vld [vmem:[#allocation2 + $0x8] sm:$0xff] }
 0x31a   :  { %513 = vst.msk [vmem:[%s838_s7 + $0x8] sm:$0xf] %vm131_vm1, %v551_v36  ;;  %v549_v40 = vpack.c.bf16 %v490_v37, %v490_v37  ;;  %v493_v41 = vadd.f32 %v540_v27, %v482_v38  ;;  %v480_v42 = vadd.f32 %v701_v3, %v476_v39 }
 0x31c   :  { %511 = vst.msk [vmem:[%s838_s7] sm:$0xf] %vm131_vm1, %v549_v40  ;;  %v552_v2 = vpack.c.bf16 %v493_v41, %v493_v41  ;;  %v491_v4 = vadd.f32 %v540_v27, %v480_v42 }
 0x31e   :  { %514 = vst.msk [vmem:[%s838_s7 + $0xc] sm:$0xf] %vm131_vm1, %v552_v2  ;;  %v550_v5 = vpack.c.bf16 %v491_v4, %v491_v4 }
 0x320   :  { %512 = vst.msk [vmem:[%s838_s7 + $0x4] sm:$0xf] %vm131_vm1, %v550_v5 }

// kernel: multimodal_moe_forward.35
= control target key start
LH: loop header
LB: loop body
LE: loop exit
PB: predicated region body
PF: predicated region fallthrough
CT: control target
= control target key end

     0   :  { %vm27_vm0 = vcmask 261120   ;;  %v196_v15 = vmov 0.0   ;;  %vm197_vm1 = vmmov 0   ;;  %vm81_vm2 = vcmask 257024   ;;  %s260_s0 = inlined_call_operand.vmem [shape: f32[16,32], index: 0, kind: input, shape index: {}]   ;;  %s261_s3 = inlined_call_operand.vmem [shape: bf16[32,128], index: 3, kind: input, shape index: {}]   ;;  %s262_s1 = inlined_call_operand.vmem [shape: f32[1,32], index: 1, kind: input, shape index: {}]   ;;  %s263_s2 = inlined_call_operand.vmem [shape: f32[1,32], index: 2, kind: input, shape index: {}]   ;;  %s264_s4 = inlined_call_operand.vmem [shape: f32[1,128], index: 4, kind: input, shape index: {}]   ;;  %s265_s5 = inlined_call_operand.vmem [shape: f32[16,128], index: 5, kind: output, shape index: {}]  }
   0x1   :  { %v25_v0 = vld [vmem:[%s260_s0] sm:$0xff]  ;;  %v26_v1 = vld [vmem:[%s260_s0 + $0x8] sm:$0xff]  ;;  %179 = vmatprep.subr.bf16.mxu0 %v196_v15  ;;  %183 = vmatprep.mubr.msk.bf16.mxu0 %vm197_vm1, %v196_v15 }
   0x2   :  { %v28_v2 = vsel %vm27_vm0, %v25_v0, 0.0  ;;  %v31_v3 = vsel %vm27_vm0, %v26_v1, 0.0  ;;  %v189_v14 = vld [vmem:[%s261_s3 + $0x8] sm:$0xff]   ;;  %v190_v16 = vld [vmem:[%s261_s3] sm:$0xff]  }
   0x3   :  { %29 = vadd.xlane.f32.xlu0 %v28_v2  ;;  %180 = vmatpush3.bf16.msra.mxu0 %v189_v14  ;;  %v165_v24 = vld [vmem:[%s262_s1] ss:$0 sm:$0xff] }
   0x4   :  { %181 = vmatprep.subr.bf16.mxu0 %v196_v15  ;;  %v166_v26 = vld [vmem:[%s263_s2] ss:$0 sm:$0xff] }
   0x5   :  { %v169_v36 = vld [vmem:[%s264_s4] ss:$0 sm:$0xff] }
   0x7   :  { %32 = vadd.xlane.f32.xlu0 %v31_v3  ;;  %182 = vmatpush3.bf16.msra.mxu0 %v190_v16 }
  0x8c   :  { %v30_v4 = vpop.xlane.xlu0 %29 }
  0x8d   :  { %v35_v5 = vmul.f32 0.03125, %v30_v4 }
  0x8f   :  { %v37_v6 = vsub.f32 %v25_v0, %v35_v5 }
  0x90   :  { %v33_v7 = vpop.xlane.xlu0 %32 }
  0x91   :  { %v36_v8 = vmul.f32 0.03125, %v33_v7  ;;  %v39_v9 = vmul.f32 %v37_v6, %v37_v6 }
  0x93   :  { %v38_v10 = vsub.f32 %v26_v1, %v36_v8  ;;  %v41_v11 = vsel %vm27_vm0, %v39_v9, 0.0 }
  0x94   :  { %42 = vadd.xlane.f32.xlu1 %v41_v11 }
  0x95   :  { %v40_v12 = vmul.f32 %v38_v10, %v38_v10 }
  0x97   :  { %v44_v13 = vsel %vm27_vm0, %v40_v12, 0.0 }
  0x98   :  { %45 = vadd.xlane.f32.xlu1 %v44_v13 }
 0x11d   :  { %v43_v17 = vpop.xlane.xlu1 %42 }
 0x11e   :  { %v47_v18 = vmul.f32 0.03125, %v43_v17 }
 0x120   :  { %v49_v19 = vadd.f32 1e-05, %v47_v18 }
 0x121   :  { %v46_v20 = vpop.xlane.xlu1 %45 }
 0x122   :  { %192 = vrsqrt.f32 %v49_v19  ;;  %v48_v21 = vmul.f32 0.03125, %v46_v20 }
 0x124   :  { %v50_v22 = vadd.f32 1e-05, %v48_v21 }
 0x126   :  { %194 = vrsqrt.f32 %v50_v22 }
 0x12f   :  { %v193_v23 = vpop.eup %192 }
 0x130   :  { %v53_v25 = vmul.f32 %v193_v23, %v37_v6 }
 0x132   :  { %v62_v27 = vmul.f32 %v165_v24, %v53_v25 }
 0x133   :  { %v195_v28 = vpop.eup %194 }
 0x134   :  { %v71_v29 = vadd.f32 %v166_v26, %v62_v27  ;;  %v54_v30 = vmul.f32 %v195_v28, %v38_v10 }
 0x136   :  { %v174_v31 = vpack.c.bf16 %v71_v29, %v71_v29  ;;  %v63_v32 = vmul.f32 %v165_v24, %v54_v30 }
 0x138   :  { %82 = vst.msk [vmem:[#allocation2] sm:$0xf] %vm81_vm2, %v174_v31  ;;  %v72_v33 = vadd.f32 %v166_v26, %v63_v32 }
 0x13a   :  { %v175_v34 = vpack.c.bf16 %v72_v33, %v72_v33 }
 0x13c   :  { %83 = vst.msk [vmem:[#allocation2 + $0x4] sm:$0xf] %vm81_vm2, %v175_v34 }
 0x143   :  { %v191_v35 = vld [vmem:[#allocation2] sm:$0xff]  }
 0x144   :  { %184 = vmatmul.mubr.msk.bf16.vlgmr.msra.gmra.mxu0 %vm27_vm0, %v191_v35 }
 0x204   :  { %v152_v37 = vpop.f32.mrf.mxu0 }
 0x205   :  { %v153_v38 = vadd.f32 %v169_v36, %v152_v37 }
 0x206   :  { %v185_v39 = vpop.f32.mrf.mxu0 }
 0x207   :  { %159 = vst [vmem:[%s265_s5] sm:$0xff] %v153_v38 }
 0x208   :  { %v155_v40 = vpop.f32.mrf.mxu0 }
 0x209   :  { %v156_v41 = vadd.f32 %v169_v36, %v155_v40 }
 0x20a   :  { %v186_v42 = vpop.f32.mrf.mxu0 }
 0x20b   :  { %160 = vst [vmem:[%s265_s5 + $0x8] sm:$0xff] %v156_v41 }

</bundles_post_ra>
